<compile_context>
chip_gen: v7x
topology: tpu7x:2x2x1
jax: 0.10.0
libtpu: 0.0.40
codegen_flags: <defaults>
</compile_context>

<pallas_src>
import functools

import jax
import jax.numpy as jnp
import numpy as np
from jax import lax
from jax.experimental import pallas as pl
from jax.experimental.pallas import tpu as pltpu


def _round_up(x, m):
    return (x + m - 1) // m * m


# ----------------------------------------------------------------------------
# Generation-aware VMEM budget + time-chunk sizing.
# ----------------------------------------------------------------------------
def _physical_vmem_bytes():
    """Best-effort per-TensorCore VMEM capacity; conservative v7x fallback."""
    default = 64 * 1024 * 1024
    try:
        info = pltpu.get_tpu_info()
    except Exception:
        return default
    for name in ("vmem_capacity_bytes", "vmem_size_bytes", "vmem_bytes"):
        v = getattr(info, name, None)
        if isinstance(v, int) and v > 0:
            return v
    return default


def _vmem_limit_bytes():
    # ~25% headroom for compiler scratch: ~48 MiB on v7x, ~96 MiB on v5e/v6e.
    return (_physical_vmem_bytes() * 3) // 4


def _pick_time_chunk(T, Bp, Hp, vmem_limit):
    """Size the per-grid-step time chunk from the VMEM budget (8..32 steps)."""
    G = 3 * Hp
    # double-buffered gi chunk (bf16) + double-buffered out chunk (f32), per step
    per_step = Bp * (2 * G * 2 + 2 * Hp * 4)
    # resident w_hh^T (bf16, single-buffered) + b_hn + h scratch + slack
    fixed = Hp * G * 2 + Hp * 4 + Bp * Hp * 4 + (8 << 20)
    avail = vmem_limit - fixed
    tc = 8
    if avail > 0:
        tc = int(avail // per_step)
    tc = max(8, min(32, (tc // 8) * 8))
    return min(tc, _round_up(T, 8))


# ----------------------------------------------------------------------------
# Pallas kernel: one grid step == one (direction, time-chunk).  The hidden
# state lives in a VMEM scratch that persists across the time-chunk axis
# (reset at chunk 0 of each direction via pl.when).
# ----------------------------------------------------------------------------
def _gru_chunk_kernel(gi_ref, whh_ref, bhn_ref, out_ref, h_ref, *,
                      hidden_pad, chunk, unroll):
    c = pl.program_id(1)

    @pl.when(c == 0)
    def _():
        h_ref[...] = jnp.zeros_like(h_ref)

    Hp = hidden_pad
    whh = whh_ref[...]            # (Hp, 3*Hp) bf16, resident per direction
    # Hoisted out of the per-step loop: JAX does not CSE broadcast_in_dim.
    bhn_b = jnp.broadcast_to(bhn_ref[...], h_ref.shape)   # (Bp, Hp) f32

    def step(j, h):
        # gi is streamed as bf16 (halves the dominant HBM stream); upcast here.
        gi_t = gi_ref[j].astype(jnp.float32)               # (Bp, 3*Hp)
        gh = jnp.dot(h.astype(jnp.bfloat16), whh,
                     preferred_element_type=jnp.float32)   # (Bp, 3*Hp)
        # sigmoid(x) = 0.5*(1 + tanh(x/2)): one EUP pass instead of exp + recip.
        r_t = 0.5 * (1.0 + jnp.tanh(0.5 * (gh[:, :Hp] + gi_t[:, :Hp])))
        z_t = 0.5 * (1.0 + jnp.tanh(0.5 * (gh[:, Hp:2 * Hp] + gi_t[:, Hp:2 * Hp])))
        n_t = jnp.tanh(r_t * (gh[:, 2 * Hp:] + bhn_b) + gi_t[:, 2 * Hp:])
        h_new = n_t + z_t * (h - n_t)
        out_ref[j] = h_new
        return h_new

    # fori_loop (not a Python `for`) bounds register live ranges for large
    # chunks; small chunks are fully unrolled for LLO scheduler visibility.
    h_ref[...] = lax.fori_loop(0, chunk, step, h_ref[...], unroll=unroll)


# ----------------------------------------------------------------------------
# Per-cell weight preparation: pad H -> Hp (multiple of 128), transpose, put
# each gate in its own lane-aligned slab, fold biases.
# ----------------------------------------------------------------------------
def _prep_cell(w_ih, w_hh, b_ih, b_hh, *, Hp, G):
    H = w_hh.shape[1]
    D = w_ih.shape[1]
    b_ih = b_ih.reshape(-1)
    b_hh = b_hh.reshape(-1)

    wih_t_p = jnp.zeros((D, G), jnp.float32)     # x-side weights (per-gate slabs)
    whh_t_p = jnp.zeros((Hp, G), jnp.float32)    # h-side weights (per-gate slabs)
    bias_fold = jnp.zeros((G,), jnp.float32)     # b_ih (+ b_hh for r,z) folded
    bhn_p = jnp.zeros((Hp,), jnp.float32)        # b_hn kept separate (scaled by r_t)

    for g in range(3):
        wih_t_p = wih_t_p.at[:, g * Hp:g * Hp + H].set(w_ih[g * H:(g + 1) * H, :].T)
        whh_t_p = whh_t_p.at[:H, g * Hp:g * Hp + H].set(w_hh[g * H:(g + 1) * H, :].T)
        fold = b_ih[g * H:(g + 1) * H]
        if g < 2:                                 # r and z gates: b_hh folds exactly
            fold = fold + b_hh[g * H:(g + 1) * H]
        bias_fold = bias_fold.at[g * Hp:g * Hp + H].set(fold)
    bhn_p = bhn_p.at[:H].set(b_hh[2 * H:3 * H])

    return (wih_t_p, whh_t_p.astype(jnp.bfloat16), bias_fold, bhn_p.reshape(1, Hp))


# ----------------------------------------------------------------------------
# GRU2 forward (jitted core).
# ----------------------------------------------------------------------------
@functools.partial(
    jax.jit,
    static_argnames=("bidirectional", "time_chunk", "vmem_limit",
                     "single_buffer_weights"))
def _gru2_forward_impl(x_btd, params, bidirectional, time_chunk, vmem_limit,
                       single_buffer_weights):
    x = x_btd.astype(jnp.float32)
    B, T, D = x.shape
    H = params["fw"][1].shape[1]

    Hp = _round_up(H, 128)            # lane-aligned per-gate width
    G = 3 * Hp
    Bp = _round_up(B, 8)              # sublane-aligned batch
    TC = max(1, min(int(time_chunk), _round_up(T, 8)))
    Tp = _round_up(T, TC)
    unroll = TC <= 16                 # full unroll only for small chunks

    dirs = ("fw", "bw") if bidirectional else ("fw",)
    ndir = len(dirs)

    prepped = [_prep_cell(*params[d], Hp=Hp, G=G) for d in dirs]
    wih_stack = jnp.stack([p[0] for p in prepped])          # (ndir, D, G)  f32
    whh_stack = jnp.stack([p[1] for p in prepped])          # (ndir, Hp, G) bf16
    bias_fold = jnp.stack([p[2] for p in prepped])          # (ndir, G)     f32
    bhn_stack = jnp.stack([p[3] for p in prepped])          # (ndir, 1, Hp) f32

    # Time-major, batch-padded input; backward direction gets a time-reversed
    # copy (x has only D columns, cheap vs. gi).
    x_tbd = jnp.transpose(x, (1, 0, 2))                     # (T, B, D)
    x_tbd = jnp.pad(x_tbd, ((0, 0), (0, Bp - B), (0, 0)))   # (T, Bp, D)
    x_dirs = [x_tbd] + ([x_tbd[::-1]] if bidirectional else [])
    x_stack = jnp.stack(x_dirs)                             # (ndir, T, Bp, D)

    # Hoisted input projection for ALL time steps / directions: one big bf16
    # batched matmul with f32 accumulation; biases folded; streamed as bf16.
    gi = jnp.einsum("ntbd,ndg->ntbg",
                    x_stack.astype(jnp.bfloat16),
                    wih_stack.astype(jnp.bfloat16),
                    preferred_element_type=jnp.float32)
    gi = (gi + bias_fold[:, None, None, :]).astype(jnp.bfloat16)
    gi = jnp.pad(gi, ((0, 0), (0, Tp - T), (0, 0), (0, 0)))  # (ndir, Tp, Bp, G) bf16

    kernel = functools.partial(_gru_chunk_kernel, hidden_pad=Hp, chunk=TC,
                               unroll=unroll)

    # Resident per-direction operands: index_map is constant along the
    # time-chunk axis, so single-buffer them to save VMEM.
    if single_buffer_weights:
        whh_spec = pl.BlockSpec((None, Hp, G), lambda d, c: (d, 0, 0),
                                pipeline_mode=pl.Buffered(1))
        bhn_spec = pl.BlockSpec((None, 1, Hp), lambda d, c: (d, 0, 0),
                                pipeline_mode=pl.Buffered(1))
    else:
        whh_spec = pl.BlockSpec((None, Hp, G), lambda d, c: (d, 0, 0))
        bhn_spec = pl.BlockSpec((None, 1, Hp), lambda d, c: (d, 0, 0))

    out_p = pl.pallas_call(
        kernel,
        out_shape=jax.ShapeDtypeStruct((ndir, Tp, Bp, Hp), jnp.float32),
        grid_spec=pltpu.PrefetchScalarGridSpec(
            num_scalar_prefetch=0,
            grid=(ndir, Tp // TC),
            in_specs=[
                pl.BlockSpec((None, TC, Bp, G), lambda d, c: (d, c, 0, 0)),  # gi chunk (bf16)
                whh_spec,                                                    # w_hh^T (resident)
                bhn_spec,                                                    # b_hn
            ],
            out_specs=pl.BlockSpec((None, TC, Bp, Hp), lambda d, c: (d, c, 0, 0)),
            scratch_shapes=[pltpu.VMEM((Bp, Hp), jnp.float32)],              # carried hidden state
        ),
        compiler_params=pltpu.CompilerParams(
            # direction axis parallel (2 TCs on v7x); time axis is the recurrence.
            dimension_semantics=("parallel", "arbitrary"),
            vmem_limit_bytes=int(vmem_limit),
        ),
    )(gi, whh_stack, bhn_stack)

    out_fw = out_p[0, :T, :B, :H]                    # (T, B, H) time-major
    outputs = jnp.transpose(out_fw, (1, 0, 2))       # (B, T, H)
    h_fw = outputs[:, -1, :]
    if not bidirectional:
        return outputs, h_fw

    out_bw_rev = out_p[1, :T, :B, :H]                # backward cell, reversed time
    outputs_rev = jnp.transpose(out_bw_rev[::-1], (1, 0, 2))   # (B, T, H) original order
    h_bw = outputs_rev[:, 0, :]
    return outputs, h_fw, h_bw


def gru2_forward(x_btd, params, bidirectional=False, time_chunk=None,
                 single_buffer_weights=True):
    """GRU2 forward.  Returns (outputs, h_fw) or (outputs, h_fw, h_bw)."""
    B, T, _ = x_btd.shape
    H = params["fw"][1].shape[1]
    Hp = _round_up(H, 128)
    Bp = _round_up(B, 8)
    vmem_limit = _vmem_limit_bytes()
    if time_chunk is None:
        time_chunk = _pick_time_chunk(T, Bp, Hp, vmem_limit)
    return _gru2_forward_impl(x_btd, params,
                              bidirectional=bool(bidirectional),
                              time_chunk=int(time_chunk),
                              vmem_limit=int(vmem_limit),
                              single_buffer_weights=bool(single_buffer_weights))


# ----------------------------------------------------------------------------
# Deterministic parameter init, mirroring GRUCellV2.__init__:
#   uniform in [-K, K] with K = 1/sqrt(hidden_size)
# ----------------------------------------------------------------------------
def init_gru_cell_params(key, input_size, hidden_size):
    K = 1.0 / np.sqrt(hidden_size)
    k1, k2, k3, k4 = jax.random.split(key, 4)
    w_ih = jax.random.uniform(k1, (3 * hidden_size, input_size), jnp.float32, -K, K)
    w_hh = jax.random.uniform(k2, (3 * hidden_size, hidden_size), jnp.float32, -K, K)
    b_ih = jax.random.uniform(k3, (3 * hidden_size, 1), jnp.float32, -K, K)
    b_hh = jax.random.uniform(k4, (3 * hidden_size, 1), jnp.float32, -K, K)
    return (w_ih, w_hh, b_ih, b_hh)


# ----------------------------------------------------------------------------
# Pure-JAX f32 reference (lax.scan) used as a correctness check of the kernel.
# ----------------------------------------------------------------------------
def _gru_ref(x_btd, cell_params):
    w_ih, w_hh, b_ih, b_hh = cell_params
    H = w_hh.shape[1]

    def step(h, x_t):
        gi = x_t @ w_ih.T + b_ih.reshape(1, -1)
        gh = h @ w_hh.T + b_hh.reshape(1, -1)
        w_ir, w_iz, w_in = jnp.split(gi, 3, axis=1)
        w_hr, w_hz, w_hn = jnp.split(gh, 3, axis=1)
        r = jax.nn.sigmoid(w_hr + w_ir)
        z = jax.nn.sigmoid(w_hz + w_iz)
        n = jnp.tanh(r * w_hn + w_in)
        h_new = n + z * (h - n)
        return h_new, h_new

    B = x_btd.shape[0]
    h0 = jnp.zeros((B, H), jnp.float32)
    _, outs = jax.lax.scan(step, h0, jnp.transpose(x_btd, (1, 0, 2)))
    return jnp.transpose(outs, (1, 0, 2))


if __name__ == "__main__":
    # TODO(synk): v5e/v6e direction-fusion (both cells per step in one body) and
    # the v7x batch-parallel split for the unidirectional case are not applied;
    # the single-pallas_call parallel-direction layout is kept for simplicity.
    B, T, D, H = 4, 8, 16, 32

    key = jax.random.PRNGKey(0)
    k_x, k_fw, k_bw = jax.random.split(key, 3)
    x = jax.random.normal(k_x, (B, T, D), jnp.float32)

    params = {
        "fw": init_gru_cell_params(k_fw, D, H),
        "bw": init_gru_cell_params(k_bw, D, H),
    }

    # Prefer single-buffered resident weights; fall back gracefully if this
    # JAX build rejects pl.Buffered(1) for pallas_call operands.
    sbw = True
    try:
        outputs, h_fw, h_bw = gru2_forward(x, params, bidirectional=True,
                                           single_buffer_weights=sbw)
    except Exception:
        sbw = False
        outputs, h_fw, h_bw = gru2_forward(x, params, bidirectional=True,
                                           single_buffer_weights=sbw)
    jax.block_until_ready((outputs, h_fw, h_bw))

    # unidirectional path as well
    outputs_uni, h_uni = gru2_forward(x, params, bidirectional=False,
                                      single_buffer_weights=sbw)
    jax.block_until_ready((outputs_uni, h_uni))

    # correctness check against pure-JAX f32 reference (kernel matmuls and the
    # streamed input projection run in bf16 with f32 accumulation, hence the
    # relaxed tolerance)
    ref_fw = _gru_ref(x, params["fw"])
    ref_bw = _gru_ref(x[:, ::-1, :], params["bw"])[:, ::-1, :]
    np.testing.assert_allclose(np.asarray(outputs), np.asarray(ref_fw), atol=3e-2, rtol=3e-2)
    np.testing.assert_allclose(np.asarray(h_fw), np.asarray(ref_fw[:, -1, :]), atol=3e-2, rtol=3e-2)
    np.testing.assert_allclose(np.asarray(h_bw), np.asarray(ref_bw[:, 0, :]), atol=3e-2, rtol=3e-2)
    np.testing.assert_allclose(np.asarray(outputs_uni), np.asarray(ref_fw), atol=3e-2, rtol=3e-2)
    np.testing.assert_allclose(np.asarray(h_uni), np.asarray(ref_fw[:, -1, :]), atol=3e-2, rtol=3e-2)

    print("KERNEL_OK")
</pallas_src>

<mosaic_0001>
module attributes {stable_mosaic.version = 11 : i64} {
  func.func @_gru_chunk_kernel(%arg0: i32, %arg1: i32, %arg2: memref<1x8x8x384xbf16, #tpu.memory_space<vmem>>, %arg3: memref<1x128x384xbf16, #tpu.memory_space<vmem>>, %arg4: memref<1x1x128xf32, #tpu.memory_space<vmem>>, %arg5: memref<1x8x8x128xf32, #tpu.memory_space<vmem>>, %arg6: memref<8x128xf32, #tpu.memory_space<vmem>>) attributes {dimension_semantics = [#tpu.dimension_semantics<parallel>, #tpu.dimension_semantics<arbitrary>], iteration_bounds = array<i64: 2, 1>, scalar_prefetch = 0 : i64, scratch_operands = 1 : i64, tpu.core_type = #tpu.core_type<tc>, window_params = [{transform_indices = @transform_0, window_bounds = array<i64: 1, 8, 8, 384>}, {pipeline_mode = #tpu.pipeline_mode<synchronous>, transform_indices = @transform_1, window_bounds = array<i64: 1, 128, 384>}, {pipeline_mode = #tpu.pipeline_mode<synchronous>, transform_indices = @transform_2, window_bounds = array<i64: 1, 1, 128>}, {transform_indices = @transform_3, window_bounds = array<i64: 1, 8, 8, 128>}]} {
    %c0_i32 = arith.constant 0 : i32
    %0 = arith.cmpi eq, %arg1, %c0_i32 : i32
    %1 = arith.extui %0 : i1 to i32
    %c0_i32_0 = arith.constant 0 : i32
    %2 = arith.cmpi ne, %1, %c0_i32_0 : i32
    scf.if %2 {
      %cst_114 = arith.constant 0.000000e+00 : f32
      %323 = vector.broadcast %cst_114 : f32 to vector<8x128xf32>
      %c0_115 = arith.constant 0 : index
      %c0_116 = arith.constant 0 : index
      %324 = vector.load %arg6[%c0_115, %c0_116] : memref<8x128xf32, #tpu.memory_space<vmem>>, vector<8x128xf32>
      tpu.vector_store %arg6[%c0_115, %c0_116], %323 {strides = array<i32>} : memref<8x128xf32, #tpu.memory_space<vmem>>, vector<8x128xf32>,
    } else {
    }
    %c0 = arith.constant 0 : index
    %c0_1 = arith.constant 0 : index
    %c0_2 = arith.constant 0 : index
    %3 = vector.load %arg3[%c0, %c0_1, %c0_2] : memref<1x128x384xbf16, #tpu.memory_space<vmem>>, vector<1x128x384xbf16>
    %4 = vector.shape_cast %3 : vector<1x128x384xbf16> to vector<128x384xbf16>
    %c0_3 = arith.constant 0 : index
    %c0_4 = arith.constant 0 : index
    %c0_5 = arith.constant 0 : index
    %5 = vector.load %arg4[%c0_3, %c0_4, %c0_5] : memref<1x1x128xf32, #tpu.memory_space<vmem>>, vector<1x1x128xf32>
    %6 = vector.shape_cast %5 : vector<1x1x128xf32> to vector<1x128xf32>
    %7 = vector.shape_cast %6 : vector<1x128xf32> to vector<1x128xf32>
    %8 = vector.broadcast %7 : vector<1x128xf32> to vector<8x128xf32>
    %c0_6 = arith.constant 0 : index
    %c0_7 = arith.constant 0 : index
    %9 = vector.load %arg6[%c0_6, %c0_7] : memref<8x128xf32, #tpu.memory_space<vmem>>, vector<8x128xf32>
    %c0_i32_8 = arith.constant 0 : i32
    %c0_9 = arith.constant 0 : index
    %10 = arith.index_cast %c0_i32_8 : i32 to index
    %c0_10 = arith.constant 0 : index
    %c0_11 = arith.constant 0 : index
    %11 = vector.load %arg2[%c0_9, %10, %c0_10, %c0_11] : memref<1x8x8x384xbf16, #tpu.memory_space<vmem>>, vector<1x1x8x384xbf16>
    %12 = vector.shape_cast %11 : vector<1x1x8x384xbf16> to vector<8x384xbf16>
    %13 = arith.extf %12 : vector<8x384xbf16> to vector<8x384xf32>
    %14 = arith.truncf %9 : vector<8x128xf32> to vector<8x128xbf16>
    %cst = arith.constant dense<0.000000e+00> : vector<8x384xf32>
    %15 = tpu.matmul %14, %4, %cst {dimension_numbers = #tpu.dot_dimension_numbers<[1], [0], [0], [1], [0, 0, 1, 1], [], []>} : vector<8x128xbf16>, vector<128x384xbf16>, vector<8x384xf32> -> vector<8x384xf32>
    %16 = vector.extract_strided_slice %15 {offsets = [0, 0], sizes = [8, 128], strides = [1, 1]} : vector<8x384xf32> to vector<8x128xf32>
    %17 = vector.extract_strided_slice %13 {offsets = [0, 0], sizes = [8, 128], strides = [1, 1]} : vector<8x384xf32> to vector<8x128xf32>
    %18 = arith.addf %16, %17 : vector<8x128xf32>
    %cst_12 = arith.constant 5.000000e-01 : f32
    %19 = vector.broadcast %cst_12 : f32 to vector<8x128xf32>
    %20 = arith.mulf %19, %18 : vector<8x128xf32>
    %21 = math.tanh %20 : vector<8x128xf32>
    %cst_13 = arith.constant 1.000000e+00 : f32
    %22 = vector.broadcast %cst_13 : f32 to vector<8x128xf32>
    %23 = arith.addf %22, %21 : vector<8x128xf32>
    %cst_14 = arith.constant 5.000000e-01 : f32
    %24 = vector.broadcast %cst_14 : f32 to vector<8x128xf32>
    %25 = arith.mulf %24, %23 : vector<8x128xf32>
    %26 = vector.extract_strided_slice %15 {offsets = [0, 128], sizes = [8, 128], strides = [1, 1]} : vector<8x384xf32> to vector<8x128xf32>
    %27 = vector.extract_strided_slice %13 {offsets = [0, 128], sizes = [8, 128], strides = [1, 1]} : vector<8x384xf32> to vector<8x128xf32>
    %28 = arith.addf %26, %27 : vector<8x128xf32>
    %cst_15 = arith.constant 5.000000e-01 : f32
    %29 = vector.broadcast %cst_15 : f32 to vector<8x128xf32>
    %30 = arith.mulf %29, %28 : vector<8x128xf32>
    %31 = math.tanh %30 : vector<8x128xf32>
    %cst_16 = arith.constant 1.000000e+00 : f32
    %32 = vector.broadcast %cst_16 : f32 to vector<8x128xf32>
    %33 = arith.addf %32, %31 : vector<8x128xf32>
    %cst_17 = arith.constant 5.000000e-01 : f32
    %34 = vector.broadcast %cst_17 : f32 to vector<8x128xf32>
    %35 = arith.mulf %34, %33 : vector<8x128xf32>
    %36 = vector.extract_strided_slice %15 {offsets = [0, 256], sizes = [8, 128], strides = [1, 1]} : vector<8x384xf32> to vector<8x128xf32>
    %37 = arith.addf %36, %8 : vector<8x128xf32>
    %38 = arith.mulf %25, %37 : vector<8x128xf32>
    %39 = vector.extract_strided_slice %13 {offsets = [0, 256], sizes = [8, 128], strides = [1, 1]} : vector<8x384xf32> to vector<8x128xf32>
    %40 = arith.addf %38, %39 : vector<8x128xf32>
    %41 = math.tanh %40 : vector<8x128xf32>
    %42 = arith.subf %9, %41 : vector<8x128xf32>
    %43 = arith.mulf %35, %42 : vector<8x128xf32>
    %44 = arith.addf %41, %43 : vector<8x128xf32>
    %c0_18 = arith.constant 0 : index
    %45 = arith.index_cast %c0_i32_8 : i32 to index
    %c0_19 = arith.constant 0 : index
    %c0_20 = arith.constant 0 : index
    %46 = vector.load %arg5[%c0_18, %45, %c0_19, %c0_20] : memref<1x8x8x128xf32, #tpu.memory_space<vmem>>, vector<1x1x8x128xf32>
    %47 = vector.shape_cast %46 : vector<1x1x8x128xf32> to vector<8x128xf32>
    %48 = vector.shape_cast %44 : vector<8x128xf32> to vector<1x1x8x128xf32>
    tpu.vector_store %arg5[%c0_18, %45, %c0_19, %c0_20], %48 {strides = array<i32>} : memref<1x8x8x128xf32, #tpu.memory_space<vmem>>, vector<1x1x8x128xf32>,
    %c1_i32 = arith.constant 1 : i32
    %c0_21 = arith.constant 0 : index
    %49 = arith.index_cast %c1_i32 : i32 to index
    %c0_22 = arith.constant 0 : index
    %c0_23 = arith.constant 0 : index
    %50 = vector.load %arg2[%c0_21, %49, %c0_22, %c0_23] : memref<1x8x8x384xbf16, #tpu.memory_space<vmem>>, vector<1x1x8x384xbf16>
    %51 = vector.shape_cast %50 : vector<1x1x8x384xbf16> to vector<8x384xbf16>
    %52 = arith.extf %51 : vector<8x384xbf16> to vector<8x384xf32>
    %53 = arith.truncf %44 : vector<8x128xf32> to vector<8x128xbf16>
    %cst_24 = arith.constant dense<0.000000e+00> : vector<8x384xf32>
    %54 = tpu.matmul %53, %4, %cst_24 {dimension_numbers = #tpu.dot_dimension_numbers<[1], [0], [0], [1], [0, 0, 1, 1], [], []>} : vector<8x128xbf16>, vector<128x384xbf16>, vector<8x384xf32> -> vector<8x384xf32>
    %55 = vector.extract_strided_slice %54 {offsets = [0, 0], sizes = [8, 128], strides = [1, 1]} : vector<8x384xf32> to vector<8x128xf32>
    %56 = vector.extract_strided_slice %52 {offsets = [0, 0], sizes = [8, 128], strides = [1, 1]} : vector<8x384xf32> to vector<8x128xf32>
    %57 = arith.addf %55, %56 : vector<8x128xf32>
    %cst_25 = arith.constant 5.000000e-01 : f32
    %58 = vector.broadcast %cst_25 : f32 to vector<8x128xf32>
    %59 = arith.mulf %58, %57 : vector<8x128xf32>
    %60 = math.tanh %59 : vector<8x128xf32>
    %cst_26 = arith.constant 1.000000e+00 : f32
    %61 = vector.broadcast %cst_26 : f32 to vector<8x128xf32>
    %62 = arith.addf %61, %60 : vector<8x128xf32>
    %cst_27 = arith.constant 5.000000e-01 : f32
    %63 = vector.broadcast %cst_27 : f32 to vector<8x128xf32>
    %64 = arith.mulf %63, %62 : vector<8x128xf32>
    %65 = vector.extract_strided_slice %54 {offsets = [0, 128], sizes = [8, 128], strides = [1, 1]} : vector<8x384xf32> to vector<8x128xf32>
    %66 = vector.extract_strided_slice %52 {offsets = [0, 128], sizes = [8, 128], strides = [1, 1]} : vector<8x384xf32> to vector<8x128xf32>
    %67 = arith.addf %65, %66 : vector<8x128xf32>
    %cst_28 = arith.constant 5.000000e-01 : f32
    %68 = vector.broadcast %cst_28 : f32 to vector<8x128xf32>
    %69 = arith.mulf %68, %67 : vector<8x128xf32>
    %70 = math.tanh %69 : vector<8x128xf32>
    %cst_29 = arith.constant 1.000000e+00 : f32
    %71 = vector.broadcast %cst_29 : f32 to vector<8x128xf32>
    %72 = arith.addf %71, %70 : vector<8x128xf32>
    %cst_30 = arith.constant 5.000000e-01 : f32
    %73 = vector.broadcast %cst_30 : f32 to vector<8x128xf32>
    %74 = arith.mulf %73, %72 : vector<8x128xf32>
    %75 = vector.extract_strided_slice %54 {offsets = [0, 256], sizes = [8, 128], strides = [1, 1]} : vector<8x384xf32> to vector<8x128xf32>
    %76 = arith.addf %75, %8 : vector<8x128xf32>
    %77 = arith.mulf %64, %76 : vector<8x128xf32>
    %78 = vector.extract_strided_slice %52 {offsets = [0, 256], sizes = [8, 128], strides = [1, 1]} : vector<8x384xf32> to vector<8x128xf32>
    %79 = arith.addf %77, %78 : vector<8x128xf32>
    %80 = math.tanh %79 : vector<8x128xf32>
    %81 = arith.subf %44, %80 : vector<8x128xf32>
    %82 = arith.mulf %74, %81 : vector<8x128xf32>
    %83 = arith.addf %80, %82 : vector<8x128xf32>
    %c0_31 = arith.constant 0 : index
    %84 = arith.index_cast %c1_i32 : i32 to index
    %c0_32 = arith.constant 0 : index
    %c0_33 = arith.constant 0 : index
    %85 = vector.load %arg5[%c0_31, %84, %c0_32, %c0_33] : memref<1x8x8x128xf32, #tpu.memory_space<vmem>>, vector<1x1x8x128xf32>
    %86 = vector.shape_cast %85 : vector<1x1x8x128xf32> to vector<8x128xf32>
    %87 = vector.shape_cast %83 : vector<8x128xf32> to vector<1x1x8x128xf32>
    tpu.vector_store %arg5[%c0_31, %84, %c0_32, %c0_33], %87 {strides = array<i32>} : memref<1x8x8x128xf32, #tpu.memory_space<vmem>>, vector<1x1x8x128xf32>,
    %c2_i32 = arith.constant 2 : i32
    %c0_34 = arith.constant 0 : index
    %88 = arith.index_cast %c2_i32 : i32 to index
    %c0_35 = arith.constant 0 : index
    %c0_36 = arith.constant 0 : index
    %89 = vector.load %arg2[%c0_34, %88, %c0_35, %c0_36] : memref<1x8x8x384xbf16, #tpu.memory_space<vmem>>, vector<1x1x8x384xbf16>
    %90 = vector.shape_cast %89 : vector<1x1x8x384xbf16> to vector<8x384xbf16>
    %91 = arith.extf %90 : vector<8x384xbf16> to vector<8x384xf32>
    %92 = arith.truncf %83 : vector<8x128xf32> to vector<8x128xbf16>
    %cst_37 = arith.constant dense<0.000000e+00> : vector<8x384xf32>
    %93 = tpu.matmul %92, %4, %cst_37 {dimension_numbers = #tpu.dot_dimension_numbers<[1], [0], [0], [1], [0, 0, 1, 1], [], []>} : vector<8x128xbf16>, vector<128x384xbf16>, vector<8x384xf32> -> vector<8x384xf32>
    %94 = vector.extract_strided_slice %93 {offsets = [0, 0], sizes = [8, 128], strides = [1, 1]} : vector<8x384xf32> to vector<8x128xf32>
    %95 = vector.extract_strided_slice %91 {offsets = [0, 0], sizes = [8, 128], strides = [1, 1]} : vector<8x384xf32> to vector<8x128xf32>
    %96 = arith.addf %94, %95 : vector<8x128xf32>
    %cst_38 = arith.constant 5.000000e-01 : f32
    %97 = vector.broadcast %cst_38 : f32 to vector<8x128xf32>
    %98 = arith.mulf %97, %96 : vector<8x128xf32>
    %99 = math.tanh %98 : vector<8x128xf32>
    %cst_39 = arith.constant 1.000000e+00 : f32
    %100 = vector.broadcast %cst_39 : f32 to vector<8x128xf32>
    %101 = arith.addf %100, %99 : vector<8x128xf32>
    %cst_40 = arith.constant 5.000000e-01 : f32
    %102 = vector.broadcast %cst_40 : f32 to vector<8x128xf32>
    %103 = arith.mulf %102, %101 : vector<8x128xf32>
    %104 = vector.extract_strided_slice %93 {offsets = [0, 128], sizes = [8, 128], strides = [1, 1]} : vector<8x384xf32> to vector<8x128xf32>
    %105 = vector.extract_strided_slice %91 {offsets = [0, 128], sizes = [8, 128], strides = [1, 1]} : vector<8x384xf32> to vector<8x128xf32>
    %106 = arith.addf %104, %105 : vector<8x128xf32>
    %cst_41 = arith.constant 5.000000e-01 : f32
    %107 = vector.broadcast %cst_41 : f32 to vector<8x128xf32>
    %108 = arith.mulf %107, %106 : vector<8x128xf32>
    %109 = math.tanh %108 : vector<8x128xf32>
    %cst_42 = arith.constant 1.000000e+00 : f32
    %110 = vector.broadcast %cst_42 : f32 to vector<8x128xf32>
    %111 = arith.addf %110, %109 : vector<8x128xf32>
    %cst_43 = arith.constant 5.000000e-01 : f32
    %112 = vector.broadcast %cst_43 : f32 to vector<8x128xf32>
    %113 = arith.mulf %112, %111 : vector<8x128xf32>
    %114 = vector.extract_strided_slice %93 {offsets = [0, 256], sizes = [8, 128], strides = [1, 1]} : vector<8x384xf32> to vector<8x128xf32>
    %115 = arith.addf %114, %8 : vector<8x128xf32>
    %116 = arith.mulf %103, %115 : vector<8x128xf32>
    %117 = vector.extract_strided_slice %91 {offsets = [0, 256], sizes = [8, 128], strides = [1, 1]} : vector<8x384xf32> to vector<8x128xf32>
    %118 = arith.addf %116, %117 : vector<8x128xf32>
    %119 = math.tanh %118 : vector<8x128xf32>
    %120 = arith.subf %83, %119 : vector<8x128xf32>
    %121 = arith.mulf %113, %120 : vector<8x128xf32>
    %122 = arith.addf %119, %121 : vector<8x128xf32>
    %c0_44 = arith.constant 0 : index
    %123 = arith.index_cast %c2_i32 : i32 to index
    %c0_45 = arith.constant 0 : index
    %c0_46 = arith.constant 0 : index
    %124 = vector.load %arg5[%c0_44, %123, %c0_45, %c0_46] : memref<1x8x8x128xf32, #tpu.memory_space<vmem>>, vector<1x1x8x128xf32>
    %125 = vector.shape_cast %124 : vector<1x1x8x128xf32> to vector<8x128xf32>
    %126 = vector.shape_cast %122 : vector<8x128xf32> to vector<1x1x8x128xf32>
    tpu.vector_store %arg5[%c0_44, %123, %c0_45, %c0_46], %126 {strides = array<i32>} : memref<1x8x8x128xf32, #tpu.memory_space<vmem>>, vector<1x1x8x128xf32>,
    %c3_i32 = arith.constant 3 : i32
    %c0_47 = arith.constant 0 : index
    %127 = arith.index_cast %c3_i32 : i32 to index
    %c0_48 = arith.constant 0 : index
    %c0_49 = arith.constant 0 : index
    %128 = vector.load %arg2[%c0_47, %127, %c0_48, %c0_49] : memref<1x8x8x384xbf16, #tpu.memory_space<vmem>>, vector<1x1x8x384xbf16>
    %129 = vector.shape_cast %128 : vector<1x1x8x384xbf16> to vector<8x384xbf16>
    %130 = arith.extf %129 : vector<8x384xbf16> to vector<8x384xf32>
    %131 = arith.truncf %122 : vector<8x128xf32> to vector<8x128xbf16>
    %cst_50 = arith.constant dense<0.000000e+00> : vector<8x384xf32>
    %132 = tpu.matmul %131, %4, %cst_50 {dimension_numbers = #tpu.dot_dimension_numbers<[1], [0], [0], [1], [0, 0, 1, 1], [], []>} : vector<8x128xbf16>, vector<128x384xbf16>, vector<8x384xf32> -> vector<8x384xf32>
    %133 = vector.extract_strided_slice %132 {offsets = [0, 0], sizes = [8, 128], strides = [1, 1]} : vector<8x384xf32> to vector<8x128xf32>
    %134 = vector.extract_strided_slice %130 {offsets = [0, 0], sizes = [8, 128], strides = [1, 1]} : vector<8x384xf32> to vector<8x128xf32>
    %135 = arith.addf %133, %134 : vector<8x128xf32>
    %cst_51 = arith.constant 5.000000e-01 : f32
    %136 = vector.broadcast %cst_51 : f32 to vector<8x128xf32>
    %137 = arith.mulf %136, %135 : vector<8x128xf32>
    %138 = math.tanh %137 : vector<8x128xf32>
    %cst_52 = arith.constant 1.000000e+00 : f32
    %139 = vector.broadcast %cst_52 : f32 to vector<8x128xf32>
    %140 = arith.addf %139, %138 : vector<8x128xf32>
    %cst_53 = arith.constant 5.000000e-01 : f32
    %141 = vector.broadcast %cst_53 : f32 to vector<8x128xf32>
    %142 = arith.mulf %141, %140 : vector<8x128xf32>
    %143 = vector.extract_strided_slice %132 {offsets = [0, 128], sizes = [8, 128], strides = [1, 1]} : vector<8x384xf32> to vector<8x128xf32>
    %144 = vector.extract_strided_slice %130 {offsets = [0, 128], sizes = [8, 128], strides = [1, 1]} : vector<8x384xf32> to vector<8x128xf32>
    %145 = arith.addf %143, %144 : vector<8x128xf32>
    %cst_54 = arith.constant 5.000000e-01 : f32
    %146 = vector.broadcast %cst_54 : f32 to vector<8x128xf32>
    %147 = arith.mulf %146, %145 : vector<8x128xf32>
    %148 = math.tanh %147 : vector<8x128xf32>
    %cst_55 = arith.constant 1.000000e+00 : f32
    %149 = vector.broadcast %cst_55 : f32 to vector<8x128xf32>
    %150 = arith.addf %149, %148 : vector<8x128xf32>
    %cst_56 = arith.constant 5.000000e-01 : f32
    %151 = vector.broadcast %cst_56 : f32 to vector<8x128xf32>
    %152 = arith.mulf %151, %150 : vector<8x128xf32>
    %153 = vector.extract_strided_slice %132 {offsets = [0, 256], sizes = [8, 128], strides = [1, 1]} : vector<8x384xf32> to vector<8x128xf32>
    %154 = arith.addf %153, %8 : vector<8x128xf32>
    %155 = arith.mulf %142, %154 : vector<8x128xf32>
    %156 = vector.extract_strided_slice %130 {offsets = [0, 256], sizes = [8, 128], strides = [1, 1]} : vector<8x384xf32> to vector<8x128xf32>
    %157 = arith.addf %155, %156 : vector<8x128xf32>
    %158 = math.tanh %157 : vector<8x128xf32>
    %159 = arith.subf %122, %158 : vector<8x128xf32>
    %160 = arith.mulf %152, %159 : vector<8x128xf32>
    %161 = arith.addf %158, %160 : vector<8x128xf32>
    %c0_57 = arith.constant 0 : index
    %162 = arith.index_cast %c3_i32 : i32 to index
    %c0_58 = arith.constant 0 : index
    %c0_59 = arith.constant 0 : index
    %163 = vector.load %arg5[%c0_57, %162, %c0_58, %c0_59] : memref<1x8x8x128xf32, #tpu.memory_space<vmem>>, vector<1x1x8x128xf32>
    %164 = vector.shape_cast %163 : vector<1x1x8x128xf32> to vector<8x128xf32>
    %165 = vector.shape_cast %161 : vector<8x128xf32> to vector<1x1x8x128xf32>
    tpu.vector_store %arg5[%c0_57, %162, %c0_58, %c0_59], %165 {strides = array<i32>} : memref<1x8x8x128xf32, #tpu.memory_space<vmem>>, vector<1x1x8x128xf32>,
    %c4_i32 = arith.constant 4 : i32
    %c0_60 = arith.constant 0 : index
    %166 = arith.index_cast %c4_i32 : i32 to index
    %c0_61 = arith.constant 0 : index
    %c0_62 = arith.constant 0 : index
    %167 = vector.load %arg2[%c0_60, %166, %c0_61, %c0_62] : memref<1x8x8x384xbf16, #tpu.memory_space<vmem>>, vector<1x1x8x384xbf16>
    %168 = vector.shape_cast %167 : vector<1x1x8x384xbf16> to vector<8x384xbf16>
    %169 = arith.extf %168 : vector<8x384xbf16> to vector<8x384xf32>
    %170 = arith.truncf %161 : vector<8x128xf32> to vector<8x128xbf16>
    %cst_63 = arith.constant dense<0.000000e+00> : vector<8x384xf32>
    %171 = tpu.matmul %170, %4, %cst_63 {dimension_numbers = #tpu.dot_dimension_numbers<[1], [0], [0], [1], [0, 0, 1, 1], [], []>} : vector<8x128xbf16>, vector<128x384xbf16>, vector<8x384xf32> -> vector<8x384xf32>
    %172 = vector.extract_strided_slice %171 {offsets = [0, 0], sizes = [8, 128], strides = [1, 1]} : vector<8x384xf32> to vector<8x128xf32>
    %173 = vector.extract_strided_slice %169 {offsets = [0, 0], sizes = [8, 128], strides = [1, 1]} : vector<8x384xf32> to vector<8x128xf32>
    %174 = arith.addf %172, %173 : vector<8x128xf32>
    %cst_64 = arith.constant 5.000000e-01 : f32
    %175 = vector.broadcast %cst_64 : f32 to vector<8x128xf32>
    %176 = arith.mulf %175, %174 : vector<8x128xf32>
    %177 = math.tanh %176 : vector<8x128xf32>
    %cst_65 = arith.constant 1.000000e+00 : f32
    %178 = vector.broadcast %cst_65 : f32 to vector<8x128xf32>
    %179 = arith.addf %178, %177 : vector<8x128xf32>
    %cst_66 = arith.constant 5.000000e-01 : f32
    %180 = vector.broadcast %cst_66 : f32 to vector<8x128xf32>
    %181 = arith.mulf %180, %179 : vector<8x128xf32>
    %182 = vector.extract_strided_slice %171 {offsets = [0, 128], sizes = [8, 128], strides = [1, 1]} : vector<8x384xf32> to vector<8x128xf32>
    %183 = vector.extract_strided_slice %169 {offsets = [0, 128], sizes = [8, 128], strides = [1, 1]} : vector<8x384xf32> to vector<8x128xf32>
    %184 = arith.addf %182, %183 : vector<8x128xf32>
    %cst_67 = arith.constant 5.000000e-01 : f32
    %185 = vector.broadcast %cst_67 : f32 to vector<8x128xf32>
    %186 = arith.mulf %185, %184 : vector<8x128xf32>
    %187 = math.tanh %186 : vector<8x128xf32>
    %cst_68 = arith.constant 1.000000e+00 : f32
    %188 = vector.broadcast %cst_68 : f32 to vector<8x128xf32>
    %189 = arith.addf %188, %187 : vector<8x128xf32>
    %cst_69 = arith.constant 5.000000e-01 : f32
    %190 = vector.broadcast %cst_69 : f32 to vector<8x128xf32>
    %191 = arith.mulf %190, %189 : vector<8x128xf32>
    %192 = vector.extract_strided_slice %171 {offsets = [0, 256], sizes = [8, 128], strides = [1, 1]} : vector<8x384xf32> to vector<8x128xf32>
    %193 = arith.addf %192, %8 : vector<8x128xf32>
    %194 = arith.mulf %181, %193 : vector<8x128xf32>
    %195 = vector.extract_strided_slice %169 {offsets = [0, 256], sizes = [8, 128], strides = [1, 1]} : vector<8x384xf32> to vector<8x128xf32>
    %196 = arith.addf %194, %195 : vector<8x128xf32>
    %197 = math.tanh %196 : vector<8x128xf32>
    %198 = arith.subf %161, %197 : vector<8x128xf32>
    %199 = arith.mulf %191, %198 : vector<8x128xf32>
    %200 = arith.addf %197, %199 : vector<8x128xf32>
    %c0_70 = arith.constant 0 : index
    %201 = arith.index_cast %c4_i32 : i32 to index
    %c0_71 = arith.constant 0 : index
    %c0_72 = arith.constant 0 : index
    %202 = vector.load %arg5[%c0_70, %201, %c0_71, %c0_72] : memref<1x8x8x128xf32, #tpu.memory_space<vmem>>, vector<1x1x8x128xf32>
    %203 = vector.shape_cast %202 : vector<1x1x8x128xf32> to vector<8x128xf32>
    %204 = vector.shape_cast %200 : vector<8x128xf32> to vector<1x1x8x128xf32>
    tpu.vector_store %arg5[%c0_70, %201, %c0_71, %c0_72], %204 {strides = array<i32>} : memref<1x8x8x128xf32, #tpu.memory_space<vmem>>, vector<1x1x8x128xf32>,
    %c5_i32 = arith.constant 5 : i32
    %c0_73 = arith.constant 0 : index
    %205 = arith.index_cast %c5_i32 : i32 to index
    %c0_74 = arith.constant 0 : index
    %c0_75 = arith.constant 0 : index
    %206 = vector.load %arg2[%c0_73, %205, %c0_74, %c0_75] : memref<1x8x8x384xbf16, #tpu.memory_space<vmem>>, vector<1x1x8x384xbf16>
    %207 = vector.shape_cast %206 : vector<1x1x8x384xbf16> to vector<8x384xbf16>
    %208 = arith.extf %207 : vector<8x384xbf16> to vector<8x384xf32>
    %209 = arith.truncf %200 : vector<8x128xf32> to vector<8x128xbf16>
    %cst_76 = arith.constant dense<0.000000e+00> : vector<8x384xf32>
    %210 = tpu.matmul %209, %4, %cst_76 {dimension_numbers = #tpu.dot_dimension_numbers<[1], [0], [0], [1], [0, 0, 1, 1], [], []>} : vector<8x128xbf16>, vector<128x384xbf16>, vector<8x384xf32> -> vector<8x384xf32>
    %211 = vector.extract_strided_slice %210 {offsets = [0, 0], sizes = [8, 128], strides = [1, 1]} : vector<8x384xf32> to vector<8x128xf32>
    %212 = vector.extract_strided_slice %208 {offsets = [0, 0], sizes = [8, 128], strides = [1, 1]} : vector<8x384xf32> to vector<8x128xf32>
    %213 = arith.addf %211, %212 : vector<8x128xf32>
    %cst_77 = arith.constant 5.000000e-01 : f32
    %214 = vector.broadcast %cst_77 : f32 to vector<8x128xf32>
    %215 = arith.mulf %214, %213 : vector<8x128xf32>
    %216 = math.tanh %215 : vector<8x128xf32>
    %cst_78 = arith.constant 1.000000e+00 : f32
    %217 = vector.broadcast %cst_78 : f32 to vector<8x128xf32>
    %218 = arith.addf %217, %216 : vector<8x128xf32>
    %cst_79 = arith.constant 5.000000e-01 : f32
    %219 = vector.broadcast %cst_79 : f32 to vector<8x128xf32>
    %220 = arith.mulf %219, %218 : vector<8x128xf32>
    %221 = vector.extract_strided_slice %210 {offsets = [0, 128], sizes = [8, 128], strides = [1, 1]} : vector<8x384xf32> to vector<8x128xf32>
    %222 = vector.extract_strided_slice %208 {offsets = [0, 128], sizes = [8, 128], strides = [1, 1]} : vector<8x384xf32> to vector<8x128xf32>
    %223 = arith.addf %221, %222 : vector<8x128xf32>
    %cst_80 = arith.constant 5.000000e-01 : f32
    %224 = vector.broadcast %cst_80 : f32 to vector<8x128xf32>
    %225 = arith.mulf %224, %223 : vector<8x128xf32>
    %226 = math.tanh %225 : vector<8x128xf32>
    %cst_81 = arith.constant 1.000000e+00 : f32
    %227 = vector.broadcast %cst_81 : f32 to vector<8x128xf32>
    %228 = arith.addf %227, %226 : vector<8x128xf32>
    %cst_82 = arith.constant 5.000000e-01 : f32
    %229 = vector.broadcast %cst_82 : f32 to vector<8x128xf32>
    %230 = arith.mulf %229, %228 : vector<8x128xf32>
    %231 = vector.extract_strided_slice %210 {offsets = [0, 256], sizes = [8, 128], strides = [1, 1]} : vector<8x384xf32> to vector<8x128xf32>
    %232 = arith.addf %231, %8 : vector<8x128xf32>
    %233 = arith.mulf %220, %232 : vector<8x128xf32>
    %234 = vector.extract_strided_slice %208 {offsets = [0, 256], sizes = [8, 128], strides = [1, 1]} : vector<8x384xf32> to vector<8x128xf32>
    %235 = arith.addf %233, %234 : vector<8x128xf32>
    %236 = math.tanh %235 : vector<8x128xf32>
    %237 = arith.subf %200, %236 : vector<8x128xf32>
    %238 = arith.mulf %230, %237 : vector<8x128xf32>
    %239 = arith.addf %236, %238 : vector<8x128xf32>
    %c0_83 = arith.constant 0 : index
    %240 = arith.index_cast %c5_i32 : i32 to index
    %c0_84 = arith.constant 0 : index
    %c0_85 = arith.constant 0 : index
    %241 = vector.load %arg5[%c0_83, %240, %c0_84, %c0_85] : memref<1x8x8x128xf32, #tpu.memory_space<vmem>>, vector<1x1x8x128xf32>
    %242 = vector.shape_cast %241 : vector<1x1x8x128xf32> to vector<8x128xf32>
    %243 = vector.shape_cast %239 : vector<8x128xf32> to vector<1x1x8x128xf32>
    tpu.vector_store %arg5[%c0_83, %240, %c0_84, %c0_85], %243 {strides = array<i32>} : memref<1x8x8x128xf32, #tpu.memory_space<vmem>>, vector<1x1x8x128xf32>,
    %c6_i32 = arith.constant 6 : i32
    %c0_86 = arith.constant 0 : index
    %244 = arith.index_cast %c6_i32 : i32 to index
    %c0_87 = arith.constant 0 : index
    %c0_88 = arith.constant 0 : index
    %245 = vector.load %arg2[%c0_86, %244, %c0_87, %c0_88] : memref<1x8x8x384xbf16, #tpu.memory_space<vmem>>, vector<1x1x8x384xbf16>
    %246 = vector.shape_cast %245 : vector<1x1x8x384xbf16> to vector<8x384xbf16>
    %247 = arith.extf %246 : vector<8x384xbf16> to vector<8x384xf32>
    %248 = arith.truncf %239 : vector<8x128xf32> to vector<8x128xbf16>
    %cst_89 = arith.constant dense<0.000000e+00> : vector<8x384xf32>
    %249 = tpu.matmul %248, %4, %cst_89 {dimension_numbers = #tpu.dot_dimension_numbers<[1], [0], [0], [1], [0, 0, 1, 1], [], []>} : vector<8x128xbf16>, vector<128x384xbf16>, vector<8x384xf32> -> vector<8x384xf32>
    %250 = vector.extract_strided_slice %249 {offsets = [0, 0], sizes = [8, 128], strides = [1, 1]} : vector<8x384xf32> to vector<8x128xf32>
    %251 = vector.extract_strided_slice %247 {offsets = [0, 0], sizes = [8, 128], strides = [1, 1]} : vector<8x384xf32> to vector<8x128xf32>
    %252 = arith.addf %250, %251 : vector<8x128xf32>
    %cst_90 = arith.constant 5.000000e-01 : f32
    %253 = vector.broadcast %cst_90 : f32 to vector<8x128xf32>
    %254 = arith.mulf %253, %252 : vector<8x128xf32>
    %255 = math.tanh %254 : vector<8x128xf32>
    %cst_91 = arith.constant 1.000000e+00 : f32
    %256 = vector.broadcast %cst_91 : f32 to vector<8x128xf32>
    %257 = arith.addf %256, %255 : vector<8x128xf32>
    %cst_92 = arith.constant 5.000000e-01 : f32
    %258 = vector.broadcast %cst_92 : f32 to vector<8x128xf32>
    %259 = arith.mulf %258, %257 : vector<8x128xf32>
    %260 = vector.extract_strided_slice %249 {offsets = [0, 128], sizes = [8, 128], strides = [1, 1]} : vector<8x384xf32> to vector<8x128xf32>
    %261 = vector.extract_strided_slice %247 {offsets = [0, 128], sizes = [8, 128], strides = [1, 1]} : vector<8x384xf32> to vector<8x128xf32>
    %262 = arith.addf %260, %261 : vector<8x128xf32>
    %cst_93 = arith.constant 5.000000e-01 : f32
    %263 = vector.broadcast %cst_93 : f32 to vector<8x128xf32>
    %264 = arith.mulf %263, %262 : vector<8x128xf32>
    %265 = math.tanh %264 : vector<8x128xf32>
    %cst_94 = arith.constant 1.000000e+00 : f32
    %266 = vector.broadcast %cst_94 : f32 to vector<8x128xf32>
    %267 = arith.addf %266, %265 : vector<8x128xf32>
    %cst_95 = arith.constant 5.000000e-01 : f32
    %268 = vector.broadcast %cst_95 : f32 to vector<8x128xf32>
    %269 = arith.mulf %268, %267 : vector<8x128xf32>
    %270 = vector.extract_strided_slice %249 {offsets = [0, 256], sizes = [8, 128], strides = [1, 1]} : vector<8x384xf32> to vector<8x128xf32>
    %271 = arith.addf %270, %8 : vector<8x128xf32>
    %272 = arith.mulf %259, %271 : vector<8x128xf32>
    %273 = vector.extract_strided_slice %247 {offsets = [0, 256], sizes = [8, 128], strides = [1, 1]} : vector<8x384xf32> to vector<8x128xf32>
    %274 = arith.addf %272, %273 : vector<8x128xf32>
    %275 = math.tanh %274 : vector<8x128xf32>
    %276 = arith.subf %239, %275 : vector<8x128xf32>
    %277 = arith.mulf %269, %276 : vector<8x128xf32>
    %278 = arith.addf %275, %277 : vector<8x128xf32>
    %c0_96 = arith.constant 0 : index
    %279 = arith.index_cast %c6_i32 : i32 to index
    %c0_97 = arith.constant 0 : index
    %c0_98 = arith.constant 0 : index
    %280 = vector.load %arg5[%c0_96, %279, %c0_97, %c0_98] : memref<1x8x8x128xf32, #tpu.memory_space<vmem>>, vector<1x1x8x128xf32>
    %281 = vector.shape_cast %280 : vector<1x1x8x128xf32> to vector<8x128xf32>
    %282 = vector.shape_cast %278 : vector<8x128xf32> to vector<1x1x8x128xf32>
    tpu.vector_store %arg5[%c0_96, %279, %c0_97, %c0_98], %282 {strides = array<i32>} : memref<1x8x8x128xf32, #tpu.memory_space<vmem>>, vector<1x1x8x128xf32>,
    %c7_i32 = arith.constant 7 : i32
    %c0_99 = arith.constant 0 : index
    %283 = arith.index_cast %c7_i32 : i32 to index
    %c0_100 = arith.constant 0 : index
    %c0_101 = arith.constant 0 : index
    %284 = vector.load %arg2[%c0_99, %283, %c0_100, %c0_101] : memref<1x8x8x384xbf16, #tpu.memory_space<vmem>>, vector<1x1x8x384xbf16>
    %285 = vector.shape_cast %284 : vector<1x1x8x384xbf16> to vector<8x384xbf16>
    %286 = arith.extf %285 : vector<8x384xbf16> to vector<8x384xf32>
    %287 = arith.truncf %278 : vector<8x128xf32> to vector<8x128xbf16>
    %cst_102 = arith.constant dense<0.000000e+00> : vector<8x384xf32>
    %288 = tpu.matmul %287, %4, %cst_102 {dimension_numbers = #tpu.dot_dimension_numbers<[1], [0], [0], [1], [0, 0, 1, 1], [], []>} : vector<8x128xbf16>, vector<128x384xbf16>, vector<8x384xf32> -> vector<8x384xf32>
    %289 = vector.extract_strided_slice %288 {offsets = [0, 0], sizes = [8, 128], strides = [1, 1]} : vector<8x384xf32> to vector<8x128xf32>
    %290 = vector.extract_strided_slice %286 {offsets = [0, 0], sizes = [8, 128], strides = [1, 1]} : vector<8x384xf32> to vector<8x128xf32>
    %291 = arith.addf %289, %290 : vector<8x128xf32>
    %cst_103 = arith.constant 5.000000e-01 : f32
    %292 = vector.broadcast %cst_103 : f32 to vector<8x128xf32>
    %293 = arith.mulf %292, %291 : vector<8x128xf32>
    %294 = math.tanh %293 : vector<8x128xf32>
    %cst_104 = arith.constant 1.000000e+00 : f32
    %295 = vector.broadcast %cst_104 : f32 to vector<8x128xf32>
    %296 = arith.addf %295, %294 : vector<8x128xf32>
    %cst_105 = arith.constant 5.000000e-01 : f32
    %297 = vector.broadcast %cst_105 : f32 to vector<8x128xf32>
    %298 = arith.mulf %297, %296 : vector<8x128xf32>
    %299 = vector.extract_strided_slice %288 {offsets = [0, 128], sizes = [8, 128], strides = [1, 1]} : vector<8x384xf32> to vector<8x128xf32>
    %300 = vector.extract_strided_slice %286 {offsets = [0, 128], sizes = [8, 128], strides = [1, 1]} : vector<8x384xf32> to vector<8x128xf32>
    %301 = arith.addf %299, %300 : vector<8x128xf32>
    %cst_106 = arith.constant 5.000000e-01 : f32
    %302 = vector.broadcast %cst_106 : f32 to vector<8x128xf32>
    %303 = arith.mulf %302, %301 : vector<8x128xf32>
    %304 = math.tanh %303 : vector<8x128xf32>
    %cst_107 = arith.constant 1.000000e+00 : f32
    %305 = vector.broadcast %cst_107 : f32 to vector<8x128xf32>
    %306 = arith.addf %305, %304 : vector<8x128xf32>
    %cst_108 = arith.constant 5.000000e-01 : f32
    %307 = vector.broadcast %cst_108 : f32 to vector<8x128xf32>
    %308 = arith.mulf %307, %306 : vector<8x128xf32>
    %309 = vector.extract_strided_slice %288 {offsets = [0, 256], sizes = [8, 128], strides = [1, 1]} : vector<8x384xf32> to vector<8x128xf32>
    %310 = arith.addf %309, %8 : vector<8x128xf32>
    %311 = arith.mulf %298, %310 : vector<8x128xf32>
    %312 = vector.extract_strided_slice %286 {offsets = [0, 256], sizes = [8, 128], strides = [1, 1]} : vector<8x384xf32> to vector<8x128xf32>
    %313 = arith.addf %311, %312 : vector<8x128xf32>
    %314 = math.tanh %313 : vector<8x128xf32>
    %315 = arith.subf %278, %314 : vector<8x128xf32>
    %316 = arith.mulf %308, %315 : vector<8x128xf32>
    %317 = arith.addf %314, %316 : vector<8x128xf32>
    %c0_109 = arith.constant 0 : index
    %318 = arith.index_cast %c7_i32 : i32 to index
    %c0_110 = arith.constant 0 : index
    %c0_111 = arith.constant 0 : index
    %319 = vector.load %arg5[%c0_109, %318, %c0_110, %c0_111] : memref<1x8x8x128xf32, #tpu.memory_space<vmem>>, vector<1x1x8x128xf32>
    %320 = vector.shape_cast %319 : vector<1x1x8x128xf32> to vector<8x128xf32>
    %321 = vector.shape_cast %317 : vector<8x128xf32> to vector<1x1x8x128xf32>
    tpu.vector_store %arg5[%c0_109, %318, %c0_110, %c0_111], %321 {strides = array<i32>} : memref<1x8x8x128xf32, #tpu.memory_space<vmem>>, vector<1x1x8x128xf32>,
    %c8_i32 = arith.constant 8 : i32
    %c0_112 = arith.constant 0 : index
    %c0_113 = arith.constant 0 : index
    %322 = vector.load %arg6[%c0_112, %c0_113] : memref<8x128xf32, #tpu.memory_space<vmem>>, vector<8x128xf32>
    tpu.vector_store %arg6[%c0_112, %c0_113], %317 {strides = array<i32>} : memref<8x128xf32, #tpu.memory_space<vmem>>, vector<8x128xf32>,
    return
  }
  func.func @transform_0(%arg0: i32, %arg1: i32) -> (i32, i32, i32, i32) {
    %c0_i32 = arith.constant 0 : i32
    %c0_i32_0 = arith.constant 0 : i32
    %c0_i32_1 = arith.constant 0 : i32
    return %arg0, %arg1, %c0_i32, %c0_i32_0 : i32, i32, i32, i32
  }
  func.func @transform_1(%arg0: i32, %arg1: i32) -> (i32, i32, i32) {
    %c0_i32 = arith.constant 0 : i32
    %c0_i32_0 = arith.constant 0 : i32
    %c0_i32_1 = arith.constant 0 : i32
    return %arg0, %c0_i32, %c0_i32_0 : i32, i32, i32
  }
  func.func @transform_2(%arg0: i32, %arg1: i32) -> (i32, i32, i32) {
    %c0_i32 = arith.constant 0 : i32
    %c0_i32_0 = arith.constant 0 : i32
    %c0_i32_1 = arith.constant 0 : i32
    return %arg0, %c0_i32, %c0_i32_0 : i32, i32, i32
  }
  func.func @transform_3(%arg0: i32, %arg1: i32) -> (i32, i32, i32, i32) {
    %c0_i32 = arith.constant 0 : i32
    %c0_i32_0 = arith.constant 0 : i32
    %c0_i32_1 = arith.constant 0 : i32
    return %arg0, %arg1, %c0_i32, %c0_i32_0 : i32, i32, i32, i32
  }
}

module attributes {stable_mosaic.version = 11 : i64} {
  func.func @_gru_chunk_kernel(%arg0: i32, %arg1: i32, %arg2: memref<1x8x8x384xbf16, #tpu.memory_space<vmem>>, %arg3: memref<1x128x384xbf16, #tpu.memory_space<vmem>>, %arg4: memref<1x1x128xf32, #tpu.memory_space<vmem>>, %arg5: memref<1x8x8x128xf32, #tpu.memory_space<vmem>>, %arg6: memref<8x128xf32, #tpu.memory_space<vmem>>) attributes {dimension_semantics = [#tpu.dimension_semantics<parallel>, #tpu.dimension_semantics<arbitrary>], iteration_bounds = array<i64: 2, 1>, scalar_prefetch = 0 : i64, scratch_operands = 1 : i64, tpu.core_type = #tpu.core_type<tc>, window_params = [{transform_indices = @transform_0, window_bounds = array<i64: 1, 8, 8, 384>}, {transform_indices = @transform_1, window_bounds = array<i64: 1, 128, 384>}, {transform_indices = @transform_2, window_bounds = array<i64: 1, 1, 128>}, {transform_indices = @transform_3, window_bounds = array<i64: 1, 8, 8, 128>}]} {
    %c0_i32 = arith.constant 0 : i32
    %0 = arith.cmpi eq, %arg1, %c0_i32 : i32
    %1 = arith.extui %0 : i1 to i32
    %c0_i32_0 = arith.constant 0 : i32
    %2 = arith.cmpi ne, %1, %c0_i32_0 : i32
    scf.if %2 {
      %cst_114 = arith.constant 0.000000e+00 : f32
      %323 = vector.broadcast %cst_114 : f32 to vector<8x128xf32>
      %c0_115 = arith.constant 0 : index
      %c0_116 = arith.constant 0 : index
      %324 = vector.load %arg6[%c0_115, %c0_116] : memref<8x128xf32, #tpu.memory_space<vmem>>, vector<8x128xf32>
      tpu.vector_store %arg6[%c0_115, %c0_116], %323 {strides = array<i32>} : memref<8x128xf32, #tpu.memory_space<vmem>>, vector<8x128xf32>,
    } else {
    }
    %c0 = arith.constant 0 : index
    %c0_1 = arith.constant 0 : index
    %c0_2 = arith.constant 0 : index
    %3 = vector.load %arg3[%c0, %c0_1, %c0_2] : memref<1x128x384xbf16, #tpu.memory_space<vmem>>, vector<1x128x384xbf16>
    %4 = vector.shape_cast %3 : vector<1x128x384xbf16> to vector<128x384xbf16>
    %c0_3 = arith.constant 0 : index
    %c0_4 = arith.constant 0 : index
    %c0_5 = arith.constant 0 : index
    %5 = vector.load %arg4[%c0_3, %c0_4, %c0_5] : memref<1x1x128xf32, #tpu.memory_space<vmem>>, vector<1x1x128xf32>
    %6 = vector.shape_cast %5 : vector<1x1x128xf32> to vector<1x128xf32>
    %7 = vector.shape_cast %6 : vector<1x128xf32> to vector<1x128xf32>
    %8 = vector.broadcast %7 : vector<1x128xf32> to vector<8x128xf32>
    %c0_6 = arith.constant 0 : index
    %c0_7 = arith.constant 0 : index
    %9 = vector.load %arg6[%c0_6, %c0_7] : memref<8x128xf32, #tpu.memory_space<vmem>>, vector<8x128xf32>
    %c0_i32_8 = arith.constant 0 : i32
    %c0_9 = arith.constant 0 : index
    %10 = arith.index_cast %c0_i32_8 : i32 to index
    %c0_10 = arith.constant 0 : index
    %c0_11 = arith.constant 0 : index
    %11 = vector.load %arg2[%c0_9, %10, %c0_10, %c0_11] : memref<1x8x8x384xbf16, #tpu.memory_space<vmem>>, vector<1x1x8x384xbf16>
    %12 = vector.shape_cast %11 : vector<1x1x8x384xbf16> to vector<8x384xbf16>
    %13 = arith.extf %12 : vector<8x384xbf16> to vector<8x384xf32>
    %14 = arith.truncf %9 : vector<8x128xf32> to vector<8x128xbf16>
    %cst = arith.constant dense<0.000000e+00> : vector<8x384xf32>
    %15 = tpu.matmul %14, %4, %cst {dimension_numbers = #tpu.dot_dimension_numbers<[1], [0], [0], [1], [0, 0, 1, 1], [], []>} : vector<8x128xbf16>, vector<128x384xbf16>, vector<8x384xf32> -> vector<8x384xf32>
    %16 = vector.extract_strided_slice %15 {offsets = [0, 0], sizes = [8, 128], strides = [1, 1]} : vector<8x384xf32> to vector<8x128xf32>
    %17 = vector.extract_strided_slice %13 {offsets = [0, 0], sizes = [8, 128], strides = [1, 1]} : vector<8x384xf32> to vector<8x128xf32>
    %18 = arith.addf %16, %17 : vector<8x128xf32>
    %cst_12 = arith.constant 5.000000e-01 : f32
    %19 = vector.broadcast %cst_12 : f32 to vector<8x128xf32>
    %20 = arith.mulf %19, %18 : vector<8x128xf32>
    %21 = math.tanh %20 : vector<8x128xf32>
    %cst_13 = arith.constant 1.000000e+00 : f32
    %22 = vector.broadcast %cst_13 : f32 to vector<8x128xf32>
    %23 = arith.addf %22, %21 : vector<8x128xf32>
    %cst_14 = arith.constant 5.000000e-01 : f32
    %24 = vector.broadcast %cst_14 : f32 to vector<8x128xf32>
    %25 = arith.mulf %24, %23 : vector<8x128xf32>
    %26 = vector.extract_strided_slice %15 {offsets = [0, 128], sizes = [8, 128], strides = [1, 1]} : vector<8x384xf32> to vector<8x128xf32>
    %27 = vector.extract_strided_slice %13 {offsets = [0, 128], sizes = [8, 128], strides = [1, 1]} : vector<8x384xf32> to vector<8x128xf32>
    %28 = arith.addf %26, %27 : vector<8x128xf32>
    %cst_15 = arith.constant 5.000000e-01 : f32
    %29 = vector.broadcast %cst_15 : f32 to vector<8x128xf32>
    %30 = arith.mulf %29, %28 : vector<8x128xf32>
    %31 = math.tanh %30 : vector<8x128xf32>
    %cst_16 = arith.constant 1.000000e+00 : f32
    %32 = vector.broadcast %cst_16 : f32 to vector<8x128xf32>
    %33 = arith.addf %32, %31 : vector<8x128xf32>
    %cst_17 = arith.constant 5.000000e-01 : f32
    %34 = vector.broadcast %cst_17 : f32 to vector<8x128xf32>
    %35 = arith.mulf %34, %33 : vector<8x128xf32>
    %36 = vector.extract_strided_slice %15 {offsets = [0, 256], sizes = [8, 128], strides = [1, 1]} : vector<8x384xf32> to vector<8x128xf32>
    %37 = arith.addf %36, %8 : vector<8x128xf32>
    %38 = arith.mulf %25, %37 : vector<8x128xf32>
    %39 = vector.extract_strided_slice %13 {offsets = [0, 256], sizes = [8, 128], strides = [1, 1]} : vector<8x384xf32> to vector<8x128xf32>
    %40 = arith.addf %38, %39 : vector<8x128xf32>
    %41 = math.tanh %40 : vector<8x128xf32>
    %42 = arith.subf %9, %41 : vector<8x128xf32>
    %43 = arith.mulf %35, %42 : vector<8x128xf32>
    %44 = arith.addf %41, %43 : vector<8x128xf32>
    %c0_18 = arith.constant 0 : index
    %45 = arith.index_cast %c0_i32_8 : i32 to index
    %c0_19 = arith.constant 0 : index
    %c0_20 = arith.constant 0 : index
    %46 = vector.load %arg5[%c0_18, %45, %c0_19, %c0_20] : memref<1x8x8x128xf32, #tpu.memory_space<vmem>>, vector<1x1x8x128xf32>
    %47 = vector.shape_cast %46 : vector<1x1x8x128xf32> to vector<8x128xf32>
    %48 = vector.shape_cast %44 : vector<8x128xf32> to vector<1x1x8x128xf32>
    tpu.vector_store %arg5[%c0_18, %45, %c0_19, %c0_20], %48 {strides = array<i32>} : memref<1x8x8x128xf32, #tpu.memory_space<vmem>>, vector<1x1x8x128xf32>,
    %c1_i32 = arith.constant 1 : i32
    %c0_21 = arith.constant 0 : index
    %49 = arith.index_cast %c1_i32 : i32 to index
    %c0_22 = arith.constant 0 : index
    %c0_23 = arith.constant 0 : index
    %50 = vector.load %arg2[%c0_21, %49, %c0_22, %c0_23] : memref<1x8x8x384xbf16, #tpu.memory_space<vmem>>, vector<1x1x8x384xbf16>
    %51 = vector.shape_cast %50 : vector<1x1x8x384xbf16> to vector<8x384xbf16>
    %52 = arith.extf %51 : vector<8x384xbf16> to vector<8x384xf32>
    %53 = arith.truncf %44 : vector<8x128xf32> to vector<8x128xbf16>
    %cst_24 = arith.constant dense<0.000000e+00> : vector<8x384xf32>
    %54 = tpu.matmul %53, %4, %cst_24 {dimension_numbers = #tpu.dot_dimension_numbers<[1], [0], [0], [1], [0, 0, 1, 1], [], []>} : vector<8x128xbf16>, vector<128x384xbf16>, vector<8x384xf32> -> vector<8x384xf32>
    %55 = vector.extract_strided_slice %54 {offsets = [0, 0], sizes = [8, 128], strides = [1, 1]} : vector<8x384xf32> to vector<8x128xf32>
    %56 = vector.extract_strided_slice %52 {offsets = [0, 0], sizes = [8, 128], strides = [1, 1]} : vector<8x384xf32> to vector<8x128xf32>
    %57 = arith.addf %55, %56 : vector<8x128xf32>
    %cst_25 = arith.constant 5.000000e-01 : f32
    %58 = vector.broadcast %cst_25 : f32 to vector<8x128xf32>
    %59 = arith.mulf %58, %57 : vector<8x128xf32>
    %60 = math.tanh %59 : vector<8x128xf32>
    %cst_26 = arith.constant 1.000000e+00 : f32
    %61 = vector.broadcast %cst_26 : f32 to vector<8x128xf32>
    %62 = arith.addf %61, %60 : vector<8x128xf32>
    %cst_27 = arith.constant 5.000000e-01 : f32
    %63 = vector.broadcast %cst_27 : f32 to vector<8x128xf32>
    %64 = arith.mulf %63, %62 : vector<8x128xf32>
    %65 = vector.extract_strided_slice %54 {offsets = [0, 128], sizes = [8, 128], strides = [1, 1]} : vector<8x384xf32> to vector<8x128xf32>
    %66 = vector.extract_strided_slice %52 {offsets = [0, 128], sizes = [8, 128], strides = [1, 1]} : vector<8x384xf32> to vector<8x128xf32>
    %67 = arith.addf %65, %66 : vector<8x128xf32>
    %cst_28 = arith.constant 5.000000e-01 : f32
    %68 = vector.broadcast %cst_28 : f32 to vector<8x128xf32>
    %69 = arith.mulf %68, %67 : vector<8x128xf32>
    %70 = math.tanh %69 : vector<8x128xf32>
    %cst_29 = arith.constant 1.000000e+00 : f32
    %71 = vector.broadcast %cst_29 : f32 to vector<8x128xf32>
    %72 = arith.addf %71, %70 : vector<8x128xf32>
    %cst_30 = arith.constant 5.000000e-01 : f32
    %73 = vector.broadcast %cst_30 : f32 to vector<8x128xf32>
    %74 = arith.mulf %73, %72 : vector<8x128xf32>
    %75 = vector.extract_strided_slice %54 {offsets = [0, 256], sizes = [8, 128], strides = [1, 1]} : vector<8x384xf32> to vector<8x128xf32>
    %76 = arith.addf %75, %8 : vector<8x128xf32>
    %77 = arith.mulf %64, %76 : vector<8x128xf32>
    %78 = vector.extract_strided_slice %52 {offsets = [0, 256], sizes = [8, 128], strides = [1, 1]} : vector<8x384xf32> to vector<8x128xf32>
    %79 = arith.addf %77, %78 : vector<8x128xf32>
    %80 = math.tanh %79 : vector<8x128xf32>
    %81 = arith.subf %44, %80 : vector<8x128xf32>
    %82 = arith.mulf %74, %81 : vector<8x128xf32>
    %83 = arith.addf %80, %82 : vector<8x128xf32>
    %c0_31 = arith.constant 0 : index
    %84 = arith.index_cast %c1_i32 : i32 to index
    %c0_32 = arith.constant 0 : index
    %c0_33 = arith.constant 0 : index
    %85 = vector.load %arg5[%c0_31, %84, %c0_32, %c0_33] : memref<1x8x8x128xf32, #tpu.memory_space<vmem>>, vector<1x1x8x128xf32>
    %86 = vector.shape_cast %85 : vector<1x1x8x128xf32> to vector<8x128xf32>
    %87 = vector.shape_cast %83 : vector<8x128xf32> to vector<1x1x8x128xf32>
    tpu.vector_store %arg5[%c0_31, %84, %c0_32, %c0_33], %87 {strides = array<i32>} : memref<1x8x8x128xf32, #tpu.memory_space<vmem>>, vector<1x1x8x128xf32>,
    %c2_i32 = arith.constant 2 : i32
    %c0_34 = arith.constant 0 : index
    %88 = arith.index_cast %c2_i32 : i32 to index
    %c0_35 = arith.constant 0 : index
    %c0_36 = arith.constant 0 : index
    %89 = vector.load %arg2[%c0_34, %88, %c0_35, %c0_36] : memref<1x8x8x384xbf16, #tpu.memory_space<vmem>>, vector<1x1x8x384xbf16>
    %90 = vector.shape_cast %89 : vector<1x1x8x384xbf16> to vector<8x384xbf16>
    %91 = arith.extf %90 : vector<8x384xbf16> to vector<8x384xf32>
    %92 = arith.truncf %83 : vector<8x128xf32> to vector<8x128xbf16>
    %cst_37 = arith.constant dense<0.000000e+00> : vector<8x384xf32>
    %93 = tpu.matmul %92, %4, %cst_37 {dimension_numbers = #tpu.dot_dimension_numbers<[1], [0], [0], [1], [0, 0, 1, 1], [], []>} : vector<8x128xbf16>, vector<128x384xbf16>, vector<8x384xf32> -> vector<8x384xf32>
    %94 = vector.extract_strided_slice %93 {offsets = [0, 0], sizes = [8, 128], strides = [1, 1]} : vector<8x384xf32> to vector<8x128xf32>
    %95 = vector.extract_strided_slice %91 {offsets = [0, 0], sizes = [8, 128], strides = [1, 1]} : vector<8x384xf32> to vector<8x128xf32>
    %96 = arith.addf %94, %95 : vector<8x128xf32>
    %cst_38 = arith.constant 5.000000e-01 : f32
    %97 = vector.broadcast %cst_38 : f32 to vector<8x128xf32>
    %98 = arith.mulf %97, %96 : vector<8x128xf32>
    %99 = math.tanh %98 : vector<8x128xf32>
    %cst_39 = arith.constant 1.000000e+00 : f32
    %100 = vector.broadcast %cst_39 : f32 to vector<8x128xf32>
    %101 = arith.addf %100, %99 : vector<8x128xf32>
    %cst_40 = arith.constant 5.000000e-01 : f32
    %102 = vector.broadcast %cst_40 : f32 to vector<8x128xf32>
    %103 = arith.mulf %102, %101 : vector<8x128xf32>
    %104 = vector.extract_strided_slice %93 {offsets = [0, 128], sizes = [8, 128], strides = [1, 1]} : vector<8x384xf32> to vector<8x128xf32>
    %105 = vector.extract_strided_slice %91 {offsets = [0, 128], sizes = [8, 128], strides = [1, 1]} : vector<8x384xf32> to vector<8x128xf32>
    %106 = arith.addf %104, %105 : vector<8x128xf32>
    %cst_41 = arith.constant 5.000000e-01 : f32
    %107 = vector.broadcast %cst_41 : f32 to vector<8x128xf32>
    %108 = arith.mulf %107, %106 : vector<8x128xf32>
    %109 = math.tanh %108 : vector<8x128xf32>
    %cst_42 = arith.constant 1.000000e+00 : f32
    %110 = vector.broadcast %cst_42 : f32 to vector<8x128xf32>
    %111 = arith.addf %110, %109 : vector<8x128xf32>
    %cst_43 = arith.constant 5.000000e-01 : f32
    %112 = vector.broadcast %cst_43 : f32 to vector<8x128xf32>
    %113 = arith.mulf %112, %111 : vector<8x128xf32>
    %114 = vector.extract_strided_slice %93 {offsets = [0, 256], sizes = [8, 128], strides = [1, 1]} : vector<8x384xf32> to vector<8x128xf32>
    %115 = arith.addf %114, %8 : vector<8x128xf32>
    %116 = arith.mulf %103, %115 : vector<8x128xf32>
    %117 = vector.extract_strided_slice %91 {offsets = [0, 256], sizes = [8, 128], strides = [1, 1]} : vector<8x384xf32> to vector<8x128xf32>
    %118 = arith.addf %116, %117 : vector<8x128xf32>
    %119 = math.tanh %118 : vector<8x128xf32>
    %120 = arith.subf %83, %119 : vector<8x128xf32>
    %121 = arith.mulf %113, %120 : vector<8x128xf32>
    %122 = arith.addf %119, %121 : vector<8x128xf32>
    %c0_44 = arith.constant 0 : index
    %123 = arith.index_cast %c2_i32 : i32 to index
    %c0_45 = arith.constant 0 : index
    %c0_46 = arith.constant 0 : index
    %124 = vector.load %arg5[%c0_44, %123, %c0_45, %c0_46] : memref<1x8x8x128xf32, #tpu.memory_space<vmem>>, vector<1x1x8x128xf32>
    %125 = vector.shape_cast %124 : vector<1x1x8x128xf32> to vector<8x128xf32>
    %126 = vector.shape_cast %122 : vector<8x128xf32> to vector<1x1x8x128xf32>
    tpu.vector_store %arg5[%c0_44, %123, %c0_45, %c0_46], %126 {strides = array<i32>} : memref<1x8x8x128xf32, #tpu.memory_space<vmem>>, vector<1x1x8x128xf32>,
    %c3_i32 = arith.constant 3 : i32
    %c0_47 = arith.constant 0 : index
    %127 = arith.index_cast %c3_i32 : i32 to index
    %c0_48 = arith.constant 0 : index
    %c0_49 = arith.constant 0 : index
    %128 = vector.load %arg2[%c0_47, %127, %c0_48, %c0_49] : memref<1x8x8x384xbf16, #tpu.memory_space<vmem>>, vector<1x1x8x384xbf16>
    %129 = vector.shape_cast %128 : vector<1x1x8x384xbf16> to vector<8x384xbf16>
    %130 = arith.extf %129 : vector<8x384xbf16> to vector<8x384xf32>
    %131 = arith.truncf %122 : vector<8x128xf32> to vector<8x128xbf16>
    %cst_50 = arith.constant dense<0.000000e+00> : vector<8x384xf32>
    %132 = tpu.matmul %131, %4, %cst_50 {dimension_numbers = #tpu.dot_dimension_numbers<[1], [0], [0], [1], [0, 0, 1, 1], [], []>} : vector<8x128xbf16>, vector<128x384xbf16>, vector<8x384xf32> -> vector<8x384xf32>
    %133 = vector.extract_strided_slice %132 {offsets = [0, 0], sizes = [8, 128], strides = [1, 1]} : vector<8x384xf32> to vector<8x128xf32>
    %134 = vector.extract_strided_slice %130 {offsets = [0, 0], sizes = [8, 128], strides = [1, 1]} : vector<8x384xf32> to vector<8x128xf32>
    %135 = arith.addf %133, %134 : vector<8x128xf32>
    %cst_51 = arith.constant 5.000000e-01 : f32
    %136 = vector.broadcast %cst_51 : f32 to vector<8x128xf32>
    %137 = arith.mulf %136, %135 : vector<8x128xf32>
    %138 = math.tanh %137 : vector<8x128xf32>
    %cst_52 = arith.constant 1.000000e+00 : f32
    %139 = vector.broadcast %cst_52 : f32 to vector<8x128xf32>
    %140 = arith.addf %139, %138 : vector<8x128xf32>
    %cst_53 = arith.constant 5.000000e-01 : f32
    %141 = vector.broadcast %cst_53 : f32 to vector<8x128xf32>
    %142 = arith.mulf %141, %140 : vector<8x128xf32>
    %143 = vector.extract_strided_slice %132 {offsets = [0, 128], sizes = [8, 128], strides = [1, 1]} : vector<8x384xf32> to vector<8x128xf32>
    %144 = vector.extract_strided_slice %130 {offsets = [0, 128], sizes = [8, 128], strides = [1, 1]} : vector<8x384xf32> to vector<8x128xf32>
    %145 = arith.addf %143, %144 : vector<8x128xf32>
    %cst_54 = arith.constant 5.000000e-01 : f32
    %146 = vector.broadcast %cst_54 : f32 to vector<8x128xf32>
    %147 = arith.mulf %146, %145 : vector<8x128xf32>
    %148 = math.tanh %147 : vector<8x128xf32>
    %cst_55 = arith.constant 1.000000e+00 : f32
    %149 = vector.broadcast %cst_55 : f32 to vector<8x128xf32>
    %150 = arith.addf %149, %148 : vector<8x128xf32>
    %cst_56 = arith.constant 5.000000e-01 : f32
    %151 = vector.broadcast %cst_56 : f32 to vector<8x128xf32>
    %152 = arith.mulf %151, %150 : vector<8x128xf32>
    %153 = vector.extract_strided_slice %132 {offsets = [0, 256], sizes = [8, 128], strides = [1, 1]} : vector<8x384xf32> to vector<8x128xf32>
    %154 = arith.addf %153, %8 : vector<8x128xf32>
    %155 = arith.mulf %142, %154 : vector<8x128xf32>
    %156 = vector.extract_strided_slice %130 {offsets = [0, 256], sizes = [8, 128], strides = [1, 1]} : vector<8x384xf32> to vector<8x128xf32>
    %157 = arith.addf %155, %156 : vector<8x128xf32>
    %158 = math.tanh %157 : vector<8x128xf32>
    %159 = arith.subf %122, %158 : vector<8x128xf32>
    %160 = arith.mulf %152, %159 : vector<8x128xf32>
    %161 = arith.addf %158, %160 : vector<8x128xf32>
    %c0_57 = arith.constant 0 : index
    %162 = arith.index_cast %c3_i32 : i32 to index
    %c0_58 = arith.constant 0 : index
    %c0_59 = arith.constant 0 : index
    %163 = vector.load %arg5[%c0_57, %162, %c0_58, %c0_59] : memref<1x8x8x128xf32, #tpu.memory_space<vmem>>, vector<1x1x8x128xf32>
    %164 = vector.shape_cast %163 : vector<1x1x8x128xf32> to vector<8x128xf32>
    %165 = vector.shape_cast %161 : vector<8x128xf32> to vector<1x1x8x128xf32>
    tpu.vector_store %arg5[%c0_57, %162, %c0_58, %c0_59], %165 {strides = array<i32>} : memref<1x8x8x128xf32, #tpu.memory_space<vmem>>, vector<1x1x8x128xf32>,
    %c4_i32 = arith.constant 4 : i32
    %c0_60 = arith.constant 0 : index
    %166 = arith.index_cast %c4_i32 : i32 to index
    %c0_61 = arith.constant 0 : index
    %c0_62 = arith.constant 0 : index
    %167 = vector.load %arg2[%c0_60, %166, %c0_61, %c0_62] : memref<1x8x8x384xbf16, #tpu.memory_space<vmem>>, vector<1x1x8x384xbf16>
    %168 = vector.shape_cast %167 : vector<1x1x8x384xbf16> to vector<8x384xbf16>
    %169 = arith.extf %168 : vector<8x384xbf16> to vector<8x384xf32>
    %170 = arith.truncf %161 : vector<8x128xf32> to vector<8x128xbf16>
    %cst_63 = arith.constant dense<0.000000e+00> : vector<8x384xf32>
    %171 = tpu.matmul %170, %4, %cst_63 {dimension_numbers = #tpu.dot_dimension_numbers<[1], [0], [0], [1], [0, 0, 1, 1], [], []>} : vector<8x128xbf16>, vector<128x384xbf16>, vector<8x384xf32> -> vector<8x384xf32>
    %172 = vector.extract_strided_slice %171 {offsets = [0, 0], sizes = [8, 128], strides = [1, 1]} : vector<8x384xf32> to vector<8x128xf32>
    %173 = vector.extract_strided_slice %169 {offsets = [0, 0], sizes = [8, 128], strides = [1, 1]} : vector<8x384xf32> to vector<8x128xf32>
    %174 = arith.addf %172, %173 : vector<8x128xf32>
    %cst_64 = arith.constant 5.000000e-01 : f32
    %175 = vector.broadcast %cst_64 : f32 to vector<8x128xf32>
    %176 = arith.mulf %175, %174 : vector<8x128xf32>
    %177 = math.tanh %176 : vector<8x128xf32>
    %cst_65 = arith.constant 1.000000e+00 : f32
    %178 = vector.broadcast %cst_65 : f32 to vector<8x128xf32>
    %179 = arith.addf %178, %177 : vector<8x128xf32>
    %cst_66 = arith.constant 5.000000e-01 : f32
    %180 = vector.broadcast %cst_66 : f32 to vector<8x128xf32>
    %181 = arith.mulf %180, %179 : vector<8x128xf32>
    %182 = vector.extract_strided_slice %171 {offsets = [0, 128], sizes = [8, 128], strides = [1, 1]} : vector<8x384xf32> to vector<8x128xf32>
    %183 = vector.extract_strided_slice %169 {offsets = [0, 128], sizes = [8, 128], strides = [1, 1]} : vector<8x384xf32> to vector<8x128xf32>
    %184 = arith.addf %182, %183 : vector<8x128xf32>
    %cst_67 = arith.constant 5.000000e-01 : f32
    %185 = vector.broadcast %cst_67 : f32 to vector<8x128xf32>
    %186 = arith.mulf %185, %184 : vector<8x128xf32>
    %187 = math.tanh %186 : vector<8x128xf32>
    %cst_68 = arith.constant 1.000000e+00 : f32
    %188 = vector.broadcast %cst_68 : f32 to vector<8x128xf32>
    %189 = arith.addf %188, %187 : vector<8x128xf32>
    %cst_69 = arith.constant 5.000000e-01 : f32
    %190 = vector.broadcast %cst_69 : f32 to vector<8x128xf32>
    %191 = arith.mulf %190, %189 : vector<8x128xf32>
    %192 = vector.extract_strided_slice %171 {offsets = [0, 256], sizes = [8, 128], strides = [1, 1]} : vector<8x384xf32> to vector<8x128xf32>
    %193 = arith.addf %192, %8 : vector<8x128xf32>
    %194 = arith.mulf %181, %193 : vector<8x128xf32>
    %195 = vector.extract_strided_slice %169 {offsets = [0, 256], sizes = [8, 128], strides = [1, 1]} : vector<8x384xf32> to vector<8x128xf32>
    %196 = arith.addf %194, %195 : vector<8x128xf32>
    %197 = math.tanh %196 : vector<8x128xf32>
    %198 = arith.subf %161, %197 : vector<8x128xf32>
    %199 = arith.mulf %191, %198 : vector<8x128xf32>
    %200 = arith.addf %197, %199 : vector<8x128xf32>
    %c0_70 = arith.constant 0 : index
    %201 = arith.index_cast %c4_i32 : i32 to index
    %c0_71 = arith.constant 0 : index
    %c0_72 = arith.constant 0 : index
    %202 = vector.load %arg5[%c0_70, %201, %c0_71, %c0_72] : memref<1x8x8x128xf32, #tpu.memory_space<vmem>>, vector<1x1x8x128xf32>
    %203 = vector.shape_cast %202 : vector<1x1x8x128xf32> to vector<8x128xf32>
    %204 = vector.shape_cast %200 : vector<8x128xf32> to vector<1x1x8x128xf32>
    tpu.vector_store %arg5[%c0_70, %201, %c0_71, %c0_72], %204 {strides = array<i32>} : memref<1x8x8x128xf32, #tpu.memory_space<vmem>>, vector<1x1x8x128xf32>,
    %c5_i32 = arith.constant 5 : i32
    %c0_73 = arith.constant 0 : index
    %205 = arith.index_cast %c5_i32 : i32 to index
    %c0_74 = arith.constant 0 : index
    %c0_75 = arith.constant 0 : index
    %206 = vector.load %arg2[%c0_73, %205, %c0_74, %c0_75] : memref<1x8x8x384xbf16, #tpu.memory_space<vmem>>, vector<1x1x8x384xbf16>
    %207 = vector.shape_cast %206 : vector<1x1x8x384xbf16> to vector<8x384xbf16>
    %208 = arith.extf %207 : vector<8x384xbf16> to vector<8x384xf32>
    %209 = arith.truncf %200 : vector<8x128xf32> to vector<8x128xbf16>
    %cst_76 = arith.constant dense<0.000000e+00> : vector<8x384xf32>
    %210 = tpu.matmul %209, %4, %cst_76 {dimension_numbers = #tpu.dot_dimension_numbers<[1], [0], [0], [1], [0, 0, 1, 1], [], []>} : vector<8x128xbf16>, vector<128x384xbf16>, vector<8x384xf32> -> vector<8x384xf32>
    %211 = vector.extract_strided_slice %210 {offsets = [0, 0], sizes = [8, 128], strides = [1, 1]} : vector<8x384xf32> to vector<8x128xf32>
    %212 = vector.extract_strided_slice %208 {offsets = [0, 0], sizes = [8, 128], strides = [1, 1]} : vector<8x384xf32> to vector<8x128xf32>
    %213 = arith.addf %211, %212 : vector<8x128xf32>
    %cst_77 = arith.constant 5.000000e-01 : f32
    %214 = vector.broadcast %cst_77 : f32 to vector<8x128xf32>
    %215 = arith.mulf %214, %213 : vector<8x128xf32>
    %216 = math.tanh %215 : vector<8x128xf32>
    %cst_78 = arith.constant 1.000000e+00 : f32
    %217 = vector.broadcast %cst_78 : f32 to vector<8x128xf32>
    %218 = arith.addf %217, %216 : vector<8x128xf32>
    %cst_79 = arith.constant 5.000000e-01 : f32
    %219 = vector.broadcast %cst_79 : f32 to vector<8x128xf32>
    %220 = arith.mulf %219, %218 : vector<8x128xf32>
    %221 = vector.extract_strided_slice %210 {offsets = [0, 128], sizes = [8, 128], strides = [1, 1]} : vector<8x384xf32> to vector<8x128xf32>
    %222 = vector.extract_strided_slice %208 {offsets = [0, 128], sizes = [8, 128], strides = [1, 1]} : vector<8x384xf32> to vector<8x128xf32>
    %223 = arith.addf %221, %222 : vector<8x128xf32>
    %cst_80 = arith.constant 5.000000e-01 : f32
    %224 = vector.broadcast %cst_80 : f32 to vector<8x128xf32>
    %225 = arith.mulf %224, %223 : vector<8x128xf32>
    %226 = math.tanh %225 : vector<8x128xf32>
    %cst_81 = arith.constant 1.000000e+00 : f32
    %227 = vector.broadcast %cst_81 : f32 to vector<8x128xf32>
    %228 = arith.addf %227, %226 : vector<8x128xf32>
    %cst_82 = arith.constant 5.000000e-01 : f32
    %229 = vector.broadcast %cst_82 : f32 to vector<8x128xf32>
    %230 = arith.mulf %229, %228 : vector<8x128xf32>
    %231 = vector.extract_strided_slice %210 {offsets = [0, 256], sizes = [8, 128], strides = [1, 1]} : vector<8x384xf32> to vector<8x128xf32>
    %232 = arith.addf %231, %8 : vector<8x128xf32>
    %233 = arith.mulf %220, %232 : vector<8x128xf32>
    %234 = vector.extract_strided_slice %208 {offsets = [0, 256], sizes = [8, 128], strides = [1, 1]} : vector<8x384xf32> to vector<8x128xf32>
    %235 = arith.addf %233, %234 : vector<8x128xf32>
    %236 = math.tanh %235 : vector<8x128xf32>
    %237 = arith.subf %200, %236 : vector<8x128xf32>
    %238 = arith.mulf %230, %237 : vector<8x128xf32>
    %239 = arith.addf %236, %238 : vector<8x128xf32>
    %c0_83 = arith.constant 0 : index
    %240 = arith.index_cast %c5_i32 : i32 to index
    %c0_84 = arith.constant 0 : index
    %c0_85 = arith.constant 0 : index
    %241 = vector.load %arg5[%c0_83, %240, %c0_84, %c0_85] : memref<1x8x8x128xf32, #tpu.memory_space<vmem>>, vector<1x1x8x128xf32>
    %242 = vector.shape_cast %241 : vector<1x1x8x128xf32> to vector<8x128xf32>
    %243 = vector.shape_cast %239 : vector<8x128xf32> to vector<1x1x8x128xf32>
    tpu.vector_store %arg5[%c0_83, %240, %c0_84, %c0_85], %243 {strides = array<i32>} : memref<1x8x8x128xf32, #tpu.memory_space<vmem>>, vector<1x1x8x128xf32>,
    %c6_i32 = arith.constant 6 : i32
    %c0_86 = arith.constant 0 : index
    %244 = arith.index_cast %c6_i32 : i32 to index
    %c0_87 = arith.constant 0 : index
    %c0_88 = arith.constant 0 : index
    %245 = vector.load %arg2[%c0_86, %244, %c0_87, %c0_88] : memref<1x8x8x384xbf16, #tpu.memory_space<vmem>>, vector<1x1x8x384xbf16>
    %246 = vector.shape_cast %245 : vector<1x1x8x384xbf16> to vector<8x384xbf16>
    %247 = arith.extf %246 : vector<8x384xbf16> to vector<8x384xf32>
    %248 = arith.truncf %239 : vector<8x128xf32> to vector<8x128xbf16>
    %cst_89 = arith.constant dense<0.000000e+00> : vector<8x384xf32>
    %249 = tpu.matmul %248, %4, %cst_89 {dimension_numbers = #tpu.dot_dimension_numbers<[1], [0], [0], [1], [0, 0, 1, 1], [], []>} : vector<8x128xbf16>, vector<128x384xbf16>, vector<8x384xf32> -> vector<8x384xf32>
    %250 = vector.extract_strided_slice %249 {offsets = [0, 0], sizes = [8, 128], strides = [1, 1]} : vector<8x384xf32> to vector<8x128xf32>
    %251 = vector.extract_strided_slice %247 {offsets = [0, 0], sizes = [8, 128], strides = [1, 1]} : vector<8x384xf32> to vector<8x128xf32>
    %252 = arith.addf %250, %251 : vector<8x128xf32>
    %cst_90 = arith.constant 5.000000e-01 : f32
    %253 = vector.broadcast %cst_90 : f32 to vector<8x128xf32>
    %254 = arith.mulf %253, %252 : vector<8x128xf32>
    %255 = math.tanh %254 : vector<8x128xf32>
    %cst_91 = arith.constant 1.000000e+00 : f32
    %256 = vector.broadcast %cst_91 : f32 to vector<8x128xf32>
    %257 = arith.addf %256, %255 : vector<8x128xf32>
    %cst_92 = arith.constant 5.000000e-01 : f32
    %258 = vector.broadcast %cst_92 : f32 to vector<8x128xf32>
    %259 = arith.mulf %258, %257 : vector<8x128xf32>
    %260 = vector.extract_strided_slice %249 {offsets = [0, 128], sizes = [8, 128], strides = [1, 1]} : vector<8x384xf32> to vector<8x128xf32>
    %261 = vector.extract_strided_slice %247 {offsets = [0, 128], sizes = [8, 128], strides = [1, 1]} : vector<8x384xf32> to vector<8x128xf32>
    %262 = arith.addf %260, %261 : vector<8x128xf32>
    %cst_93 = arith.constant 5.000000e-01 : f32
    %263 = vector.broadcast %cst_93 : f32 to vector<8x128xf32>
    %264 = arith.mulf %263, %262 : vector<8x128xf32>
    %265 = math.tanh %264 : vector<8x128xf32>
    %cst_94 = arith.constant 1.000000e+00 : f32
    %266 = vector.broadcast %cst_94 : f32 to vector<8x128xf32>
    %267 = arith.addf %266, %265 : vector<8x128xf32>
    %cst_95 = arith.constant 5.000000e-01 : f32
    %268 = vector.broadcast %cst_95 : f32 to vector<8x128xf32>
    %269 = arith.mulf %268, %267 : vector<8x128xf32>
    %270 = vector.extract_strided_slice %249 {offsets = [0, 256], sizes = [8, 128], strides = [1, 1]} : vector<8x384xf32> to vector<8x128xf32>
    %271 = arith.addf %270, %8 : vector<8x128xf32>
    %272 = arith.mulf %259, %271 : vector<8x128xf32>
    %273 = vector.extract_strided_slice %247 {offsets = [0, 256], sizes = [8, 128], strides = [1, 1]} : vector<8x384xf32> to vector<8x128xf32>
    %274 = arith.addf %272, %273 : vector<8x128xf32>
    %275 = math.tanh %274 : vector<8x128xf32>
    %276 = arith.subf %239, %275 : vector<8x128xf32>
    %277 = arith.mulf %269, %276 : vector<8x128xf32>
    %278 = arith.addf %275, %277 : vector<8x128xf32>
    %c0_96 = arith.constant 0 : index
    %279 = arith.index_cast %c6_i32 : i32 to index
    %c0_97 = arith.constant 0 : index
    %c0_98 = arith.constant 0 : index
    %280 = vector.load %arg5[%c0_96, %279, %c0_97, %c0_98] : memref<1x8x8x128xf32, #tpu.memory_space<vmem>>, vector<1x1x8x128xf32>
    %281 = vector.shape_cast %280 : vector<1x1x8x128xf32> to vector<8x128xf32>
    %282 = vector.shape_cast %278 : vector<8x128xf32> to vector<1x1x8x128xf32>
    tpu.vector_store %arg5[%c0_96, %279, %c0_97, %c0_98], %282 {strides = array<i32>} : memref<1x8x8x128xf32, #tpu.memory_space<vmem>>, vector<1x1x8x128xf32>,
    %c7_i32 = arith.constant 7 : i32
    %c0_99 = arith.constant 0 : index
    %283 = arith.index_cast %c7_i32 : i32 to index
    %c0_100 = arith.constant 0 : index
    %c0_101 = arith.constant 0 : index
    %284 = vector.load %arg2[%c0_99, %283, %c0_100, %c0_101] : memref<1x8x8x384xbf16, #tpu.memory_space<vmem>>, vector<1x1x8x384xbf16>
    %285 = vector.shape_cast %284 : vector<1x1x8x384xbf16> to vector<8x384xbf16>
    %286 = arith.extf %285 : vector<8x384xbf16> to vector<8x384xf32>
    %287 = arith.truncf %278 : vector<8x128xf32> to vector<8x128xbf16>
    %cst_102 = arith.constant dense<0.000000e+00> : vector<8x384xf32>
    %288 = tpu.matmul %287, %4, %cst_102 {dimension_numbers = #tpu.dot_dimension_numbers<[1], [0], [0], [1], [0, 0, 1, 1], [], []>} : vector<8x128xbf16>, vector<128x384xbf16>, vector<8x384xf32> -> vector<8x384xf32>
    %289 = vector.extract_strided_slice %288 {offsets = [0, 0], sizes = [8, 128], strides = [1, 1]} : vector<8x384xf32> to vector<8x128xf32>
    %290 = vector.extract_strided_slice %286 {offsets = [0, 0], sizes = [8, 128], strides = [1, 1]} : vector<8x384xf32> to vector<8x128xf32>
    %291 = arith.addf %289, %290 : vector<8x128xf32>
    %cst_103 = arith.constant 5.000000e-01 : f32
    %292 = vector.broadcast %cst_103 : f32 to vector<8x128xf32>
    %293 = arith.mulf %292, %291 : vector<8x128xf32>
    %294 = math.tanh %293 : vector<8x128xf32>
    %cst_104 = arith.constant 1.000000e+00 : f32
    %295 = vector.broadcast %cst_104 : f32 to vector<8x128xf32>
    %296 = arith.addf %295, %294 : vector<8x128xf32>
    %cst_105 = arith.constant 5.000000e-01 : f32
    %297 = vector.broadcast %cst_105 : f32 to vector<8x128xf32>
    %298 = arith.mulf %297, %296 : vector<8x128xf32>
    %299 = vector.extract_strided_slice %288 {offsets = [0, 128], sizes = [8, 128], strides = [1, 1]} : vector<8x384xf32> to vector<8x128xf32>
    %300 = vector.extract_strided_slice %286 {offsets = [0, 128], sizes = [8, 128], strides = [1, 1]} : vector<8x384xf32> to vector<8x128xf32>
    %301 = arith.addf %299, %300 : vector<8x128xf32>
    %cst_106 = arith.constant 5.000000e-01 : f32
    %302 = vector.broadcast %cst_106 : f32 to vector<8x128xf32>
    %303 = arith.mulf %302, %301 : vector<8x128xf32>
    %304 = math.tanh %303 : vector<8x128xf32>
    %cst_107 = arith.constant 1.000000e+00 : f32
    %305 = vector.broadcast %cst_107 : f32 to vector<8x128xf32>
    %306 = arith.addf %305, %304 : vector<8x128xf32>
    %cst_108 = arith.constant 5.000000e-01 : f32
    %307 = vector.broadcast %cst_108 : f32 to vector<8x128xf32>
    %308 = arith.mulf %307, %306 : vector<8x128xf32>
    %309 = vector.extract_strided_slice %288 {offsets = [0, 256], sizes = [8, 128], strides = [1, 1]} : vector<8x384xf32> to vector<8x128xf32>
    %310 = arith.addf %309, %8 : vector<8x128xf32>
    %311 = arith.mulf %298, %310 : vector<8x128xf32>
    %312 = vector.extract_strided_slice %286 {offsets = [0, 256], sizes = [8, 128], strides = [1, 1]} : vector<8x384xf32> to vector<8x128xf32>
    %313 = arith.addf %311, %312 : vector<8x128xf32>
    %314 = math.tanh %313 : vector<8x128xf32>
    %315 = arith.subf %278, %314 : vector<8x128xf32>
    %316 = arith.mulf %308, %315 : vector<8x128xf32>
    %317 = arith.addf %314, %316 : vector<8x128xf32>
    %c0_109 = arith.constant 0 : index
    %318 = arith.index_cast %c7_i32 : i32 to index
    %c0_110 = arith.constant 0 : index
    %c0_111 = arith.constant 0 : index
    %319 = vector.load %arg5[%c0_109, %318, %c0_110, %c0_111] : memref<1x8x8x128xf32, #tpu.memory_space<vmem>>, vector<1x1x8x128xf32>
    %320 = vector.shape_cast %319 : vector<1x1x8x128xf32> to vector<8x128xf32>
    %321 = vector.shape_cast %317 : vector<8x128xf32> to vector<1x1x8x128xf32>
    tpu.vector_store %arg5[%c0_109, %318, %c0_110, %c0_111], %321 {strides = array<i32>} : memref<1x8x8x128xf32, #tpu.memory_space<vmem>>, vector<1x1x8x128xf32>,
    %c8_i32 = arith.constant 8 : i32
    %c0_112 = arith.constant 0 : index
    %c0_113 = arith.constant 0 : index
    %322 = vector.load %arg6[%c0_112, %c0_113] : memref<8x128xf32, #tpu.memory_space<vmem>>, vector<8x128xf32>
    tpu.vector_store %arg6[%c0_112, %c0_113], %317 {strides = array<i32>} : memref<8x128xf32, #tpu.memory_space<vmem>>, vector<8x128xf32>,
    return
  }
  func.func @transform_0(%arg0: i32, %arg1: i32) -> (i32, i32, i32, i32) {
    %c0_i32 = arith.constant 0 : i32
    %c0_i32_0 = arith.constant 0 : i32
    %c0_i32_1 = arith.constant 0 : i32
    return %arg0, %arg1, %c0_i32, %c0_i32_0 : i32, i32, i32, i32
  }
  func.func @transform_1(%arg0: i32, %arg1: i32) -> (i32, i32, i32) {
    %c0_i32 = arith.constant 0 : i32
    %c0_i32_0 = arith.constant 0 : i32
    %c0_i32_1 = arith.constant 0 : i32
    return %arg0, %c0_i32, %c0_i32_0 : i32, i32, i32
  }
  func.func @transform_2(%arg0: i32, %arg1: i32) -> (i32, i32, i32) {
    %c0_i32 = arith.constant 0 : i32
    %c0_i32_0 = arith.constant 0 : i32
    %c0_i32_1 = arith.constant 0 : i32
    return %arg0, %c0_i32, %c0_i32_0 : i32, i32, i32
  }
  func.func @transform_3(%arg0: i32, %arg1: i32) -> (i32, i32, i32, i32) {
    %c0_i32 = arith.constant 0 : i32
    %c0_i32_0 = arith.constant 0 : i32
    %c0_i32_1 = arith.constant 0 : i32
    return %arg0, %arg1, %c0_i32, %c0_i32_0 : i32, i32, i32, i32
  }
}

</mosaic_0001>

<bundles_post_ra>
// kernel: _gru2_forward_impl.1
= control target key start
LH: loop header
LB: loop body
LE: loop exit
PB: predicated region body
PF: predicated region fallthrough
CT: control target
= control target key end

     0   :  { %s1845_s12 = smov 0   ;;  %s1847_s13 = smov 0   ;;  %s2326_s0 = inlined_call_operand.vmem [shape: bf16[2,8,8,384], index: 0, kind: input, shape index: {}]   ;;  %s2327_s1 = inlined_call_operand.vmem [shape: bf16[2,128,384], index: 1, kind: input, shape index: {}]   ;;  %s2328_s2 = inlined_call_operand.vmem [shape: f32[2,1,128], index: 2, kind: input, shape index: {}]   ;;  %s2329_s3 = inlined_call_operand.vmem [shape: f32[2,8,8,128], index: 3, kind: output, shape index: {}]  }
   0x1   :  { %s1849_s14 = smov 0  }
   0x2 LB: > { %s25_s15 = sadd.s32 1, %s1815_s13  ;;  %p1397_p0 = scmp.ge.s32.totalorder %s1819_s14, 1  ;;  %s1819_s14 = sphi %s1849_s14, %s13_s14   ;;  %s1815_s13 = sphi %s1847_s13, %s2331_s13   ;;  %s1811_s12 = sphi %s1845_s12, %s2330_s12  }
   0x3   : > { %p27_p1 = scmp.ge.s32.totalorder %s25_s15, 2  ;;  %p177_p2 = scmp.lt.s32.totalorder %s1819_s14, 3 }
   0x5   : > { %s2333_s15 = smov (%p27_p1, %s25_s15), 0  ;;  %p178_p3 = pnand %p1397_p0, %p177_p2 }
   0x6   : > { %p219_p4 = scmp.lt.s32.totalorder (!%p178_p3), %s1811_s12, 1  ;;  %v1821_v0 = vmov (!%p178_p3), 0.0   ;;  %v1822_v1 = vmov (!%p178_p3), 0   ;;  %vm1823_vm0 = vmmov (!%p178_p3), 0   ;;  %v1824_v26 = vmov (!%p178_p3), 0.0|0.0  }
   0x7   : > { %181 = sbr.rel (%p178_p3) target bundleno = 2082 (0x822), region = 32  ;;  %1523 = vmatprep.subr.bf16.mxu1 (!%p178_p3), %v1821_v0  ;;  %459 = vmatprep.mubr.bf16.mxu0 (!%p178_p3), %v1822_v1 }
   0x8   : > { %1539 = vmatprep.mubr.msk.bf16.mxu1 (!%p178_p3), %vm1823_vm0, %v1821_v0 }
   0xe   : > { %s2335_s12 = smov (!%p219_p4, %s1811_s12), 1 }
   0xf   : > { %s1684_s16 = smul.u32 192, %s2335_s12  ;;  %s236_s26 = scalar_lea.vmem %s2328_s2, %s2335_s12 }
  0x10   : > { %s1683_s20 = smul.u32 96, %s2335_s12  ;;  %v2026_v41 = vld [vmem:[%s236_s26] ss:$0 sm:$0xff]  ;;  %s1450_s27 = sshll.u32 %s2335_s12, 6 }
  0x11   : > { %s1873_s19 = scalar_lea.vmem %s2327_s1, %s1684_s16  ;;  %s2037_s30 = scalar_lea.vmem %s2329_s3, %s1450_s27 }
  0x12   : > { %v1876_v2 = vld [vmem:[%s1873_s19 + $0x4] ss:$12 sps:$4 sm:$0xff]   ;;  %v1879_v3 = vld [vmem:[%s1873_s19] ss:$12 sps:$4 sm:$0xff]   ;;  %v1883_v4 = vld [vmem:[%s1873_s19 + $0x1c] ss:$12 sps:$4 sm:$0xff]   ;;  %s2019_s23 = scalar_lea.vmem %s2326_s0, %s1683_s20 }
  0x13   : > { %427 = vmatprep.subr.bf16.mxu0 %v1876_v2  ;;  %v1887_v5 = vld [vmem:[%s1873_s19 + $0x18] ss:$12 sps:$4 sm:$0xff]   ;;  %v1891_v6 = vld [vmem:[%s1873_s19 + $0x34] ss:$12 sps:$4 sm:$0xff]   ;;  %v1898_v8 = vld [vmem:[%s1873_s19 + $0x30] ss:$12 sps:$4 sm:$0xff]  }
  0x14   : > { %428 = vmatpush1.bf16.msra.mxu0 %v1879_v3  ;;  %v1894_v7 = vld [vmem:[%s1873_s19 + $0x8] ss:$12 sps:$4 sm:$0xff]   ;;  %v1901_v9 = vld [vmem:[%s1873_s19 + $0x4c] ss:$12 sps:$4 sm:$0xff]   ;;  %v1914_v12 = vld [vmem:[%s1873_s19 + $0x64] ss:$12 sps:$4 sm:$0xff]  }
  0x15   : > { %429 = vmatprep.subr.bf16.mxu0 %v1883_v4  ;;  %1524 = vmatpush3.bf16.msra.mxu1 %v1894_v7  ;;  %v1906_v10 = vld [vmem:[%s1873_s19 + $0x20] ss:$12 sps:$4 sm:$0xff]   ;;  %v1910_v11 = vld [vmem:[%s1873_s19 + $0x48] ss:$12 sps:$4 sm:$0xff]   ;;  %v1919_v13 = vld [vmem:[%s1873_s19 + $0x38] ss:$12 sps:$4 sm:$0xff]  }
  0x16   : > { %1525 = vmatprep.subr.bf16.mxu1 %v1821_v0  ;;  %v1923_v14 = vld [vmem:[%s1873_s19 + $0x60] ss:$12 sps:$4 sm:$0xff]   ;;  %v1927_v15 = vld [vmem:[%s1873_s19 + $0x7c] ss:$12 sps:$4 sm:$0xff]   ;;  %v1937_v17 = vld [vmem:[%s1873_s19 + $0x78] ss:$12 sps:$4 sm:$0xff]  }
  0x17   : > { %v1932_v16 = vld [vmem:[%s1873_s19 + $0x50] ss:$12 sps:$4 sm:$0xff]   ;;  %v1941_v18 = vld [vmem:[%s1873_s19 + $0x94] ss:$12 sps:$4 sm:$0xff]   ;;  %v1954_v21 = vld [vmem:[%s1873_s19 + $0xac] ss:$12 sps:$4 sm:$0xff]  }
  0x18   : > { %430 = vmatpush1.bf16.msra.mxu0 %v1887_v5  ;;  %v1945_v19 = vld [vmem:[%s1873_s19 + $0x68] ss:$12 sps:$4 sm:$0xff]   ;;  %v1950_v20 = vld [vmem:[%s1873_s19 + $0x90] ss:$12 sps:$4 sm:$0xff]   ;;  %v1958_v22 = vld [vmem:[%s1873_s19 + $0x80] ss:$12 sps:$4 sm:$0xff]  }
  0x19   : > { %431 = vmatprep.subr.bf16.mxu0 %v1891_v6  ;;  %1526 = vmatpush3.bf16.msra.mxu1 %v1906_v10  ;;  %v1963_v23 = vld [vmem:[%s1873_s19 + $0xa8] ss:$12 sps:$4 sm:$0xff]   ;;  %v1968_v24 = vld [vmem:[%s1873_s19 + $0x98] ss:$12 sps:$4 sm:$0xff]   ;;  %v1974_v25 = vld [vmem:[%s1873_s19 + $0xb0] ss:$12 sps:$4 sm:$0xff]  }
  0x1a   : > { %1527 = vmatprep.subr.bf16.mxu1 %v1821_v0  ;;  %v293_v27 = vld [vmem:[%s2019_s23] sm:$0xff]  ;;  %v2029_v44 = vld [vmem:[%s2019_s23 + $0x8] ss:$12 sps:$4 sm:$0xff]   ;;  %v1427_v59 = vld [vmem:[%s2019_s23 + $0xc] sm:$0xff] }
  0x1b   : > { %v295_v28 = vunpack.c.l.bf16 %v293_v27  ;;  %v296_v36 = vunpack.c.h.bf16 %v293_v27  ;;  %v297_v47 = vunpack.c.l.bf16 %v2029_v44  ;;  %v529_v60 = vunpack.c.l.bf16 %v1427_v59 }
  0x1c   : > { %432 = vmatpush1.bf16.msra.mxu0 %v1898_v8 }
  0x1d   : > { %433 = vmatprep.subr.bf16.mxu0 %v1901_v9  ;;  %1528 = vmatpush3.bf16.msra.mxu1 %v1919_v13 }
  0x1e   : > { %1529 = vmatprep.subr.bf16.mxu1 %v1821_v0 }
  0x20   : > { %434 = vmatpush1.bf16.msra.mxu0 %v1910_v11 }
  0x21   : > { %435 = vmatprep.subr.bf16.mxu0 %v1914_v12  ;;  %1530 = vmatpush3.bf16.msra.mxu1 %v1932_v16 }
  0x22   : > { %1531 = vmatprep.subr.bf16.mxu1 %v1821_v0 }
  0x24   : > { %436 = vmatpush1.bf16.msra.mxu0 %v1923_v14 }
  0x25   : > { %437 = vmatprep.subr.bf16.mxu0 %v1927_v15  ;;  %1532 = vmatpush3.bf16.msra.mxu1 %v1945_v19 }
  0x26   : > { %1533 = vmatprep.subr.bf16.mxu1 %v1821_v0 }
  0x28   : > { %438 = vmatpush1.bf16.msra.mxu0 %v1937_v17 }
  0x29   : > { %439 = vmatprep.subr.bf16.mxu0 %v1941_v18  ;;  %1534 = vmatpush3.bf16.msra.mxu1 %v1958_v22 }
  0x2a   : > { %1535 = vmatprep.subr.bf16.mxu1 %v1821_v0 }
  0x2c   : > { %440 = vmatpush1.bf16.msra.mxu0 %v1950_v20 }
  0x2d   : > { %441 = vmatprep.subr.bf16.mxu0 %v1954_v21  ;;  %1536 = vmatpush3.bf16.msra.mxu1 %v1968_v24 }
  0x2e   : > { %1537 = vmatprep.subr.bf16.mxu1 %v1821_v0 }
  0x30   : > { %442 = vmatpush1.bf16.msra.mxu0 %v1963_v23 }
  0x31   : > { %533 = vmatprep.subr.bf16.mxu0 %v1876_v2  ;;  %1538 = vmatpush3.bf16.msra.mxu1 %v1974_v25 }
  0x32   : > { %1543 = vmatprep.subr.bf16.mxu1 %v1821_v0 }
  0x33   : > { %460 = vmatmul.mubr.bf16.vlgmr.msra.gmra.mrb[0].mxu0 %v1824_v26 }
  0x34   : > { %534 = vmatpush1.bf16.msra.mxu0 %v1879_v3  ;;  %565 = vmatprep.mubr.bf16.mxu0 %v1822_v1 }
  0x35   : > { %535 = vmatprep.subr.bf16.mxu0 %v1883_v4  ;;  %1540 = vmatmul.mubr.bf16.vlgmr.msra.gmra.mrb[0].mxu1 %v1824_v26 }
  0x36   : > { %1544 = vmatpush3.bf16.msra.mxu1 %v1894_v7  ;;  %1559 = vmatprep.mubr.msk.bf16.mxu1 %vm1823_vm0, %v1821_v0 }
  0x37   : > { %1545 = vmatprep.subr.bf16.mxu1 %v1821_v0 }
  0x38   : > { %536 = vmatpush1.bf16.msra.mxu0 %v1887_v5 }
  0x39   : > { %537 = vmatprep.subr.bf16.mxu0 %v1891_v6 }
  0x3a   : > { %1546 = vmatpush3.bf16.msra.mxu1 %v1906_v10 }
  0x3b   : > { %1547 = vmatprep.subr.bf16.mxu1 %v1821_v0 }
  0x3c   : > { %538 = vmatpush1.bf16.msra.mxu0 %v1898_v8 }
  0x3d   : > { %539 = vmatprep.subr.bf16.mxu0 %v1901_v9 }
  0x3e   : > { %1548 = vmatpush3.bf16.msra.mxu1 %v1919_v13 }
  0x3f   : > { %1549 = vmatprep.subr.bf16.mxu1 %v1821_v0 }
  0x40   : > { %540 = vmatpush1.bf16.msra.mxu0 %v1910_v11 }
  0x41   : > { %541 = vmatprep.subr.bf16.mxu0 %v1914_v12 }
  0x42   : > { %1550 = vmatpush3.bf16.msra.mxu1 %v1932_v16 }
  0x43   : > { %1551 = vmatprep.subr.bf16.mxu1 %v1821_v0 }
  0x44   : > { %542 = vmatpush1.bf16.msra.mxu0 %v1923_v14 }
  0x45   : > { %543 = vmatprep.subr.bf16.mxu0 %v1927_v15 }
  0x46   : > { %1552 = vmatpush3.bf16.msra.mxu1 %v1945_v19 }
  0x47   : > { %1553 = vmatprep.subr.bf16.mxu1 %v1821_v0 }
  0x48   : > { %544 = vmatpush1.bf16.msra.mxu0 %v1937_v17 }
  0x49   : > { %545 = vmatprep.subr.bf16.mxu0 %v1941_v18 }
  0x4a   : > { %1554 = vmatpush3.bf16.msra.mxu1 %v1958_v22 }
  0x4b   : > { %1555 = vmatprep.subr.bf16.mxu1 %v1821_v0 }
  0x4c   : > { %546 = vmatpush1.bf16.msra.mxu0 %v1950_v20 }
  0x4d   : > { %547 = vmatprep.subr.bf16.mxu0 %v1954_v21 }
  0x4e   : > { %1556 = vmatpush3.bf16.msra.mxu1 %v1968_v24 }
  0x4f   : > { %1557 = vmatprep.subr.bf16.mxu1 %v1821_v0 }
  0x50   : > { %548 = vmatpush1.bf16.msra.mxu0 %v1963_v23 }
  0x51   : > { %640 = vmatprep.subr.bf16.mxu0 %v1876_v2 }
  0x52   : > { %1558 = vmatpush3.bf16.msra.mxu1 %v1974_v25 }
  0x53   : > { %1563 = vmatprep.subr.bf16.mxu1 %v1821_v0 }
 0x106   : > { %v461_v29 = vpop.f32.mrb[0].mxu0 }
 0x107   : > { %v508_v30 = vadd.f32 %v461_v29, %v295_v28  ;;  %v463_v31 = vpop.f32.mrb[1].mxu0 }
 0x108   : > { %v465_v32 = vpop.f32.mrb[2].mxu0  ;;  %v502_v35 = vpop.f32.mrb[0].mxu1  ;;  %v513_v40 = vadd.f32 %v463_v31, %v296_v36 }
 0x109   : > { %v509_v33 = vmul.f32 0.5, %v508_v30  ;;  %v466_v34 = vpop.f32.mrb[3].mxu0  ;;  %v1541_v37 = vpop.f32.mrb[1].mxu1  ;;  %v518_v46 = vadd.f32 %v2026_v41, %v502_v35 }
 0x10a   : > { %v505_v38 = vpop.f32.mrb[2].mxu1  ;;  %v514_v42 = vmul.f32 0.5, %v513_v40 }
 0x10b   : > { %1745 = vtanh.f32 %v509_v33  ;;  %v1542_v39 = vpop.f32.mrb[3].mxu1  ;;  %v530_v33 = vunpack.c.h.bf16 %v1427_v59  ;;  %v531_v38 = vunpack.c.h.bf16 %v2029_v44 }
 0x10c   : > { %1747 = vtanh.f32 %v514_v42 }
 0x115   : > { %v1746_v43 = vpop.eup %1745 }
 0x116   : > { %v511_v45 = vadd.f32 1.0, %v1746_v43  ;;  %v1748_v51 = vpop.eup %1747 }
 0x117   : > { %v516_v52 = vadd.f32 1.0, %v1748_v51 }
 0x118   : > { %v512_v48 = vmul.f32 0.5, %v511_v45 }
 0x119   : > { %v517_v54 = vmul.f32 0.5, %v516_v52  ;;  %v1430_v52 = vld [vmem:[%s2019_s23 + $0x18] sm:$0xff] }
 0x11a   : > { %v519_v49 = vmul.f32 %v518_v46, %v512_v48 }
 0x11c   : > { %v520_v50 = vadd.f32 %v519_v49, %v297_v47 }
 0x11e   : > { %1749 = vtanh.f32 %v520_v50 }
 0x128   : > { %v1750_v53 = vpop.eup %1749 }
 0x129   : > { %v522_v55 = vsub.f32 0.0, %v1750_v53 }
 0x12b   : > { %v523_v56 = vmul.f32 %v522_v55, %v517_v54 }
 0x12d   : > { %v2039_v57 = vadd.f32 %v1750_v53, %v523_v56  ;;  %v636_v53 = vunpack.c.l.bf16 %v1430_v52 }
 0x12f   : > { %525 = vst [vmem:[%s2037_s30] sm:$0xff] %v2039_v57  ;;  %v532_v58 = vpack.c.bf16 %v2039_v57, %v2039_v57 }
 0x131   : > { %566 = vmatmul.mubr.bf16.vlgmr.msra.gmra.mrb[4].mxu0 %v532_v58  ;;  %1560 = vmatmul.mubr.bf16.vlgmr.msra.gmra.mrb[4].mxu1 %v532_v58 }
 0x132   : > { %641 = vmatpush1.bf16.msra.mxu0 %v1879_v3  ;;  %1564 = vmatpush3.bf16.msra.mxu1 %v1894_v7 }
 0x133   : > { %642 = vmatprep.subr.bf16.mxu0 %v1883_v4  ;;  %1565 = vmatprep.subr.bf16.mxu1 %v1821_v0 }
 0x134   : > { %672 = vmatprep.mubr.bf16.mxu0 %v1822_v1  ;;  %1579 = vmatprep.mubr.msk.bf16.mxu1 %vm1823_vm0, %v1821_v0 }
 0x136   : > { %643 = vmatpush1.bf16.msra.mxu0 %v1887_v5  ;;  %1566 = vmatpush3.bf16.msra.mxu1 %v1906_v10 }
 0x137   : > { %644 = vmatprep.subr.bf16.mxu0 %v1891_v6  ;;  %1567 = vmatprep.subr.bf16.mxu1 %v1821_v0 }
 0x13a   : > { %645 = vmatpush1.bf16.msra.mxu0 %v1898_v8  ;;  %1568 = vmatpush3.bf16.msra.mxu1 %v1919_v13 }
 0x13b   : > { %646 = vmatprep.subr.bf16.mxu0 %v1901_v9  ;;  %1569 = vmatprep.subr.bf16.mxu1 %v1821_v0 }
 0x13e   : > { %647 = vmatpush1.bf16.msra.mxu0 %v1910_v11  ;;  %1570 = vmatpush3.bf16.msra.mxu1 %v1932_v16 }
 0x13f   : > { %648 = vmatprep.subr.bf16.mxu0 %v1914_v12  ;;  %1571 = vmatprep.subr.bf16.mxu1 %v1821_v0 }
 0x142   : > { %649 = vmatpush1.bf16.msra.mxu0 %v1923_v14  ;;  %1572 = vmatpush3.bf16.msra.mxu1 %v1945_v19 }
 0x143   : > { %650 = vmatprep.subr.bf16.mxu0 %v1927_v15  ;;  %1573 = vmatprep.subr.bf16.mxu1 %v1821_v0 }
 0x146   : > { %651 = vmatpush1.bf16.msra.mxu0 %v1937_v17  ;;  %1574 = vmatpush3.bf16.msra.mxu1 %v1958_v22 }
 0x147   : > { %652 = vmatprep.subr.bf16.mxu0 %v1941_v18  ;;  %1575 = vmatprep.subr.bf16.mxu1 %v1821_v0 }
 0x14a   : > { %653 = vmatpush1.bf16.msra.mxu0 %v1950_v20  ;;  %1576 = vmatpush3.bf16.msra.mxu1 %v1968_v24 }
 0x14b   : > { %654 = vmatprep.subr.bf16.mxu0 %v1954_v21  ;;  %1577 = vmatprep.subr.bf16.mxu1 %v1821_v0 }
 0x14e   : > { %655 = vmatpush1.bf16.msra.mxu0 %v1963_v23  ;;  %1578 = vmatpush3.bf16.msra.mxu1 %v1974_v25 }
 0x14f   : > { %747 = vmatprep.subr.bf16.mxu0 %v1876_v2  ;;  %1583 = vmatprep.subr.bf16.mxu1 %v1821_v0 }
 0x204   : > { %v567_v61 = vpop.f32.mrb[4].mxu0  ;;  %v608_v62 = vpop.f32.mrb[4].mxu1 }
 0x205   : > { %v614_v63 = vadd.f32 %v567_v61, %v529_v60  ;;  %v569_v26 = vpop.f32.mrb[5].mxu0  ;;  %v1561_v27 = vpop.f32.mrb[5].mxu1  ;;  %v624_v40 = vadd.f32 %v2026_v41, %v608_v62 }
 0x206   : > { %v571_v28 = vpop.f32.mrb[6].mxu0  ;;  %v611_v29 = vpop.f32.mrb[6].mxu1  ;;  %v619_v34 = vadd.f32 %v569_v26, %v530_v33  ;;  %v637_v26 = vunpack.c.h.bf16 %v1430_v52 }
 0x207   : > { %v615_v30 = vmul.f32 0.5, %v614_v63  ;;  %v572_v31 = vpop.f32.mrb[7].mxu0  ;;  %v1562_v32 = vpop.f32.mrb[7].mxu1 }
 0x208   : > { %v620_v35 = vmul.f32 0.5, %v619_v34 }
 0x209   : > { %1751 = vtanh.f32 %v615_v30  ;;  %v2127_v30 = vld [vmem:[%s2019_s23 + $0x20] ss:$12 sps:$4 sm:$0xff]  }
 0x20a   : > { %1753 = vtanh.f32 %v620_v35  ;;  %v638_v32 = vunpack.c.l.bf16 %v2127_v30 }
 0x213   : > { %v1752_v36 = vpop.eup %1751 }
 0x214   : > { %v617_v37 = vadd.f32 1.0, %v1752_v36  ;;  %v1754_v45 = vpop.eup %1753 }
 0x215   : > { %v622_v46 = vadd.f32 1.0, %v1754_v45 }
 0x216   : > { %v618_v39 = vmul.f32 0.5, %v617_v37 }
 0x217   : > { %v623_v48 = vmul.f32 0.5, %v622_v46 }
 0x218   : > { %v625_v42 = vmul.f32 %v624_v40, %v618_v39 }
 0x21a   : > { %v626_v43 = vadd.f32 %v625_v42, %v531_v38 }
 0x21c   : > { %1755 = vtanh.f32 %v626_v43 }
 0x226   : > { %v1756_v47 = vpop.eup %1755 }
 0x227   : > { %v628_v49 = vsub.f32 %v2039_v57, %v1756_v47 }
 0x229   : > { %v629_v50 = vmul.f32 %v628_v49, %v623_v48 }
 0x22b   : > { %v2084_v51 = vadd.f32 %v1756_v47, %v629_v50  ;;  %v1433_v47 = vld [vmem:[%s2019_s23 + $0x24] sm:$0xff] }
 0x22c   : > { %v743_v48 = vunpack.c.l.bf16 %v1433_v47 }
 0x22d   : > { %1429 = vst [vmem:[%s2037_s30 + $0x8] sm:$0xff] %v2084_v51  ;;  %v639_v44 = vpack.c.bf16 %v2084_v51, %v2084_v51 }
 0x22f   : > { %673 = vmatmul.mubr.bf16.vlgmr.msra.gmra.mrb[8].mxu0 %v639_v44  ;;  %1580 = vmatmul.mubr.bf16.vlgmr.msra.gmra.mrb[8].mxu1 %v639_v44 }
 0x230   : > { %748 = vmatpush1.bf16.msra.mxu0 %v1879_v3  ;;  %1584 = vmatpush3.bf16.msra.mxu1 %v1894_v7 }
 0x231   : > { %749 = vmatprep.subr.bf16.mxu0 %v1883_v4  ;;  %1585 = vmatprep.subr.bf16.mxu1 %v1821_v0 }
 0x232   : > { %779 = vmatprep.mubr.bf16.mxu0 %v1822_v1  ;;  %1599 = vmatprep.mubr.msk.bf16.mxu1 %vm1823_vm0, %v1821_v0 }
 0x234   : > { %750 = vmatpush1.bf16.msra.mxu0 %v1887_v5  ;;  %1586 = vmatpush3.bf16.msra.mxu1 %v1906_v10 }
 0x235   : > { %751 = vmatprep.subr.bf16.mxu0 %v1891_v6  ;;  %1587 = vmatprep.subr.bf16.mxu1 %v1821_v0 }
 0x238   : > { %752 = vmatpush1.bf16.msra.mxu0 %v1898_v8  ;;  %1588 = vmatpush3.bf16.msra.mxu1 %v1919_v13 }
 0x239   : > { %753 = vmatprep.subr.bf16.mxu0 %v1901_v9  ;;  %1589 = vmatprep.subr.bf16.mxu1 %v1821_v0 }
 0x23c   : > { %754 = vmatpush1.bf16.msra.mxu0 %v1910_v11  ;;  %1590 = vmatpush3.bf16.msra.mxu1 %v1932_v16 }
 0x23d   : > { %755 = vmatprep.subr.bf16.mxu0 %v1914_v12  ;;  %1591 = vmatprep.subr.bf16.mxu1 %v1821_v0 }
 0x240   : > { %756 = vmatpush1.bf16.msra.mxu0 %v1923_v14  ;;  %1592 = vmatpush3.bf16.msra.mxu1 %v1945_v19 }
 0x241   : > { %757 = vmatprep.subr.bf16.mxu0 %v1927_v15  ;;  %1593 = vmatprep.subr.bf16.mxu1 %v1821_v0 }
 0x244   : > { %758 = vmatpush1.bf16.msra.mxu0 %v1937_v17  ;;  %1594 = vmatpush3.bf16.msra.mxu1 %v1958_v22 }
 0x245   : > { %759 = vmatprep.subr.bf16.mxu0 %v1941_v18  ;;  %1595 = vmatprep.subr.bf16.mxu1 %v1821_v0 }
 0x248   : > { %760 = vmatpush1.bf16.msra.mxu0 %v1950_v20  ;;  %1596 = vmatpush3.bf16.msra.mxu1 %v1968_v24 }
 0x249   : > { %761 = vmatprep.subr.bf16.mxu0 %v1954_v21  ;;  %1597 = vmatprep.subr.bf16.mxu1 %v1821_v0 }
 0x24c   : > { %762 = vmatpush1.bf16.msra.mxu0 %v1963_v23  ;;  %1598 = vmatpush3.bf16.msra.mxu1 %v1974_v25 }
 0x24d   : > { %854 = vmatprep.subr.bf16.mxu0 %v1876_v2  ;;  %1603 = vmatprep.subr.bf16.mxu1 %v1821_v0 }
 0x302   : > { %v674_v54 = vpop.f32.mrb[8].mxu0  ;;  %v715_v55 = vpop.f32.mrb[8].mxu1 }
 0x303   : > { %v721_v56 = vadd.f32 %v674_v54, %v636_v53  ;;  %v676_v57 = vpop.f32.mrb[9].mxu0  ;;  %v1581_v58 = vpop.f32.mrb[9].mxu1  ;;  %v731_v34 = vadd.f32 %v2026_v41, %v715_v55 }
 0x304   : > { %v678_v59 = vpop.f32.mrb[10].mxu0  ;;  %v718_v60 = vpop.f32.mrb[10].mxu1  ;;  %v726_v27 = vadd.f32 %v676_v57, %v637_v26  ;;  %v744_v58 = vunpack.c.h.bf16 %v1433_v47 }
 0x305   : > { %v722_v61 = vmul.f32 0.5, %v721_v56  ;;  %v679_v62 = vpop.f32.mrb[11].mxu0  ;;  %v1582_v63 = vpop.f32.mrb[11].mxu1 }
 0x306   : > { %v727_v28 = vmul.f32 0.5, %v726_v27  ;;  %v745_v63 = vunpack.c.h.bf16 %v2127_v30 }
 0x307   : > { %1757 = vtanh.f32 %v722_v61 }
 0x308   : > { %1759 = vtanh.f32 %v727_v28 }
 0x311   : > { %v1758_v29 = vpop.eup %1757 }
 0x312   : > { %v724_v31 = vadd.f32 1.0, %v1758_v29  ;;  %v1760_v37 = vpop.eup %1759 }
 0x313   : > { %v729_v38 = vadd.f32 1.0, %v1760_v37 }
 0x314   : > { %v725_v33 = vmul.f32 0.5, %v724_v31 }
 0x315   : > { %v730_v40 = vmul.f32 0.5, %v729_v38  ;;  %v1436_v38 = vld [vmem:[%s2019_s23 + $0x30] sm:$0xff] }
 0x316   : > { %v732_v35 = vmul.f32 %v731_v34, %v725_v33 }
 0x318   : > { %v733_v36 = vadd.f32 %v732_v35, %v638_v32 }
 0x31a   : > { %1761 = vtanh.f32 %v733_v36 }
 0x324   : > { %v1762_v39 = vpop.eup %1761 }
 0x325   : > { %v735_v42 = vsub.f32 %v2084_v51, %v1762_v39 }
 0x327   : > { %v736_v43 = vmul.f32 %v735_v42, %v730_v40 }
 0x329   : > { %v2132_v45 = vadd.f32 %v1762_v39, %v736_v43  ;;  %v850_v39 = vunpack.c.l.bf16 %v1436_v38 }
 0x32b   : > { %1432 = vst [vmem:[%s2037_s30 + $0x10] sm:$0xff] %v2132_v45  ;;  %v746_v46 = vpack.c.bf16 %v2132_v45, %v2132_v45 }
 0x32d   : > { %780 = vmatmul.mubr.bf16.vlgmr.msra.gmra.mrb[12].mxu0 %v746_v46  ;;  %1600 = vmatmul.mubr.bf16.vlgmr.msra.gmra.mrb[12].mxu1 %v746_v46 }
 0x32e   : > { %855 = vmatpush1.bf16.msra.mxu0 %v1879_v3  ;;  %1604 = vmatpush3.bf16.msra.mxu1 %v1894_v7 }
 0x32f   : > { %856 = vmatprep.subr.bf16.mxu0 %v1883_v4  ;;  %1605 = vmatprep.subr.bf16.mxu1 %v1821_v0 }
 0x330   : > { %886 = vmatprep.mubr.bf16.mxu0 %v1822_v1  ;;  %1619 = vmatprep.mubr.msk.bf16.mxu1 %vm1823_vm0, %v1821_v0 }
 0x332   : > { %857 = vmatpush1.bf16.msra.mxu0 %v1887_v5  ;;  %1606 = vmatpush3.bf16.msra.mxu1 %v1906_v10 }
 0x333   : > { %858 = vmatprep.subr.bf16.mxu0 %v1891_v6  ;;  %1607 = vmatprep.subr.bf16.mxu1 %v1821_v0 }
 0x336   : > { %859 = vmatpush1.bf16.msra.mxu0 %v1898_v8  ;;  %1608 = vmatpush3.bf16.msra.mxu1 %v1919_v13 }
 0x337   : > { %860 = vmatprep.subr.bf16.mxu0 %v1901_v9  ;;  %1609 = vmatprep.subr.bf16.mxu1 %v1821_v0 }
 0x33a   : > { %861 = vmatpush1.bf16.msra.mxu0 %v1910_v11  ;;  %1610 = vmatpush3.bf16.msra.mxu1 %v1932_v16 }
 0x33b   : > { %862 = vmatprep.subr.bf16.mxu0 %v1914_v12  ;;  %1611 = vmatprep.subr.bf16.mxu1 %v1821_v0 }
 0x33e   : > { %863 = vmatpush1.bf16.msra.mxu0 %v1923_v14  ;;  %1612 = vmatpush3.bf16.msra.mxu1 %v1945_v19 }
 0x33f   : > { %864 = vmatprep.subr.bf16.mxu0 %v1927_v15  ;;  %1613 = vmatprep.subr.bf16.mxu1 %v1821_v0 }
 0x342   : > { %865 = vmatpush1.bf16.msra.mxu0 %v1937_v17  ;;  %1614 = vmatpush3.bf16.msra.mxu1 %v1958_v22 }
 0x343   : > { %866 = vmatprep.subr.bf16.mxu0 %v1941_v18  ;;  %1615 = vmatprep.subr.bf16.mxu1 %v1821_v0 }
 0x346   : > { %867 = vmatpush1.bf16.msra.mxu0 %v1950_v20  ;;  %1616 = vmatpush3.bf16.msra.mxu1 %v1968_v24 }
 0x347   : > { %868 = vmatprep.subr.bf16.mxu0 %v1954_v21  ;;  %1617 = vmatprep.subr.bf16.mxu1 %v1821_v0 }
 0x34a   : > { %869 = vmatpush1.bf16.msra.mxu0 %v1963_v23  ;;  %1618 = vmatpush3.bf16.msra.mxu1 %v1974_v25 }
 0x34b   : > { %961 = vmatprep.subr.bf16.mxu0 %v1876_v2  ;;  %1623 = vmatprep.subr.bf16.mxu1 %v1821_v0 }
 0x400   : > { %v781_v49 = vpop.f32.mrb[12].mxu0  ;;  %v822_v50 = vpop.f32.mrb[12].mxu1 }
 0x401   : > { %v828_v51 = vadd.f32 %v781_v49, %v743_v48  ;;  %v783_v44 = vpop.f32.mrb[13].mxu0  ;;  %v1601_v52 = vpop.f32.mrb[13].mxu1  ;;  %v838_v27 = vadd.f32 %v2026_v41, %v822_v50 }
 0x402   : > { %v785_v53 = vpop.f32.mrb[14].mxu0  ;;  %v825_v54 = vpop.f32.mrb[14].mxu1  ;;  %v833_v59 = vadd.f32 %v783_v44, %v744_v58  ;;  %v851_v44 = vunpack.c.h.bf16 %v1436_v38 }
 0x403   : > { %v829_v55 = vmul.f32 0.5, %v828_v51  ;;  %v786_v56 = vpop.f32.mrb[15].mxu0  ;;  %v1602_v57 = vpop.f32.mrb[15].mxu1 }
 0x404   : > { %v834_v60 = vmul.f32 0.5, %v833_v59 }
 0x405   : > { %1763 = vtanh.f32 %v829_v55  ;;  %v2220_v55 = vld [vmem:[%s2019_s23 + $0x38] ss:$12 sps:$4 sm:$0xff]  }
 0x406   : > { %1765 = vtanh.f32 %v834_v60  ;;  %v852_v57 = vunpack.c.l.bf16 %v2220_v55 }
 0x40f   : > { %v1764_v61 = vpop.eup %1763 }
 0x410   : > { %v831_v62 = vadd.f32 1.0, %v1764_v61  ;;  %v1766_v31 = vpop.eup %1765 }
 0x411   : > { %v836_v32 = vadd.f32 1.0, %v1766_v31 }
 0x412   : > { %v832_v26 = vmul.f32 0.5, %v831_v62 }
 0x413   : > { %v837_v34 = vmul.f32 0.5, %v836_v32 }
 0x414   : > { %v839_v28 = vmul.f32 %v838_v27, %v832_v26 }
 0x416   : > { %v840_v29 = vadd.f32 %v839_v28, %v745_v63 }
 0x418   : > { %1767 = vtanh.f32 %v840_v29 }
 0x422   : > { %v1768_v33 = vpop.eup %1767 }
 0x423   : > { %v842_v35 = vsub.f32 %v2132_v45, %v1768_v33 }
 0x425   : > { %v843_v36 = vmul.f32 %v842_v35, %v837_v34 }
 0x427   : > { %v2177_v37 = vadd.f32 %v1768_v33, %v843_v36 }
 0x429   : > { %1435 = vst [vmem:[%s2037_s30 + $0x18] sm:$0xff] %v2177_v37  ;;  %v853_v30 = vpack.c.bf16 %v2177_v37, %v2177_v37 }
 0x42b   : > { %887 = vmatmul.mubr.bf16.vlgmr.msra.gmra.mrb[16].mxu0 %v853_v30  ;;  %1620 = vmatmul.mubr.bf16.vlgmr.msra.gmra.mrb[16].mxu1 %v853_v30 }
 0x42c   : > { %962 = vmatpush1.bf16.msra.mxu0 %v1879_v3  ;;  %1624 = vmatpush3.bf16.msra.mxu1 %v1894_v7 }
 0x42d   : > { %963 = vmatprep.subr.bf16.mxu0 %v1883_v4  ;;  %1625 = vmatprep.subr.bf16.mxu1 %v1821_v0 }
 0x42e   : > { %993 = vmatprep.mubr.bf16.mxu0 %v1822_v1  ;;  %1639 = vmatprep.mubr.msk.bf16.mxu1 %vm1823_vm0, %v1821_v0 }
 0x430   : > { %964 = vmatpush1.bf16.msra.mxu0 %v1887_v5  ;;  %1626 = vmatpush3.bf16.msra.mxu1 %v1906_v10 }
 0x431   : > { %965 = vmatprep.subr.bf16.mxu0 %v1891_v6  ;;  %1627 = vmatprep.subr.bf16.mxu1 %v1821_v0 }
 0x434   : > { %966 = vmatpush1.bf16.msra.mxu0 %v1898_v8  ;;  %1628 = vmatpush3.bf16.msra.mxu1 %v1919_v13 }
 0x435   : > { %967 = vmatprep.subr.bf16.mxu0 %v1901_v9  ;;  %1629 = vmatprep.subr.bf16.mxu1 %v1821_v0 }
 0x438   : > { %968 = vmatpush1.bf16.msra.mxu0 %v1910_v11  ;;  %1630 = vmatpush3.bf16.msra.mxu1 %v1932_v16 }
 0x439   : > { %969 = vmatprep.subr.bf16.mxu0 %v1914_v12  ;;  %1631 = vmatprep.subr.bf16.mxu1 %v1821_v0 }
 0x43c   : > { %970 = vmatpush1.bf16.msra.mxu0 %v1923_v14  ;;  %1632 = vmatpush3.bf16.msra.mxu1 %v1945_v19 }
 0x43d   : > { %971 = vmatprep.subr.bf16.mxu0 %v1927_v15  ;;  %1633 = vmatprep.subr.bf16.mxu1 %v1821_v0 }
 0x440   : > { %972 = vmatpush1.bf16.msra.mxu0 %v1937_v17  ;;  %1634 = vmatpush3.bf16.msra.mxu1 %v1958_v22 }
 0x441   : > { %973 = vmatprep.subr.bf16.mxu0 %v1941_v18  ;;  %1635 = vmatprep.subr.bf16.mxu1 %v1821_v0 }
 0x444   : > { %974 = vmatpush1.bf16.msra.mxu0 %v1950_v20  ;;  %1636 = vmatpush3.bf16.msra.mxu1 %v1968_v24 }
 0x445   : > { %975 = vmatprep.subr.bf16.mxu0 %v1954_v21  ;;  %1637 = vmatprep.subr.bf16.mxu1 %v1821_v0 }
 0x448   : > { %976 = vmatpush1.bf16.msra.mxu0 %v1963_v23  ;;  %1638 = vmatpush3.bf16.msra.mxu1 %v1974_v25 }
 0x449   : > { %1068 = vmatprep.subr.bf16.mxu0 %v1876_v2  ;;  %1643 = vmatprep.subr.bf16.mxu1 %v1821_v0 }
 0x4fe   : > { %v888_v40 = vpop.f32.mrb[16].mxu0  ;;  %v929_v42 = vpop.f32.mrb[16].mxu1 }
 0x4ff   : > { %v935_v43 = vadd.f32 %v888_v40, %v850_v39  ;;  %v890_v45 = vpop.f32.mrb[17].mxu0  ;;  %v1621_v46 = vpop.f32.mrb[17].mxu1  ;;  %v945_v59 = vadd.f32 %v2026_v41, %v929_v42 }
 0x500   : > { %v892_v47 = vpop.f32.mrb[18].mxu0  ;;  %v932_v48 = vpop.f32.mrb[18].mxu1  ;;  %v940_v52 = vadd.f32 %v890_v45, %v851_v44  ;;  %v959_v46 = vunpack.c.h.bf16 %v2220_v55 }
 0x501   : > { %v936_v49 = vmul.f32 0.5, %v935_v43  ;;  %v893_v50 = vpop.f32.mrb[19].mxu0  ;;  %v1622_v51 = vpop.f32.mrb[19].mxu1 }
 0x502   : > { %v941_v53 = vmul.f32 0.5, %v940_v52 }
 0x503   : > { %1769 = vtanh.f32 %v936_v49 }
 0x504   : > { %1771 = vtanh.f32 %v941_v53 }
 0x50d   : > { %v1770_v54 = vpop.eup %1769 }
 0x50e   : > { %v938_v56 = vadd.f32 1.0, %v1770_v54  ;;  %v1772_v62 = vpop.eup %1771 }
 0x50f   : > { %v943_v63 = vadd.f32 1.0, %v1772_v62 }
 0x510   : > { %v939_v58 = vmul.f32 0.5, %v938_v56 }
 0x511   : > { %v944_v27 = vmul.f32 0.5, %v943_v63 }
 0x512   : > { %v946_v60 = vmul.f32 %v945_v59, %v939_v58  ;;  %v1793_v58 = vld [vmem:[%s1873_s19] ss:$12 sps:$4 sm:$0xff]   ;;  %v1794_v59 = vld [vmem:[%s1873_s19 + $0x1c] ss:$12 sps:$4 sm:$0xff]  }
 0x514   : > { %v947_v61 = vadd.f32 %v946_v60, %v852_v57  ;;  %v1795_v60 = vld [vmem:[%s1873_s19 + $0x18] ss:$12 sps:$4 sm:$0xff]  }
 0x516   : > { %1773 = vtanh.f32 %v947_v61  ;;  %v1796_v61 = vld [vmem:[%s1873_s19 + $0x34] ss:$12 sps:$4 sm:$0xff]  }
 0x520   : > { %v1774_v26 = vpop.eup %1773 }
 0x521   : > { %v949_v28 = vsub.f32 %v2177_v37, %v1774_v26 }
 0x523   : > { %v950_v29 = vmul.f32 %v949_v28, %v944_v27 }
 0x525   : > { %v2225_v31 = vadd.f32 %v1774_v26, %v950_v29 }
 0x527   : > { %1438 = vst [vmem:[%s2037_s30 + $0x20] sm:$0xff] %v2225_v31  ;;  %v960_v32 = vpack.c.bf16 %v2225_v31, %v2225_v31 }
 0x529   : > { %994 = vmatmul.mubr.bf16.vlgmr.msra.gmra.mrb[20].mxu0 %v960_v32  ;;  %1640 = vmatmul.mubr.bf16.vlgmr.msra.gmra.mrb[20].mxu1 %v960_v32 }
 0x52a   : > { %1069 = vmatpush1.bf16.msra.mxu0 %v1879_v3  ;;  %1644 = vmatpush3.bf16.msra.mxu1 %v1894_v7  ;;  %v1439_v3 = vld [vmem:[%s2019_s23 + $0x3c] sm:$0xff] }
 0x52b   : > { %1070 = vmatprep.subr.bf16.mxu0 %v1883_v4  ;;  %1645 = vmatprep.subr.bf16.mxu1 %v1821_v0  ;;  %v957_v4 = vunpack.c.l.bf16 %v1439_v3  ;;  %v958_v40 = vunpack.c.h.bf16 %v1439_v3 }
 0x52c   : > { %1100 = vmatprep.mubr.bf16.mxu0 %v1822_v1  ;;  %1659 = vmatprep.mubr.msk.bf16.mxu1 %vm1823_vm0, %v1821_v0 }
 0x52e   : > { %1071 = vmatpush1.bf16.msra.mxu0 %v1887_v5  ;;  %1646 = vmatpush3.bf16.msra.mxu1 %v1906_v10 }
 0x52f   : > { %1072 = vmatprep.subr.bf16.mxu0 %v1891_v6  ;;  %1647 = vmatprep.subr.bf16.mxu1 %v1821_v0 }
 0x532   : > { %1073 = vmatpush1.bf16.msra.mxu0 %v1898_v8  ;;  %1648 = vmatpush3.bf16.msra.mxu1 %v1919_v13 }
 0x533   : > { %1074 = vmatprep.subr.bf16.mxu0 %v1901_v9  ;;  %1649 = vmatprep.subr.bf16.mxu1 %v1821_v0 }
 0x536   : > { %1075 = vmatpush1.bf16.msra.mxu0 %v1910_v11  ;;  %1650 = vmatpush3.bf16.msra.mxu1 %v1932_v16 }
 0x537   : > { %1076 = vmatprep.subr.bf16.mxu0 %v1914_v12  ;;  %1651 = vmatprep.subr.bf16.mxu1 %v1821_v0 }
 0x53a   : > { %1077 = vmatpush1.bf16.msra.mxu0 %v1923_v14  ;;  %1652 = vmatpush3.bf16.msra.mxu1 %v1945_v19 }
 0x53b   : > { %1078 = vmatprep.subr.bf16.mxu0 %v1927_v15  ;;  %1653 = vmatprep.subr.bf16.mxu1 %v1821_v0 }
 0x53e   : > { %1079 = vmatpush1.bf16.msra.mxu0 %v1937_v17  ;;  %1654 = vmatpush3.bf16.msra.mxu1 %v1958_v22 }
 0x53f   : > { %1080 = vmatprep.subr.bf16.mxu0 %v1941_v18  ;;  %1655 = vmatprep.subr.bf16.mxu1 %v1821_v0 }
 0x542   : > { %1081 = vmatpush1.bf16.msra.mxu0 %v1950_v20  ;;  %1656 = vmatpush3.bf16.msra.mxu1 %v1968_v24 }
 0x543   : > { %1082 = vmatprep.subr.bf16.mxu0 %v1954_v21  ;;  %1657 = vmatprep.subr.bf16.mxu1 %v1821_v0 }
 0x546   : > { %1083 = vmatpush1.bf16.msra.mxu0 %v1963_v23  ;;  %1658 = vmatpush3.bf16.msra.mxu1 %v1974_v25 }
 0x547   : > { %1175 = vmatprep.subr.bf16.mxu0 %v1876_v2  ;;  %1663 = vmatprep.subr.bf16.mxu1 %v1821_v0 }
 0x5fc   : > { %v995_v5 = vpop.f32.mrb[20].mxu0  ;;  %v1036_v6 = vpop.f32.mrb[20].mxu1 }
 0x5fd   : > { %v1042_v33 = vadd.f32 %v995_v5, %v957_v4  ;;  %v997_v34 = vpop.f32.mrb[21].mxu0  ;;  %v1641_v35 = vpop.f32.mrb[21].mxu1  ;;  %v1052_v48 = vadd.f32 %v2026_v41, %v1036_v6  ;;  %v1445_v5 = vld [vmem:[%s2019_s23 + $0x54] sm:$0xff] }
 0x5fe   : > { %v999_v36 = vpop.f32.mrb[22].mxu0  ;;  %v1039_v37 = vpop.f32.mrb[22].mxu1  ;;  %v1047_v42 = vadd.f32 %v997_v34, %v958_v40  ;;  %v1171_v6 = vunpack.c.l.bf16 %v1445_v5 }
 0x5ff   : > { %v1043_v30 = vmul.f32 0.5, %v1042_v33  ;;  %v1000_v38 = vpop.f32.mrb[23].mxu0  ;;  %v1642_v39 = vpop.f32.mrb[23].mxu1 }
 0x600   : > { %v1048_v43 = vmul.f32 0.5, %v1047_v42 }
 0x601   : > { %1775 = vtanh.f32 %v1043_v30 }
 0x602   : > { %1777 = vtanh.f32 %v1048_v43  ;;  %v1172_v43 = vunpack.c.h.bf16 %v1445_v5 }
 0x60b   : > { %v1776_v45 = vpop.eup %1775 }
 0x60c   : > { %v1045_v2 = vadd.f32 1.0, %v1776_v45  ;;  %v1778_v51 = vpop.eup %1777 }
 0x60d   : > { %v1050_v44 = vadd.f32 1.0, %v1778_v51 }
 0x60e   : > { %v1046_v47 = vmul.f32 0.5, %v1045_v2 }
 0x60f   : > { %v1051_v53 = vmul.f32 0.5, %v1050_v44 }
 0x610   : > { %v1053_v49 = vmul.f32 %v1052_v48, %v1046_v47 }
 0x612   : > { %v1054_v50 = vadd.f32 %v1053_v49, %v959_v46 }
 0x614   : > { %1779 = vtanh.f32 %v1054_v50 }
 0x61e   : > { %v1780_v52 = vpop.eup %1779 }
 0x61f   : > { %v1056_v54 = vsub.f32 %v2225_v31, %v1780_v52 }
 0x621   : > { %v1057_v56 = vmul.f32 %v1056_v54, %v1051_v53 }
 0x623   : > { %v2270_v57 = vadd.f32 %v1780_v52, %v1057_v56 }
 0x625   : > { %1441 = vst [vmem:[%s2037_s30 + $0x28] sm:$0xff] %v2270_v57  ;;  %v1067_v55 = vpack.c.bf16 %v2270_v57, %v2270_v57 }
 0x627   : > { %1101 = vmatmul.mubr.bf16.vlgmr.msra.gmra.mrb[24].mxu0 %v1067_v55  ;;  %1660 = vmatmul.mubr.bf16.vlgmr.msra.gmra.mrb[24].mxu1 %v1067_v55 }
 0x628   : > { %1176 = vmatpush1.bf16.msra.mxu0 %v1793_v58  ;;  %1664 = vmatpush3.bf16.msra.mxu1 %v1894_v7 }
 0x629   : > { %1177 = vmatprep.subr.bf16.mxu0 %v1794_v59  ;;  %1665 = vmatprep.subr.bf16.mxu1 %v1821_v0 }
 0x62a   : > { %1207 = vmatprep.mubr.bf16.mxu0 %v1822_v1  ;;  %1679 = vmatprep.mubr.msk.bf16.mxu1 %vm1823_vm0, %v1821_v0  ;;  %v1442_v1 = vld [vmem:[%s2019_s23 + $0x48] sm:$0xff] }
 0x62b   : > { %v1064_v7 = vunpack.c.l.bf16 %v1442_v1 }
 0x62c   : > { %1178 = vmatpush1.bf16.msra.mxu0 %v1795_v60  ;;  %1666 = vmatpush3.bf16.msra.mxu1 %v1906_v10 }
 0x62d   : > { %1179 = vmatprep.subr.bf16.mxu0 %v1796_v61  ;;  %1667 = vmatprep.subr.bf16.mxu1 %v1821_v0 }
 0x630   : > { %1180 = vmatpush1.bf16.msra.mxu0 %v1898_v8  ;;  %1668 = vmatpush3.bf16.msra.mxu1 %v1919_v13 }
 0x631   : > { %1181 = vmatprep.subr.bf16.mxu0 %v1901_v9  ;;  %1669 = vmatprep.subr.bf16.mxu1 %v1821_v0 }
 0x634   : > { %1182 = vmatpush1.bf16.msra.mxu0 %v1910_v11  ;;  %1670 = vmatpush3.bf16.msra.mxu1 %v1932_v16 }
 0x635   : > { %1183 = vmatprep.subr.bf16.mxu0 %v1914_v12  ;;  %1671 = vmatprep.subr.bf16.mxu1 %v1821_v0 }
 0x638   : > { %1184 = vmatpush1.bf16.msra.mxu0 %v1923_v14  ;;  %1672 = vmatpush3.bf16.msra.mxu1 %v1945_v19 }
 0x639   : > { %1185 = vmatprep.subr.bf16.mxu0 %v1927_v15  ;;  %1673 = vmatprep.subr.bf16.mxu1 %v1821_v0 }
 0x63c   : > { %1186 = vmatpush1.bf16.msra.mxu0 %v1937_v17  ;;  %1674 = vmatpush3.bf16.msra.mxu1 %v1958_v22 }
 0x63d   : > { %1187 = vmatprep.subr.bf16.mxu0 %v1941_v18  ;;  %1675 = vmatprep.subr.bf16.mxu1 %v1821_v0  ;;  %v1065_v18 = vunpack.c.h.bf16 %v1442_v1 }
 0x640   : > { %1188 = vmatpush1.bf16.msra.mxu0 %v1950_v20  ;;  %1676 = vmatpush3.bf16.msra.mxu1 %v1968_v24 }
 0x641   : > { %1189 = vmatprep.subr.bf16.mxu0 %v1954_v21  ;;  %1677 = vmatprep.subr.bf16.mxu1 %v1821_v0  ;;  %v1443_v21 = vld [vmem:[%s2019_s23 + $0x50] ss:$12 sps:$4 sm:$0xff]  }
 0x642   : > { %v1173_v48 = vunpack.c.h.bf16 %v1443_v21 }
 0x644   : > { %1190 = vmatpush1.bf16.msra.mxu0 %v1963_v23  ;;  %1678 = vmatpush3.bf16.msra.mxu1 %v1974_v25  ;;  %v1066_v23 = vunpack.c.l.bf16 %v1443_v21 }
 0x6fa   : > { %v1102_v8 = vpop.f32.mrb[24].mxu0  ;;  %v1143_v9 = vpop.f32.mrb[24].mxu1 }
 0x6fb   : > { %v1149_v10 = vadd.f32 %v1102_v8, %v1064_v7  ;;  %v1104_v11 = vpop.f32.mrb[25].mxu0  ;;  %v1661_v12 = vpop.f32.mrb[25].mxu1  ;;  %v1159_v25 = vadd.f32 %v2026_v41, %v1143_v9 }
 0x6fc   : > { %v1106_v13 = vpop.f32.mrb[26].mxu0  ;;  %v1146_v14 = vpop.f32.mrb[26].mxu1  ;;  %v1154_v0 = vadd.f32 %v1104_v11, %v1065_v18 }
 0x6fd   : > { %v1150_v15 = vmul.f32 0.5, %v1149_v10  ;;  %v1107_v16 = vpop.f32.mrb[27].mxu0  ;;  %v1662_v17 = vpop.f32.mrb[27].mxu1 }
 0x6fe   : > { %v1155_v19 = vmul.f32 0.5, %v1154_v0 }
 0x6ff   : > { %1781 = vtanh.f32 %v1150_v15 }
 0x700   : > { %1783 = vtanh.f32 %v1155_v19 }
 0x709   : > { %v1782_v20 = vpop.eup %1781 }
 0x70a   : > { %v1152_v22 = vadd.f32 1.0, %v1782_v20  ;;  %v1784_v26 = vpop.eup %1783 }
 0x70b   : > { %v1157_v27 = vadd.f32 1.0, %v1784_v26 }
 0x70c   : > { %v1153_v24 = vmul.f32 0.5, %v1152_v22 }
 0x70d   : > { %v1158_v29 = vmul.f32 0.5, %v1157_v27 }
 0x70e   : > { %v1160_v62 = vmul.f32 %v1159_v25, %v1153_v24 }
 0x710   : > { %v1161_v63 = vadd.f32 %v1160_v62, %v1066_v23 }
 0x712   : > { %1785 = vtanh.f32 %v1161_v63 }
 0x71c   : > { %v1786_v28 = vpop.eup %1785 }
 0x71d   : > { %v1163_v31 = vsub.f32 %v2270_v57, %v1786_v28 }
 0x71f   : > { %v1164_v32 = vmul.f32 %v1163_v31, %v1158_v29 }
 0x721   : > { %v1165_v3 = vadd.f32 %v1786_v28, %v1164_v32 }
 0x723   : > { %1444 = vst [vmem:[%s2037_s30 + $0x30] sm:$0xff] %v1165_v3  ;;  %v1174_v4 = vpack.c.bf16 %v1165_v3, %v1165_v3 }
 0x725   : > { %1208 = vmatmul.mubr.bf16.vlgmr.msra.gmra.mrb[28].mxu0 %v1174_v4  ;;  %1680 = vmatmul.mubr.bf16.vlgmr.msra.gmra.mrb[28].mxu1 %v1174_v4 }
 0x7f8   : > { %v1209_v33 = vpop.f32.mrb[28].mxu0  ;;  %v1250_v34 = vpop.f32.mrb[28].mxu1 }
 0x7f9   : > { %v1256_v35 = vadd.f32 %v1209_v33, %v1171_v6  ;;  %v1211_v36 = vpop.f32.mrb[29].mxu0  ;;  %v1681_v37 = vpop.f32.mrb[29].mxu1  ;;  %v1266_v50 = vadd.f32 %v2026_v41, %v1250_v34 }
 0x7fa   : > { %v1213_v30 = vpop.f32.mrb[30].mxu0  ;;  %v1253_v38 = vpop.f32.mrb[30].mxu1  ;;  %v1261_v45 = vadd.f32 %v1211_v36, %v1172_v43 }
 0x7fb   : > { %v1257_v39 = vmul.f32 0.5, %v1256_v35  ;;  %v1214_v40 = vpop.f32.mrb[31].mxu0  ;;  %v1682_v42 = vpop.f32.mrb[31].mxu1 }
 0x7fc   : > { %v1262_v2 = vmul.f32 0.5, %v1261_v45 }
 0x7fd   : > { %1787 = vtanh.f32 %v1257_v39 }
 0x7fe   : > { %1789 = vtanh.f32 %v1262_v2 }
 0x807   : > { %v1788_v46 = vpop.eup %1787 }
 0x808   : > { %v1259_v47 = vadd.f32 1.0, %v1788_v46  ;;  %v1790_v52 = vpop.eup %1789 }
 0x809   : > { %v1264_v53 = vadd.f32 1.0, %v1790_v52 }
 0x80a   : > { %v1260_v49 = vmul.f32 0.5, %v1259_v47 }
 0x80b   : > { %v1265_v56 = vmul.f32 0.5, %v1264_v53 }
 0x80c   : > { %v1267_v51 = vmul.f32 %v1266_v50, %v1260_v49 }
 0x80e   : > { %v1268_v44 = vadd.f32 %v1267_v51, %v1173_v48 }
 0x810   : > { %1791 = vtanh.f32 %v1268_v44 }
 0x81a   : > { %v1792_v54 = vpop.eup %1791 }
 0x81b   : > { %v1270_v57 = vsub.f32 %v1165_v3, %v1792_v54 }
 0x81d   : > { %v1271_v55 = vmul.f32 %v1270_v57, %v1265_v56 }
 0x81f   : > { %v1272_v58 = vadd.f32 %v1792_v54, %v1271_v55 }
 0x821   : > { %1447 = vst [vmem:[%s2037_s30 + $0x38] sm:$0xff] %v1272_v58 }
 0x822 PF: > { %s13_s14 = sadd.s32 1, %s1819_s14   ;;  %s2330_s12 = smov %s1815_s13 }
 0x823   : > { %p10_p5 = scmp.ge.s32.totalorder %s13_s14, 4   ;;  %s2331_s13 = smov %s2333_s15 }
 0x825   :  { %12 = sbr.rel (!%p10_p5) target bundleno = 2 (0x2), region = 86 }

// kernel: _gru2_forward_impl.1
= control target key start
LH: loop header
LB: loop body
LE: loop exit
PB: predicated region body
PF: predicated region fallthrough
CT: control target
= control target key end

     0   :  { %s1839_s12 = smov 0   ;;  %s1841_s13 = smov 0   ;;  %s2320_s0 = inlined_call_operand.vmem [shape: bf16[2,8,8,384], index: 0, kind: input, shape index: {}]   ;;  %s2321_s1 = inlined_call_operand.vmem [shape: bf16[2,128,384], index: 1, kind: input, shape index: {}]   ;;  %s2322_s2 = inlined_call_operand.vmem [shape: f32[2,1,128], index: 2, kind: input, shape index: {}]   ;;  %s2323_s3 = inlined_call_operand.vmem [shape: f32[2,8,8,128], index: 3, kind: output, shape index: {}]  }
   0x1   :  { %s1843_s14 = smov 0  }
   0x2 LB: > { %s25_s15 = sadd.s32 1, %s1809_s13  ;;  %p1391_p0 = scmp.ge.s32.totalorder %s1813_s14, 1  ;;  %s1813_s14 = sphi %s1843_s14, %s13_s14   ;;  %s1809_s13 = sphi %s1841_s13, %s2325_s13   ;;  %s1805_s12 = sphi %s1839_s12, %s2324_s12  }
   0x3   : > { %p27_p1 = scmp.ge.s32.totalorder %s25_s15, 2  ;;  %p177_p2 = scmp.lt.s32.totalorder %s1813_s14, 3 }
   0x5   : > { %s2327_s15 = smov (%p27_p1, %s25_s15), 0  ;;  %p178_p3 = pnand %p1391_p0, %p177_p2 }
   0x6   : > { %p219_p4 = scmp.lt.s32.totalorder (!%p178_p3), %s1805_s12, 1  ;;  %v1815_v0 = vmov (!%p178_p3), 0.0   ;;  %v1816_v1 = vmov (!%p178_p3), 0   ;;  %vm1817_vm0 = vmmov (!%p178_p3), 0   ;;  %v1818_v26 = vmov (!%p178_p3), 0.0|0.0  }
   0x7   : > { %181 = sbr.rel (%p178_p3) target bundleno = 2082 (0x822), region = 32  ;;  %1517 = vmatprep.subr.bf16.mxu1 (!%p178_p3), %v1815_v0  ;;  %459 = vmatprep.mubr.bf16.mxu0 (!%p178_p3), %v1816_v1 }
   0x8   : > { %1533 = vmatprep.mubr.msk.bf16.mxu1 (!%p178_p3), %vm1817_vm0, %v1815_v0 }
   0xe   : > { %s2329_s12 = smov (!%p219_p4, %s1805_s12), 1 }
   0xf   : > { %s1678_s16 = smul.u32 192, %s2329_s12  ;;  %s236_s26 = scalar_lea.vmem %s2322_s2, %s2329_s12 }
  0x10   : > { %s1677_s20 = smul.u32 96, %s2329_s12  ;;  %v2020_v41 = vld [vmem:[%s236_s26] ss:$0 sm:$0xff]  ;;  %s1444_s27 = sshll.u32 %s2329_s12, 6 }
  0x11   : > { %s1867_s19 = scalar_lea.vmem %s2321_s1, %s1678_s16  ;;  %s2031_s30 = scalar_lea.vmem %s2323_s3, %s1444_s27 }
  0x12   : > { %v1870_v2 = vld [vmem:[%s1867_s19 + $0x4] ss:$12 sps:$4 sm:$0xff]   ;;  %v1873_v3 = vld [vmem:[%s1867_s19] ss:$12 sps:$4 sm:$0xff]   ;;  %v1877_v4 = vld [vmem:[%s1867_s19 + $0x1c] ss:$12 sps:$4 sm:$0xff]   ;;  %s2013_s23 = scalar_lea.vmem %s2320_s0, %s1677_s20 }
  0x13   : > { %427 = vmatprep.subr.bf16.mxu0 %v1870_v2  ;;  %v1881_v5 = vld [vmem:[%s1867_s19 + $0x18] ss:$12 sps:$4 sm:$0xff]   ;;  %v1885_v6 = vld [vmem:[%s1867_s19 + $0x34] ss:$12 sps:$4 sm:$0xff]   ;;  %v1892_v8 = vld [vmem:[%s1867_s19 + $0x30] ss:$12 sps:$4 sm:$0xff]  }
  0x14   : > { %428 = vmatpush1.bf16.msra.mxu0 %v1873_v3  ;;  %v1888_v7 = vld [vmem:[%s1867_s19 + $0x8] ss:$12 sps:$4 sm:$0xff]   ;;  %v1895_v9 = vld [vmem:[%s1867_s19 + $0x4c] ss:$12 sps:$4 sm:$0xff]   ;;  %v1908_v12 = vld [vmem:[%s1867_s19 + $0x64] ss:$12 sps:$4 sm:$0xff]  }
  0x15   : > { %429 = vmatprep.subr.bf16.mxu0 %v1877_v4  ;;  %1518 = vmatpush3.bf16.msra.mxu1 %v1888_v7  ;;  %v1900_v10 = vld [vmem:[%s1867_s19 + $0x20] ss:$12 sps:$4 sm:$0xff]   ;;  %v1904_v11 = vld [vmem:[%s1867_s19 + $0x48] ss:$12 sps:$4 sm:$0xff]   ;;  %v1913_v13 = vld [vmem:[%s1867_s19 + $0x38] ss:$12 sps:$4 sm:$0xff]  }
  0x16   : > { %1519 = vmatprep.subr.bf16.mxu1 %v1815_v0  ;;  %v1917_v14 = vld [vmem:[%s1867_s19 + $0x60] ss:$12 sps:$4 sm:$0xff]   ;;  %v1921_v15 = vld [vmem:[%s1867_s19 + $0x7c] ss:$12 sps:$4 sm:$0xff]   ;;  %v1931_v17 = vld [vmem:[%s1867_s19 + $0x78] ss:$12 sps:$4 sm:$0xff]  }
  0x17   : > { %v1926_v16 = vld [vmem:[%s1867_s19 + $0x50] ss:$12 sps:$4 sm:$0xff]   ;;  %v1935_v18 = vld [vmem:[%s1867_s19 + $0x94] ss:$12 sps:$4 sm:$0xff]   ;;  %v1948_v21 = vld [vmem:[%s1867_s19 + $0xac] ss:$12 sps:$4 sm:$0xff]  }
  0x18   : > { %430 = vmatpush1.bf16.msra.mxu0 %v1881_v5  ;;  %v1939_v19 = vld [vmem:[%s1867_s19 + $0x68] ss:$12 sps:$4 sm:$0xff]   ;;  %v1944_v20 = vld [vmem:[%s1867_s19 + $0x90] ss:$12 sps:$4 sm:$0xff]   ;;  %v1952_v22 = vld [vmem:[%s1867_s19 + $0x80] ss:$12 sps:$4 sm:$0xff]  }
  0x19   : > { %431 = vmatprep.subr.bf16.mxu0 %v1885_v6  ;;  %1520 = vmatpush3.bf16.msra.mxu1 %v1900_v10  ;;  %v1957_v23 = vld [vmem:[%s1867_s19 + $0xa8] ss:$12 sps:$4 sm:$0xff]   ;;  %v1962_v24 = vld [vmem:[%s1867_s19 + $0x98] ss:$12 sps:$4 sm:$0xff]   ;;  %v1968_v25 = vld [vmem:[%s1867_s19 + $0xb0] ss:$12 sps:$4 sm:$0xff]  }
  0x1a   : > { %1521 = vmatprep.subr.bf16.mxu1 %v1815_v0  ;;  %v293_v27 = vld [vmem:[%s2013_s23] sm:$0xff]  ;;  %v2023_v44 = vld [vmem:[%s2013_s23 + $0x8] ss:$12 sps:$4 sm:$0xff]   ;;  %v1421_v59 = vld [vmem:[%s2013_s23 + $0xc] sm:$0xff] }
  0x1b   : > { %v295_v28 = vunpack.c.l.bf16 %v293_v27  ;;  %v296_v36 = vunpack.c.h.bf16 %v293_v27  ;;  %v297_v47 = vunpack.c.l.bf16 %v2023_v44  ;;  %v529_v60 = vunpack.c.l.bf16 %v1421_v59 }
  0x1c   : > { %432 = vmatpush1.bf16.msra.mxu0 %v1892_v8 }
  0x1d   : > { %433 = vmatprep.subr.bf16.mxu0 %v1895_v9  ;;  %1522 = vmatpush3.bf16.msra.mxu1 %v1913_v13 }
  0x1e   : > { %1523 = vmatprep.subr.bf16.mxu1 %v1815_v0 }
  0x20   : > { %434 = vmatpush1.bf16.msra.mxu0 %v1904_v11 }
  0x21   : > { %435 = vmatprep.subr.bf16.mxu0 %v1908_v12  ;;  %1524 = vmatpush3.bf16.msra.mxu1 %v1926_v16 }
  0x22   : > { %1525 = vmatprep.subr.bf16.mxu1 %v1815_v0 }
  0x24   : > { %436 = vmatpush1.bf16.msra.mxu0 %v1917_v14 }
  0x25   : > { %437 = vmatprep.subr.bf16.mxu0 %v1921_v15  ;;  %1526 = vmatpush3.bf16.msra.mxu1 %v1939_v19 }
  0x26   : > { %1527 = vmatprep.subr.bf16.mxu1 %v1815_v0 }
  0x28   : > { %438 = vmatpush1.bf16.msra.mxu0 %v1931_v17 }
  0x29   : > { %439 = vmatprep.subr.bf16.mxu0 %v1935_v18  ;;  %1528 = vmatpush3.bf16.msra.mxu1 %v1952_v22 }
  0x2a   : > { %1529 = vmatprep.subr.bf16.mxu1 %v1815_v0 }
  0x2c   : > { %440 = vmatpush1.bf16.msra.mxu0 %v1944_v20 }
  0x2d   : > { %441 = vmatprep.subr.bf16.mxu0 %v1948_v21  ;;  %1530 = vmatpush3.bf16.msra.mxu1 %v1962_v24 }
  0x2e   : > { %1531 = vmatprep.subr.bf16.mxu1 %v1815_v0 }
  0x30   : > { %442 = vmatpush1.bf16.msra.mxu0 %v1957_v23 }
  0x31   : > { %533 = vmatprep.subr.bf16.mxu0 %v1870_v2  ;;  %1532 = vmatpush3.bf16.msra.mxu1 %v1968_v25 }
  0x32   : > { %1537 = vmatprep.subr.bf16.mxu1 %v1815_v0 }
  0x33   : > { %460 = vmatmul.mubr.bf16.vlgmr.msra.gmra.mrb[0].mxu0 %v1818_v26 }
  0x34   : > { %534 = vmatpush1.bf16.msra.mxu0 %v1873_v3  ;;  %565 = vmatprep.mubr.bf16.mxu0 %v1816_v1 }
  0x35   : > { %535 = vmatprep.subr.bf16.mxu0 %v1877_v4  ;;  %1534 = vmatmul.mubr.bf16.vlgmr.msra.gmra.mrb[0].mxu1 %v1818_v26 }
  0x36   : > { %1538 = vmatpush3.bf16.msra.mxu1 %v1888_v7  ;;  %1553 = vmatprep.mubr.msk.bf16.mxu1 %vm1817_vm0, %v1815_v0 }
  0x37   : > { %1539 = vmatprep.subr.bf16.mxu1 %v1815_v0 }
  0x38   : > { %536 = vmatpush1.bf16.msra.mxu0 %v1881_v5 }
  0x39   : > { %537 = vmatprep.subr.bf16.mxu0 %v1885_v6 }
  0x3a   : > { %1540 = vmatpush3.bf16.msra.mxu1 %v1900_v10 }
  0x3b   : > { %1541 = vmatprep.subr.bf16.mxu1 %v1815_v0 }
  0x3c   : > { %538 = vmatpush1.bf16.msra.mxu0 %v1892_v8 }
  0x3d   : > { %539 = vmatprep.subr.bf16.mxu0 %v1895_v9 }
  0x3e   : > { %1542 = vmatpush3.bf16.msra.mxu1 %v1913_v13 }
  0x3f   : > { %1543 = vmatprep.subr.bf16.mxu1 %v1815_v0 }
  0x40   : > { %540 = vmatpush1.bf16.msra.mxu0 %v1904_v11 }
  0x41   : > { %541 = vmatprep.subr.bf16.mxu0 %v1908_v12 }
  0x42   : > { %1544 = vmatpush3.bf16.msra.mxu1 %v1926_v16 }
  0x43   : > { %1545 = vmatprep.subr.bf16.mxu1 %v1815_v0 }
  0x44   : > { %542 = vmatpush1.bf16.msra.mxu0 %v1917_v14 }
  0x45   : > { %543 = vmatprep.subr.bf16.mxu0 %v1921_v15 }
  0x46   : > { %1546 = vmatpush3.bf16.msra.mxu1 %v1939_v19 }
  0x47   : > { %1547 = vmatprep.subr.bf16.mxu1 %v1815_v0 }
  0x48   : > { %544 = vmatpush1.bf16.msra.mxu0 %v1931_v17 }
  0x49   : > { %545 = vmatprep.subr.bf16.mxu0 %v1935_v18 }
  0x4a   : > { %1548 = vmatpush3.bf16.msra.mxu1 %v1952_v22 }
  0x4b   : > { %1549 = vmatprep.subr.bf16.mxu1 %v1815_v0 }
  0x4c   : > { %546 = vmatpush1.bf16.msra.mxu0 %v1944_v20 }
  0x4d   : > { %547 = vmatprep.subr.bf16.mxu0 %v1948_v21 }
  0x4e   : > { %1550 = vmatpush3.bf16.msra.mxu1 %v1962_v24 }
  0x4f   : > { %1551 = vmatprep.subr.bf16.mxu1 %v1815_v0 }
  0x50   : > { %548 = vmatpush1.bf16.msra.mxu0 %v1957_v23 }
  0x51   : > { %640 = vmatprep.subr.bf16.mxu0 %v1870_v2 }
  0x52   : > { %1552 = vmatpush3.bf16.msra.mxu1 %v1968_v25 }
  0x53   : > { %1557 = vmatprep.subr.bf16.mxu1 %v1815_v0 }
 0x106   : > { %v461_v29 = vpop.f32.mrb[0].mxu0 }
 0x107   : > { %v508_v30 = vadd.f32 %v461_v29, %v295_v28  ;;  %v463_v31 = vpop.f32.mrb[1].mxu0 }
 0x108   : > { %v465_v32 = vpop.f32.mrb[2].mxu0  ;;  %v502_v35 = vpop.f32.mrb[0].mxu1  ;;  %v513_v40 = vadd.f32 %v463_v31, %v296_v36 }
 0x109   : > { %v509_v33 = vmul.f32 0.5, %v508_v30  ;;  %v466_v34 = vpop.f32.mrb[3].mxu0  ;;  %v1535_v37 = vpop.f32.mrb[1].mxu1  ;;  %v518_v46 = vadd.f32 %v2020_v41, %v502_v35 }
 0x10a   : > { %v505_v38 = vpop.f32.mrb[2].mxu1  ;;  %v514_v42 = vmul.f32 0.5, %v513_v40 }
 0x10b   : > { %1739 = vtanh.f32 %v509_v33  ;;  %v1536_v39 = vpop.f32.mrb[3].mxu1  ;;  %v530_v33 = vunpack.c.h.bf16 %v1421_v59  ;;  %v531_v38 = vunpack.c.h.bf16 %v2023_v44 }
 0x10c   : > { %1741 = vtanh.f32 %v514_v42 }
 0x115   : > { %v1740_v43 = vpop.eup %1739 }
 0x116   : > { %v511_v45 = vadd.f32 1.0, %v1740_v43  ;;  %v1742_v51 = vpop.eup %1741 }
 0x117   : > { %v516_v52 = vadd.f32 1.0, %v1742_v51 }
 0x118   : > { %v512_v48 = vmul.f32 0.5, %v511_v45 }
 0x119   : > { %v517_v54 = vmul.f32 0.5, %v516_v52  ;;  %v1424_v52 = vld [vmem:[%s2013_s23 + $0x18] sm:$0xff] }
 0x11a   : > { %v519_v49 = vmul.f32 %v518_v46, %v512_v48 }
 0x11c   : > { %v520_v50 = vadd.f32 %v519_v49, %v297_v47 }
 0x11e   : > { %1743 = vtanh.f32 %v520_v50 }
 0x128   : > { %v1744_v53 = vpop.eup %1743 }
 0x129   : > { %v522_v55 = vsub.f32 0.0, %v1744_v53 }
 0x12b   : > { %v523_v56 = vmul.f32 %v522_v55, %v517_v54 }
 0x12d   : > { %v2033_v57 = vadd.f32 %v1744_v53, %v523_v56  ;;  %v636_v53 = vunpack.c.l.bf16 %v1424_v52 }
 0x12f   : > { %525 = vst [vmem:[%s2031_s30] sm:$0xff] %v2033_v57  ;;  %v532_v58 = vpack.c.bf16 %v2033_v57, %v2033_v57 }
 0x131   : > { %566 = vmatmul.mubr.bf16.vlgmr.msra.gmra.mrb[4].mxu0 %v532_v58  ;;  %1554 = vmatmul.mubr.bf16.vlgmr.msra.gmra.mrb[4].mxu1 %v532_v58 }
 0x132   : > { %641 = vmatpush1.bf16.msra.mxu0 %v1873_v3  ;;  %1558 = vmatpush3.bf16.msra.mxu1 %v1888_v7 }
 0x133   : > { %642 = vmatprep.subr.bf16.mxu0 %v1877_v4  ;;  %1559 = vmatprep.subr.bf16.mxu1 %v1815_v0 }
 0x134   : > { %672 = vmatprep.mubr.bf16.mxu0 %v1816_v1  ;;  %1573 = vmatprep.mubr.msk.bf16.mxu1 %vm1817_vm0, %v1815_v0 }
 0x136   : > { %643 = vmatpush1.bf16.msra.mxu0 %v1881_v5  ;;  %1560 = vmatpush3.bf16.msra.mxu1 %v1900_v10 }
 0x137   : > { %644 = vmatprep.subr.bf16.mxu0 %v1885_v6  ;;  %1561 = vmatprep.subr.bf16.mxu1 %v1815_v0 }
 0x13a   : > { %645 = vmatpush1.bf16.msra.mxu0 %v1892_v8  ;;  %1562 = vmatpush3.bf16.msra.mxu1 %v1913_v13 }
 0x13b   : > { %646 = vmatprep.subr.bf16.mxu0 %v1895_v9  ;;  %1563 = vmatprep.subr.bf16.mxu1 %v1815_v0 }
 0x13e   : > { %647 = vmatpush1.bf16.msra.mxu0 %v1904_v11  ;;  %1564 = vmatpush3.bf16.msra.mxu1 %v1926_v16 }
 0x13f   : > { %648 = vmatprep.subr.bf16.mxu0 %v1908_v12  ;;  %1565 = vmatprep.subr.bf16.mxu1 %v1815_v0 }
 0x142   : > { %649 = vmatpush1.bf16.msra.mxu0 %v1917_v14  ;;  %1566 = vmatpush3.bf16.msra.mxu1 %v1939_v19 }
 0x143   : > { %650 = vmatprep.subr.bf16.mxu0 %v1921_v15  ;;  %1567 = vmatprep.subr.bf16.mxu1 %v1815_v0 }
 0x146   : > { %651 = vmatpush1.bf16.msra.mxu0 %v1931_v17  ;;  %1568 = vmatpush3.bf16.msra.mxu1 %v1952_v22 }
 0x147   : > { %652 = vmatprep.subr.bf16.mxu0 %v1935_v18  ;;  %1569 = vmatprep.subr.bf16.mxu1 %v1815_v0 }
 0x14a   : > { %653 = vmatpush1.bf16.msra.mxu0 %v1944_v20  ;;  %1570 = vmatpush3.bf16.msra.mxu1 %v1962_v24 }
 0x14b   : > { %654 = vmatprep.subr.bf16.mxu0 %v1948_v21  ;;  %1571 = vmatprep.subr.bf16.mxu1 %v1815_v0 }
 0x14e   : > { %655 = vmatpush1.bf16.msra.mxu0 %v1957_v23  ;;  %1572 = vmatpush3.bf16.msra.mxu1 %v1968_v25 }
 0x14f   : > { %747 = vmatprep.subr.bf16.mxu0 %v1870_v2  ;;  %1577 = vmatprep.subr.bf16.mxu1 %v1815_v0 }
 0x204   : > { %v567_v61 = vpop.f32.mrb[4].mxu0  ;;  %v608_v62 = vpop.f32.mrb[4].mxu1 }
 0x205   : > { %v614_v63 = vadd.f32 %v567_v61, %v529_v60  ;;  %v569_v26 = vpop.f32.mrb[5].mxu0  ;;  %v1555_v27 = vpop.f32.mrb[5].mxu1  ;;  %v624_v40 = vadd.f32 %v2020_v41, %v608_v62 }
 0x206   : > { %v571_v28 = vpop.f32.mrb[6].mxu0  ;;  %v611_v29 = vpop.f32.mrb[6].mxu1  ;;  %v619_v34 = vadd.f32 %v569_v26, %v530_v33  ;;  %v637_v26 = vunpack.c.h.bf16 %v1424_v52 }
 0x207   : > { %v615_v30 = vmul.f32 0.5, %v614_v63  ;;  %v572_v31 = vpop.f32.mrb[7].mxu0  ;;  %v1556_v32 = vpop.f32.mrb[7].mxu1 }
 0x208   : > { %v620_v35 = vmul.f32 0.5, %v619_v34 }
 0x209   : > { %1745 = vtanh.f32 %v615_v30  ;;  %v2121_v30 = vld [vmem:[%s2013_s23 + $0x20] ss:$12 sps:$4 sm:$0xff]  }
 0x20a   : > { %1747 = vtanh.f32 %v620_v35  ;;  %v638_v32 = vunpack.c.l.bf16 %v2121_v30 }
 0x213   : > { %v1746_v36 = vpop.eup %1745 }
 0x214   : > { %v617_v37 = vadd.f32 1.0, %v1746_v36  ;;  %v1748_v45 = vpop.eup %1747 }
 0x215   : > { %v622_v46 = vadd.f32 1.0, %v1748_v45 }
 0x216   : > { %v618_v39 = vmul.f32 0.5, %v617_v37 }
 0x217   : > { %v623_v48 = vmul.f32 0.5, %v622_v46 }
 0x218   : > { %v625_v42 = vmul.f32 %v624_v40, %v618_v39 }
 0x21a   : > { %v626_v43 = vadd.f32 %v625_v42, %v531_v38 }
 0x21c   : > { %1749 = vtanh.f32 %v626_v43 }
 0x226   : > { %v1750_v47 = vpop.eup %1749 }
 0x227   : > { %v628_v49 = vsub.f32 %v2033_v57, %v1750_v47 }
 0x229   : > { %v629_v50 = vmul.f32 %v628_v49, %v623_v48 }
 0x22b   : > { %v2078_v51 = vadd.f32 %v1750_v47, %v629_v50  ;;  %v1427_v47 = vld [vmem:[%s2013_s23 + $0x24] sm:$0xff] }
 0x22c   : > { %v743_v48 = vunpack.c.l.bf16 %v1427_v47 }
 0x22d   : > { %1423 = vst [vmem:[%s2031_s30 + $0x8] sm:$0xff] %v2078_v51  ;;  %v639_v44 = vpack.c.bf16 %v2078_v51, %v2078_v51 }
 0x22f   : > { %673 = vmatmul.mubr.bf16.vlgmr.msra.gmra.mrb[8].mxu0 %v639_v44  ;;  %1574 = vmatmul.mubr.bf16.vlgmr.msra.gmra.mrb[8].mxu1 %v639_v44 }
 0x230   : > { %748 = vmatpush1.bf16.msra.mxu0 %v1873_v3  ;;  %1578 = vmatpush3.bf16.msra.mxu1 %v1888_v7 }
 0x231   : > { %749 = vmatprep.subr.bf16.mxu0 %v1877_v4  ;;  %1579 = vmatprep.subr.bf16.mxu1 %v1815_v0 }
 0x232   : > { %779 = vmatprep.mubr.bf16.mxu0 %v1816_v1  ;;  %1593 = vmatprep.mubr.msk.bf16.mxu1 %vm1817_vm0, %v1815_v0 }
 0x234   : > { %750 = vmatpush1.bf16.msra.mxu0 %v1881_v5  ;;  %1580 = vmatpush3.bf16.msra.mxu1 %v1900_v10 }
 0x235   : > { %751 = vmatprep.subr.bf16.mxu0 %v1885_v6  ;;  %1581 = vmatprep.subr.bf16.mxu1 %v1815_v0 }
 0x238   : > { %752 = vmatpush1.bf16.msra.mxu0 %v1892_v8  ;;  %1582 = vmatpush3.bf16.msra.mxu1 %v1913_v13 }
 0x239   : > { %753 = vmatprep.subr.bf16.mxu0 %v1895_v9  ;;  %1583 = vmatprep.subr.bf16.mxu1 %v1815_v0 }
 0x23c   : > { %754 = vmatpush1.bf16.msra.mxu0 %v1904_v11  ;;  %1584 = vmatpush3.bf16.msra.mxu1 %v1926_v16 }
 0x23d   : > { %755 = vmatprep.subr.bf16.mxu0 %v1908_v12  ;;  %1585 = vmatprep.subr.bf16.mxu1 %v1815_v0 }
 0x240   : > { %756 = vmatpush1.bf16.msra.mxu0 %v1917_v14  ;;  %1586 = vmatpush3.bf16.msra.mxu1 %v1939_v19 }
 0x241   : > { %757 = vmatprep.subr.bf16.mxu0 %v1921_v15  ;;  %1587 = vmatprep.subr.bf16.mxu1 %v1815_v0 }
 0x244   : > { %758 = vmatpush1.bf16.msra.mxu0 %v1931_v17  ;;  %1588 = vmatpush3.bf16.msra.mxu1 %v1952_v22 }
 0x245   : > { %759 = vmatprep.subr.bf16.mxu0 %v1935_v18  ;;  %1589 = vmatprep.subr.bf16.mxu1 %v1815_v0 }
 0x248   : > { %760 = vmatpush1.bf16.msra.mxu0 %v1944_v20  ;;  %1590 = vmatpush3.bf16.msra.mxu1 %v1962_v24 }
 0x249   : > { %761 = vmatprep.subr.bf16.mxu0 %v1948_v21  ;;  %1591 = vmatprep.subr.bf16.mxu1 %v1815_v0 }
 0x24c   : > { %762 = vmatpush1.bf16.msra.mxu0 %v1957_v23  ;;  %1592 = vmatpush3.bf16.msra.mxu1 %v1968_v25 }
 0x24d   : > { %854 = vmatprep.subr.bf16.mxu0 %v1870_v2  ;;  %1597 = vmatprep.subr.bf16.mxu1 %v1815_v0 }
 0x302   : > { %v674_v54 = vpop.f32.mrb[8].mxu0  ;;  %v715_v55 = vpop.f32.mrb[8].mxu1 }
 0x303   : > { %v721_v56 = vadd.f32 %v674_v54, %v636_v53  ;;  %v676_v57 = vpop.f32.mrb[9].mxu0  ;;  %v1575_v58 = vpop.f32.mrb[9].mxu1  ;;  %v731_v34 = vadd.f32 %v2020_v41, %v715_v55 }
 0x304   : > { %v678_v59 = vpop.f32.mrb[10].mxu0  ;;  %v718_v60 = vpop.f32.mrb[10].mxu1  ;;  %v726_v27 = vadd.f32 %v676_v57, %v637_v26  ;;  %v744_v58 = vunpack.c.h.bf16 %v1427_v47 }
 0x305   : > { %v722_v61 = vmul.f32 0.5, %v721_v56  ;;  %v679_v62 = vpop.f32.mrb[11].mxu0  ;;  %v1576_v63 = vpop.f32.mrb[11].mxu1 }
 0x306   : > { %v727_v28 = vmul.f32 0.5, %v726_v27  ;;  %v745_v63 = vunpack.c.h.bf16 %v2121_v30 }
 0x307   : > { %1751 = vtanh.f32 %v722_v61 }
 0x308   : > { %1753 = vtanh.f32 %v727_v28 }
 0x311   : > { %v1752_v29 = vpop.eup %1751 }
 0x312   : > { %v724_v31 = vadd.f32 1.0, %v1752_v29  ;;  %v1754_v37 = vpop.eup %1753 }
 0x313   : > { %v729_v38 = vadd.f32 1.0, %v1754_v37 }
 0x314   : > { %v725_v33 = vmul.f32 0.5, %v724_v31 }
 0x315   : > { %v730_v40 = vmul.f32 0.5, %v729_v38  ;;  %v1430_v38 = vld [vmem:[%s2013_s23 + $0x30] sm:$0xff] }
 0x316   : > { %v732_v35 = vmul.f32 %v731_v34, %v725_v33 }
 0x318   : > { %v733_v36 = vadd.f32 %v732_v35, %v638_v32 }
 0x31a   : > { %1755 = vtanh.f32 %v733_v36 }
 0x324   : > { %v1756_v39 = vpop.eup %1755 }
 0x325   : > { %v735_v42 = vsub.f32 %v2078_v51, %v1756_v39 }
 0x327   : > { %v736_v43 = vmul.f32 %v735_v42, %v730_v40 }
 0x329   : > { %v2126_v45 = vadd.f32 %v1756_v39, %v736_v43  ;;  %v850_v39 = vunpack.c.l.bf16 %v1430_v38 }
 0x32b   : > { %1426 = vst [vmem:[%s2031_s30 + $0x10] sm:$0xff] %v2126_v45  ;;  %v746_v46 = vpack.c.bf16 %v2126_v45, %v2126_v45 }
 0x32d   : > { %780 = vmatmul.mubr.bf16.vlgmr.msra.gmra.mrb[12].mxu0 %v746_v46  ;;  %1594 = vmatmul.mubr.bf16.vlgmr.msra.gmra.mrb[12].mxu1 %v746_v46 }
 0x32e   : > { %855 = vmatpush1.bf16.msra.mxu0 %v1873_v3  ;;  %1598 = vmatpush3.bf16.msra.mxu1 %v1888_v7 }
 0x32f   : > { %856 = vmatprep.subr.bf16.mxu0 %v1877_v4  ;;  %1599 = vmatprep.subr.bf16.mxu1 %v1815_v0 }
 0x330   : > { %886 = vmatprep.mubr.bf16.mxu0 %v1816_v1  ;;  %1613 = vmatprep.mubr.msk.bf16.mxu1 %vm1817_vm0, %v1815_v0 }
 0x332   : > { %857 = vmatpush1.bf16.msra.mxu0 %v1881_v5  ;;  %1600 = vmatpush3.bf16.msra.mxu1 %v1900_v10 }
 0x333   : > { %858 = vmatprep.subr.bf16.mxu0 %v1885_v6  ;;  %1601 = vmatprep.subr.bf16.mxu1 %v1815_v0 }
 0x336   : > { %859 = vmatpush1.bf16.msra.mxu0 %v1892_v8  ;;  %1602 = vmatpush3.bf16.msra.mxu1 %v1913_v13 }
 0x337   : > { %860 = vmatprep.subr.bf16.mxu0 %v1895_v9  ;;  %1603 = vmatprep.subr.bf16.mxu1 %v1815_v0 }
 0x33a   : > { %861 = vmatpush1.bf16.msra.mxu0 %v1904_v11  ;;  %1604 = vmatpush3.bf16.msra.mxu1 %v1926_v16 }
 0x33b   : > { %862 = vmatprep.subr.bf16.mxu0 %v1908_v12  ;;  %1605 = vmatprep.subr.bf16.mxu1 %v1815_v0 }
 0x33e   : > { %863 = vmatpush1.bf16.msra.mxu0 %v1917_v14  ;;  %1606 = vmatpush3.bf16.msra.mxu1 %v1939_v19 }
 0x33f   : > { %864 = vmatprep.subr.bf16.mxu0 %v1921_v15  ;;  %1607 = vmatprep.subr.bf16.mxu1 %v1815_v0 }
 0x342   : > { %865 = vmatpush1.bf16.msra.mxu0 %v1931_v17  ;;  %1608 = vmatpush3.bf16.msra.mxu1 %v1952_v22 }
 0x343   : > { %866 = vmatprep.subr.bf16.mxu0 %v1935_v18  ;;  %1609 = vmatprep.subr.bf16.mxu1 %v1815_v0 }
 0x346   : > { %867 = vmatpush1.bf16.msra.mxu0 %v1944_v20  ;;  %1610 = vmatpush3.bf16.msra.mxu1 %v1962_v24 }
 0x347   : > { %868 = vmatprep.subr.bf16.mxu0 %v1948_v21  ;;  %1611 = vmatprep.subr.bf16.mxu1 %v1815_v0 }
 0x34a   : > { %869 = vmatpush1.bf16.msra.mxu0 %v1957_v23  ;;  %1612 = vmatpush3.bf16.msra.mxu1 %v1968_v25 }
 0x34b   : > { %961 = vmatprep.subr.bf16.mxu0 %v1870_v2  ;;  %1617 = vmatprep.subr.bf16.mxu1 %v1815_v0 }
 0x400   : > { %v781_v49 = vpop.f32.mrb[12].mxu0  ;;  %v822_v50 = vpop.f32.mrb[12].mxu1 }
 0x401   : > { %v828_v51 = vadd.f32 %v781_v49, %v743_v48  ;;  %v783_v44 = vpop.f32.mrb[13].mxu0  ;;  %v1595_v52 = vpop.f32.mrb[13].mxu1  ;;  %v838_v27 = vadd.f32 %v2020_v41, %v822_v50 }
 0x402   : > { %v785_v53 = vpop.f32.mrb[14].mxu0  ;;  %v825_v54 = vpop.f32.mrb[14].mxu1  ;;  %v833_v59 = vadd.f32 %v783_v44, %v744_v58  ;;  %v851_v44 = vunpack.c.h.bf16 %v1430_v38 }
 0x403   : > { %v829_v55 = vmul.f32 0.5, %v828_v51  ;;  %v786_v56 = vpop.f32.mrb[15].mxu0  ;;  %v1596_v57 = vpop.f32.mrb[15].mxu1 }
 0x404   : > { %v834_v60 = vmul.f32 0.5, %v833_v59 }
 0x405   : > { %1757 = vtanh.f32 %v829_v55  ;;  %v2214_v55 = vld [vmem:[%s2013_s23 + $0x38] ss:$12 sps:$4 sm:$0xff]  }
 0x406   : > { %1759 = vtanh.f32 %v834_v60  ;;  %v852_v57 = vunpack.c.l.bf16 %v2214_v55 }
 0x40f   : > { %v1758_v61 = vpop.eup %1757 }
 0x410   : > { %v831_v62 = vadd.f32 1.0, %v1758_v61  ;;  %v1760_v31 = vpop.eup %1759 }
 0x411   : > { %v836_v32 = vadd.f32 1.0, %v1760_v31 }
 0x412   : > { %v832_v26 = vmul.f32 0.5, %v831_v62 }
 0x413   : > { %v837_v34 = vmul.f32 0.5, %v836_v32 }
 0x414   : > { %v839_v28 = vmul.f32 %v838_v27, %v832_v26 }
 0x416   : > { %v840_v29 = vadd.f32 %v839_v28, %v745_v63 }
 0x418   : > { %1761 = vtanh.f32 %v840_v29 }
 0x422   : > { %v1762_v33 = vpop.eup %1761 }
 0x423   : > { %v842_v35 = vsub.f32 %v2126_v45, %v1762_v33 }
 0x425   : > { %v843_v36 = vmul.f32 %v842_v35, %v837_v34 }
 0x427   : > { %v2171_v37 = vadd.f32 %v1762_v33, %v843_v36 }
 0x429   : > { %1429 = vst [vmem:[%s2031_s30 + $0x18] sm:$0xff] %v2171_v37  ;;  %v853_v30 = vpack.c.bf16 %v2171_v37, %v2171_v37 }
 0x42b   : > { %887 = vmatmul.mubr.bf16.vlgmr.msra.gmra.mrb[16].mxu0 %v853_v30  ;;  %1614 = vmatmul.mubr.bf16.vlgmr.msra.gmra.mrb[16].mxu1 %v853_v30 }
 0x42c   : > { %962 = vmatpush1.bf16.msra.mxu0 %v1873_v3  ;;  %1618 = vmatpush3.bf16.msra.mxu1 %v1888_v7 }
 0x42d   : > { %963 = vmatprep.subr.bf16.mxu0 %v1877_v4  ;;  %1619 = vmatprep.subr.bf16.mxu1 %v1815_v0 }
 0x42e   : > { %993 = vmatprep.mubr.bf16.mxu0 %v1816_v1  ;;  %1633 = vmatprep.mubr.msk.bf16.mxu1 %vm1817_vm0, %v1815_v0 }
 0x430   : > { %964 = vmatpush1.bf16.msra.mxu0 %v1881_v5  ;;  %1620 = vmatpush3.bf16.msra.mxu1 %v1900_v10 }
 0x431   : > { %965 = vmatprep.subr.bf16.mxu0 %v1885_v6  ;;  %1621 = vmatprep.subr.bf16.mxu1 %v1815_v0 }
 0x434   : > { %966 = vmatpush1.bf16.msra.mxu0 %v1892_v8  ;;  %1622 = vmatpush3.bf16.msra.mxu1 %v1913_v13 }
 0x435   : > { %967 = vmatprep.subr.bf16.mxu0 %v1895_v9  ;;  %1623 = vmatprep.subr.bf16.mxu1 %v1815_v0 }
 0x438   : > { %968 = vmatpush1.bf16.msra.mxu0 %v1904_v11  ;;  %1624 = vmatpush3.bf16.msra.mxu1 %v1926_v16 }
 0x439   : > { %969 = vmatprep.subr.bf16.mxu0 %v1908_v12  ;;  %1625 = vmatprep.subr.bf16.mxu1 %v1815_v0 }
 0x43c   : > { %970 = vmatpush1.bf16.msra.mxu0 %v1917_v14  ;;  %1626 = vmatpush3.bf16.msra.mxu1 %v1939_v19 }
 0x43d   : > { %971 = vmatprep.subr.bf16.mxu0 %v1921_v15  ;;  %1627 = vmatprep.subr.bf16.mxu1 %v1815_v0 }
 0x440   : > { %972 = vmatpush1.bf16.msra.mxu0 %v1931_v17  ;;  %1628 = vmatpush3.bf16.msra.mxu1 %v1952_v22 }
 0x441   : > { %973 = vmatprep.subr.bf16.mxu0 %v1935_v18  ;;  %1629 = vmatprep.subr.bf16.mxu1 %v1815_v0 }
 0x444   : > { %974 = vmatpush1.bf16.msra.mxu0 %v1944_v20  ;;  %1630 = vmatpush3.bf16.msra.mxu1 %v1962_v24 }
 0x445   : > { %975 = vmatprep.subr.bf16.mxu0 %v1948_v21  ;;  %1631 = vmatprep.subr.bf16.mxu1 %v1815_v0 }
 0x448   : > { %976 = vmatpush1.bf16.msra.mxu0 %v1957_v23  ;;  %1632 = vmatpush3.bf16.msra.mxu1 %v1968_v25 }
 0x449   : > { %1068 = vmatprep.subr.bf16.mxu0 %v1870_v2  ;;  %1637 = vmatprep.subr.bf16.mxu1 %v1815_v0 }
 0x4fe   : > { %v888_v40 = vpop.f32.mrb[16].mxu0  ;;  %v929_v42 = vpop.f32.mrb[16].mxu1 }
 0x4ff   : > { %v935_v43 = vadd.f32 %v888_v40, %v850_v39  ;;  %v890_v45 = vpop.f32.mrb[17].mxu0  ;;  %v1615_v46 = vpop.f32.mrb[17].mxu1  ;;  %v945_v59 = vadd.f32 %v2020_v41, %v929_v42 }
 0x500   : > { %v892_v47 = vpop.f32.mrb[18].mxu0  ;;  %v932_v48 = vpop.f32.mrb[18].mxu1  ;;  %v940_v52 = vadd.f32 %v890_v45, %v851_v44  ;;  %v959_v46 = vunpack.c.h.bf16 %v2214_v55 }
 0x501   : > { %v936_v49 = vmul.f32 0.5, %v935_v43  ;;  %v893_v50 = vpop.f32.mrb[19].mxu0  ;;  %v1616_v51 = vpop.f32.mrb[19].mxu1 }
 0x502   : > { %v941_v53 = vmul.f32 0.5, %v940_v52 }
 0x503   : > { %1763 = vtanh.f32 %v936_v49 }
 0x504   : > { %1765 = vtanh.f32 %v941_v53 }
 0x50d   : > { %v1764_v54 = vpop.eup %1763 }
 0x50e   : > { %v938_v56 = vadd.f32 1.0, %v1764_v54  ;;  %v1766_v62 = vpop.eup %1765 }
 0x50f   : > { %v943_v63 = vadd.f32 1.0, %v1766_v62 }
 0x510   : > { %v939_v58 = vmul.f32 0.5, %v938_v56 }
 0x511   : > { %v944_v27 = vmul.f32 0.5, %v943_v63 }
 0x512   : > { %v946_v60 = vmul.f32 %v945_v59, %v939_v58  ;;  %v1787_v58 = vld [vmem:[%s1867_s19] ss:$12 sps:$4 sm:$0xff]   ;;  %v1788_v59 = vld [vmem:[%s1867_s19 + $0x1c] ss:$12 sps:$4 sm:$0xff]  }
 0x514   : > { %v947_v61 = vadd.f32 %v946_v60, %v852_v57  ;;  %v1789_v60 = vld [vmem:[%s1867_s19 + $0x18] ss:$12 sps:$4 sm:$0xff]  }
 0x516   : > { %1767 = vtanh.f32 %v947_v61  ;;  %v1790_v61 = vld [vmem:[%s1867_s19 + $0x34] ss:$12 sps:$4 sm:$0xff]  }
 0x520   : > { %v1768_v26 = vpop.eup %1767 }
 0x521   : > { %v949_v28 = vsub.f32 %v2171_v37, %v1768_v26 }
 0x523   : > { %v950_v29 = vmul.f32 %v949_v28, %v944_v27 }
 0x525   : > { %v2219_v31 = vadd.f32 %v1768_v26, %v950_v29 }
 0x527   : > { %1432 = vst [vmem:[%s2031_s30 + $0x20] sm:$0xff] %v2219_v31  ;;  %v960_v32 = vpack.c.bf16 %v2219_v31, %v2219_v31 }
 0x529   : > { %994 = vmatmul.mubr.bf16.vlgmr.msra.gmra.mrb[20].mxu0 %v960_v32  ;;  %1634 = vmatmul.mubr.bf16.vlgmr.msra.gmra.mrb[20].mxu1 %v960_v32 }
 0x52a   : > { %1069 = vmatpush1.bf16.msra.mxu0 %v1873_v3  ;;  %1638 = vmatpush3.bf16.msra.mxu1 %v1888_v7  ;;  %v1433_v3 = vld [vmem:[%s2013_s23 + $0x3c] sm:$0xff] }
 0x52b   : > { %1070 = vmatprep.subr.bf16.mxu0 %v1877_v4  ;;  %1639 = vmatprep.subr.bf16.mxu1 %v1815_v0  ;;  %v957_v4 = vunpack.c.l.bf16 %v1433_v3  ;;  %v958_v40 = vunpack.c.h.bf16 %v1433_v3 }
 0x52c   : > { %1100 = vmatprep.mubr.bf16.mxu0 %v1816_v1  ;;  %1653 = vmatprep.mubr.msk.bf16.mxu1 %vm1817_vm0, %v1815_v0 }
 0x52e   : > { %1071 = vmatpush1.bf16.msra.mxu0 %v1881_v5  ;;  %1640 = vmatpush3.bf16.msra.mxu1 %v1900_v10 }
 0x52f   : > { %1072 = vmatprep.subr.bf16.mxu0 %v1885_v6  ;;  %1641 = vmatprep.subr.bf16.mxu1 %v1815_v0 }
 0x532   : > { %1073 = vmatpush1.bf16.msra.mxu0 %v1892_v8  ;;  %1642 = vmatpush3.bf16.msra.mxu1 %v1913_v13 }
 0x533   : > { %1074 = vmatprep.subr.bf16.mxu0 %v1895_v9  ;;  %1643 = vmatprep.subr.bf16.mxu1 %v1815_v0 }
 0x536   : > { %1075 = vmatpush1.bf16.msra.mxu0 %v1904_v11  ;;  %1644 = vmatpush3.bf16.msra.mxu1 %v1926_v16 }
 0x537   : > { %1076 = vmatprep.subr.bf16.mxu0 %v1908_v12  ;;  %1645 = vmatprep.subr.bf16.mxu1 %v1815_v0 }
 0x53a   : > { %1077 = vmatpush1.bf16.msra.mxu0 %v1917_v14  ;;  %1646 = vmatpush3.bf16.msra.mxu1 %v1939_v19 }
 0x53b   : > { %1078 = vmatprep.subr.bf16.mxu0 %v1921_v15  ;;  %1647 = vmatprep.subr.bf16.mxu1 %v1815_v0 }
 0x53e   : > { %1079 = vmatpush1.bf16.msra.mxu0 %v1931_v17  ;;  %1648 = vmatpush3.bf16.msra.mxu1 %v1952_v22 }
 0x53f   : > { %1080 = vmatprep.subr.bf16.mxu0 %v1935_v18  ;;  %1649 = vmatprep.subr.bf16.mxu1 %v1815_v0 }
 0x542   : > { %1081 = vmatpush1.bf16.msra.mxu0 %v1944_v20  ;;  %1650 = vmatpush3.bf16.msra.mxu1 %v1962_v24 }
 0x543   : > { %1082 = vmatprep.subr.bf16.mxu0 %v1948_v21  ;;  %1651 = vmatprep.subr.bf16.mxu1 %v1815_v0 }
 0x546   : > { %1083 = vmatpush1.bf16.msra.mxu0 %v1957_v23  ;;  %1652 = vmatpush3.bf16.msra.mxu1 %v1968_v25 }
 0x547   : > { %1175 = vmatprep.subr.bf16.mxu0 %v1870_v2  ;;  %1657 = vmatprep.subr.bf16.mxu1 %v1815_v0 }
 0x5fc   : > { %v995_v5 = vpop.f32.mrb[20].mxu0  ;;  %v1036_v6 = vpop.f32.mrb[20].mxu1 }
 0x5fd   : > { %v1042_v33 = vadd.f32 %v995_v5, %v957_v4  ;;  %v997_v34 = vpop.f32.mrb[21].mxu0  ;;  %v1635_v35 = vpop.f32.mrb[21].mxu1  ;;  %v1052_v48 = vadd.f32 %v2020_v41, %v1036_v6  ;;  %v1439_v5 = vld [vmem:[%s2013_s23 + $0x54] sm:$0xff] }
 0x5fe   : > { %v999_v36 = vpop.f32.mrb[22].mxu0  ;;  %v1039_v37 = vpop.f32.mrb[22].mxu1  ;;  %v1047_v42 = vadd.f32 %v997_v34, %v958_v40  ;;  %v1171_v6 = vunpack.c.l.bf16 %v1439_v5 }
 0x5ff   : > { %v1043_v30 = vmul.f32 0.5, %v1042_v33  ;;  %v1000_v38 = vpop.f32.mrb[23].mxu0  ;;  %v1636_v39 = vpop.f32.mrb[23].mxu1 }
 0x600   : > { %v1048_v43 = vmul.f32 0.5, %v1047_v42 }
 0x601   : > { %1769 = vtanh.f32 %v1043_v30 }
 0x602   : > { %1771 = vtanh.f32 %v1048_v43  ;;  %v1172_v43 = vunpack.c.h.bf16 %v1439_v5 }
 0x60b   : > { %v1770_v45 = vpop.eup %1769 }
 0x60c   : > { %v1045_v2 = vadd.f32 1.0, %v1770_v45  ;;  %v1772_v51 = vpop.eup %1771 }
 0x60d   : > { %v1050_v44 = vadd.f32 1.0, %v1772_v51 }
 0x60e   : > { %v1046_v47 = vmul.f32 0.5, %v1045_v2 }
 0x60f   : > { %v1051_v53 = vmul.f32 0.5, %v1050_v44 }
 0x610   : > { %v1053_v49 = vmul.f32 %v1052_v48, %v1046_v47 }
 0x612   : > { %v1054_v50 = vadd.f32 %v1053_v49, %v959_v46 }
 0x614   : > { %1773 = vtanh.f32 %v1054_v50 }
 0x61e   : > { %v1774_v52 = vpop.eup %1773 }
 0x61f   : > { %v1056_v54 = vsub.f32 %v2219_v31, %v1774_v52 }
 0x621   : > { %v1057_v56 = vmul.f32 %v1056_v54, %v1051_v53 }
 0x623   : > { %v2264_v57 = vadd.f32 %v1774_v52, %v1057_v56 }
 0x625   : > { %1435 = vst [vmem:[%s2031_s30 + $0x28] sm:$0xff] %v2264_v57  ;;  %v1067_v55 = vpack.c.bf16 %v2264_v57, %v2264_v57 }
 0x627   : > { %1101 = vmatmul.mubr.bf16.vlgmr.msra.gmra.mrb[24].mxu0 %v1067_v55  ;;  %1654 = vmatmul.mubr.bf16.vlgmr.msra.gmra.mrb[24].mxu1 %v1067_v55 }
 0x628   : > { %1176 = vmatpush1.bf16.msra.mxu0 %v1787_v58  ;;  %1658 = vmatpush3.bf16.msra.mxu1 %v1888_v7 }
 0x629   : > { %1177 = vmatprep.subr.bf16.mxu0 %v1788_v59  ;;  %1659 = vmatprep.subr.bf16.mxu1 %v1815_v0 }
 0x62a   : > { %1207 = vmatprep.mubr.bf16.mxu0 %v1816_v1  ;;  %1673 = vmatprep.mubr.msk.bf16.mxu1 %vm1817_vm0, %v1815_v0  ;;  %v1436_v1 = vld [vmem:[%s2013_s23 + $0x48] sm:$0xff] }
 0x62b   : > { %v1064_v7 = vunpack.c.l.bf16 %v1436_v1 }
 0x62c   : > { %1178 = vmatpush1.bf16.msra.mxu0 %v1789_v60  ;;  %1660 = vmatpush3.bf16.msra.mxu1 %v1900_v10 }
 0x62d   : > { %1179 = vmatprep.subr.bf16.mxu0 %v1790_v61  ;;  %1661 = vmatprep.subr.bf16.mxu1 %v1815_v0 }
 0x630   : > { %1180 = vmatpush1.bf16.msra.mxu0 %v1892_v8  ;;  %1662 = vmatpush3.bf16.msra.mxu1 %v1913_v13 }
 0x631   : > { %1181 = vmatprep.subr.bf16.mxu0 %v1895_v9  ;;  %1663 = vmatprep.subr.bf16.mxu1 %v1815_v0 }
 0x634   : > { %1182 = vmatpush1.bf16.msra.mxu0 %v1904_v11  ;;  %1664 = vmatpush3.bf16.msra.mxu1 %v1926_v16 }
 0x635   : > { %1183 = vmatprep.subr.bf16.mxu0 %v1908_v12  ;;  %1665 = vmatprep.subr.bf16.mxu1 %v1815_v0 }
 0x638   : > { %1184 = vmatpush1.bf16.msra.mxu0 %v1917_v14  ;;  %1666 = vmatpush3.bf16.msra.mxu1 %v1939_v19 }
 0x639   : > { %1185 = vmatprep.subr.bf16.mxu0 %v1921_v15  ;;  %1667 = vmatprep.subr.bf16.mxu1 %v1815_v0 }
 0x63c   : > { %1186 = vmatpush1.bf16.msra.mxu0 %v1931_v17  ;;  %1668 = vmatpush3.bf16.msra.mxu1 %v1952_v22 }
 0x63d   : > { %1187 = vmatprep.subr.bf16.mxu0 %v1935_v18  ;;  %1669 = vmatprep.subr.bf16.mxu1 %v1815_v0  ;;  %v1065_v18 = vunpack.c.h.bf16 %v1436_v1 }
 0x640   : > { %1188 = vmatpush1.bf16.msra.mxu0 %v1944_v20  ;;  %1670 = vmatpush3.bf16.msra.mxu1 %v1962_v24 }
 0x641   : > { %1189 = vmatprep.subr.bf16.mxu0 %v1948_v21  ;;  %1671 = vmatprep.subr.bf16.mxu1 %v1815_v0  ;;  %v1437_v21 = vld [vmem:[%s2013_s23 + $0x50] ss:$12 sps:$4 sm:$0xff]  }
 0x642   : > { %v1173_v48 = vunpack.c.h.bf16 %v1437_v21 }
 0x644   : > { %1190 = vmatpush1.bf16.msra.mxu0 %v1957_v23  ;;  %1672 = vmatpush3.bf16.msra.mxu1 %v1968_v25  ;;  %v1066_v23 = vunpack.c.l.bf16 %v1437_v21 }
 0x6fa   : > { %v1102_v8 = vpop.f32.mrb[24].mxu0  ;;  %v1143_v9 = vpop.f32.mrb[24].mxu1 }
 0x6fb   : > { %v1149_v10 = vadd.f32 %v1102_v8, %v1064_v7  ;;  %v1104_v11 = vpop.f32.mrb[25].mxu0  ;;  %v1655_v12 = vpop.f32.mrb[25].mxu1  ;;  %v1159_v25 = vadd.f32 %v2020_v41, %v1143_v9 }
 0x6fc   : > { %v1106_v13 = vpop.f32.mrb[26].mxu0  ;;  %v1146_v14 = vpop.f32.mrb[26].mxu1  ;;  %v1154_v0 = vadd.f32 %v1104_v11, %v1065_v18 }
 0x6fd   : > { %v1150_v15 = vmul.f32 0.5, %v1149_v10  ;;  %v1107_v16 = vpop.f32.mrb[27].mxu0  ;;  %v1656_v17 = vpop.f32.mrb[27].mxu1 }
 0x6fe   : > { %v1155_v19 = vmul.f32 0.5, %v1154_v0 }
 0x6ff   : > { %1775 = vtanh.f32 %v1150_v15 }
 0x700   : > { %1777 = vtanh.f32 %v1155_v19 }
 0x709   : > { %v1776_v20 = vpop.eup %1775 }
 0x70a   : > { %v1152_v22 = vadd.f32 1.0, %v1776_v20  ;;  %v1778_v26 = vpop.eup %1777 }
 0x70b   : > { %v1157_v27 = vadd.f32 1.0, %v1778_v26 }
 0x70c   : > { %v1153_v24 = vmul.f32 0.5, %v1152_v22 }
 0x70d   : > { %v1158_v29 = vmul.f32 0.5, %v1157_v27 }
 0x70e   : > { %v1160_v62 = vmul.f32 %v1159_v25, %v1153_v24 }
 0x710   : > { %v1161_v63 = vadd.f32 %v1160_v62, %v1066_v23 }
 0x712   : > { %1779 = vtanh.f32 %v1161_v63 }
 0x71c   : > { %v1780_v28 = vpop.eup %1779 }
 0x71d   : > { %v1163_v31 = vsub.f32 %v2264_v57, %v1780_v28 }
 0x71f   : > { %v1164_v32 = vmul.f32 %v1163_v31, %v1158_v29 }
 0x721   : > { %v1165_v3 = vadd.f32 %v1780_v28, %v1164_v32 }
 0x723   : > { %1438 = vst [vmem:[%s2031_s30 + $0x30] sm:$0xff] %v1165_v3  ;;  %v1174_v4 = vpack.c.bf16 %v1165_v3, %v1165_v3 }
 0x725   : > { %1208 = vmatmul.mubr.bf16.vlgmr.msra.gmra.mrb[28].mxu0 %v1174_v4  ;;  %1674 = vmatmul.mubr.bf16.vlgmr.msra.gmra.mrb[28].mxu1 %v1174_v4 }
 0x7f8   : > { %v1209_v33 = vpop.f32.mrb[28].mxu0  ;;  %v1250_v34 = vpop.f32.mrb[28].mxu1 }
 0x7f9   : > { %v1256_v35 = vadd.f32 %v1209_v33, %v1171_v6  ;;  %v1211_v36 = vpop.f32.mrb[29].mxu0  ;;  %v1675_v37 = vpop.f32.mrb[29].mxu1  ;;  %v1266_v50 = vadd.f32 %v2020_v41, %v1250_v34 }
 0x7fa   : > { %v1213_v30 = vpop.f32.mrb[30].mxu0  ;;  %v1253_v38 = vpop.f32.mrb[30].mxu1  ;;  %v1261_v45 = vadd.f32 %v1211_v36, %v1172_v43 }
 0x7fb   : > { %v1257_v39 = vmul.f32 0.5, %v1256_v35  ;;  %v1214_v40 = vpop.f32.mrb[31].mxu0  ;;  %v1676_v42 = vpop.f32.mrb[31].mxu1 }
 0x7fc   : > { %v1262_v2 = vmul.f32 0.5, %v1261_v45 }
 0x7fd   : > { %1781 = vtanh.f32 %v1257_v39 }
 0x7fe   : > { %1783 = vtanh.f32 %v1262_v2 }
 0x807   : > { %v1782_v46 = vpop.eup %1781 }
 0x808   : > { %v1259_v47 = vadd.f32 1.0, %v1782_v46  ;;  %v1784_v52 = vpop.eup %1783 }
 0x809   : > { %v1264_v53 = vadd.f32 1.0, %v1784_v52 }
 0x80a   : > { %v1260_v49 = vmul.f32 0.5, %v1259_v47 }
 0x80b   : > { %v1265_v56 = vmul.f32 0.5, %v1264_v53 }
 0x80c   : > { %v1267_v51 = vmul.f32 %v1266_v50, %v1260_v49 }
 0x80e   : > { %v1268_v44 = vadd.f32 %v1267_v51, %v1173_v48 }
 0x810   : > { %1785 = vtanh.f32 %v1268_v44 }
 0x81a   : > { %v1786_v54 = vpop.eup %1785 }
 0x81b   : > { %v1270_v57 = vsub.f32 %v1165_v3, %v1786_v54 }
 0x81d   : > { %v1271_v55 = vmul.f32 %v1270_v57, %v1265_v56 }
 0x81f   : > { %v1272_v58 = vadd.f32 %v1786_v54, %v1271_v55 }
 0x821   : > { %1441 = vst [vmem:[%s2031_s30 + $0x38] sm:$0xff] %v1272_v58 }
 0x822 PF: > { %s13_s14 = sadd.s32 1, %s1813_s14   ;;  %s2324_s12 = smov %s1809_s13 }
 0x823   : > { %p10_p5 = scmp.ge.s32.totalorder %s13_s14, 4   ;;  %s2325_s13 = smov %s2327_s15 }
 0x825   :  { %12 = sbr.rel (!%p10_p5) target bundleno = 2 (0x2), region = 86 }

</bundles_post_ra>
